<compile_context>
chip_gen: v7x
topology: tpu7x:2x2x1
jax: 0.10.0
libtpu: 0.0.40
codegen_flags: <defaults>
</compile_context>

<pallas_src>
import jax
import jax.numpy as jnp
from jax.experimental import pallas as pl
from jax.experimental.pallas import tpu as pltpu

EPS = 1e-5
LANE = 128


# ------------------------------ small helpers -------------------------------

def _round_up(x, m):
    return ((x + m - 1) // m) * m


def _pick_row_tile(r, target=256):
    # Largest tile <= target (multiple of 8) that evenly divides R.
    t = min(target, r)
    for cand in (t, 512, 256, 128, 64, 32, 16, 8):
        if cand <= t and r % cand == 0:
            return cand
    return r


def _finalize_bn(stats, count, gamma, beta):
    """Fold per-tile (sum, sum_sq) into BN scale/bias (training-mode stats)."""
    s = jnp.sum(stats[:, 0, :], axis=0)          # (C,)
    sq = jnp.sum(stats[:, 1, :], axis=0)         # (C,)
    mean = s / count
    var = jnp.maximum(sq / count - mean * mean, 0.0)   # biased variance
    scale = gamma * jax.lax.rsqrt(var + EPS)           # (1, C)
    bias = beta - mean * scale                          # (1, C)
    return scale.reshape(1, -1), bias.reshape(1, -1)


# ------------------------------- Pallas kernels ------------------------------

def _emit_stats(y_f32, st_ref):
    s = jnp.sum(y_f32, axis=0, keepdims=True)            # (1, C)
    sq = jnp.sum(y_f32 * y_f32, axis=0, keepdims=True)   # (1, C)
    st_ref[...] = jnp.concatenate([s, sq], axis=0)[None]  # (1, 2, C)


def conv_stats_kernel(x_ref, w_ref, y_ref, st_ref):
    # (TR, Cin) @ (Cin, Cout) in bf16, f32 accumulation; emit raw y + stats.
    y = jnp.dot(x_ref[...].astype(jnp.bfloat16), w_ref[...],
                preferred_element_type=jnp.float32)
    _emit_stats(y, st_ref)
    y_ref[...] = y.astype(y_ref.dtype)


def bn_relu_conv_stats_kernel(x_ref, s_ref, b_ref, w_ref, y_ref, st_ref):
    # prologue: BN (precomputed scale/bias) + ReLU of the previous stage,
    # then (TR, Cin) @ (Cin, Cout); emit raw y + stats.
    a = jnp.maximum(x_ref[...].astype(jnp.float32) * s_ref[...] + b_ref[...], 0.0)
    y = jnp.dot(a.astype(jnp.bfloat16), w_ref[...],
                preferred_element_type=jnp.float32)
    _emit_stats(y, st_ref)
    y_ref[...] = y.astype(y_ref.dtype)


def bn_relu_conv3x3_stats_kernel(xp_ref, s_ref, b_ref, w_ref, y_ref, st_ref):
    # xp_ref: (1, H+2, W+2, C) raw conv1 output, spatially zero-padded.
    # Prologue BN1+ReLU (border re-zeroed = conv zero-padding), then the 3x3
    # conv as 9 shifted (H*W, C) @ (C, Cout) matmuls accumulated in f32.
    _, hp, wp, c = xp_ref.shape
    _, hw, cout = y_ref.shape
    h, wd = hp - 2, wp - 2

    xp = xp_ref[0].astype(jnp.float32)                       # (hp, wp, c)
    a = jnp.maximum(xp * s_ref[...] + b_ref[...], 0.0)

    rows = jax.lax.broadcasted_iota(jnp.int32, (hp, wp, 1), 0)
    cols = jax.lax.broadcasted_iota(jnp.int32, (hp, wp, 1), 1)
    interior = (rows >= 1) & (rows <= h) & (cols >= 1) & (cols <= wd)
    a = jnp.where(interior, a, 0.0).astype(jnp.bfloat16)

    acc = jnp.zeros((hw, cout), jnp.float32)
    for t in range(9):
        dy, dx = t // 3, t % 3
        patch = a[dy:dy + h, dx:dx + wd, :].reshape(hw, c)
        acc = acc + jnp.dot(patch, w_ref[t], preferred_element_type=jnp.float32)

    _emit_stats(acc, st_ref)
    y_ref[...] = acc[None].astype(y_ref.dtype)


def bn_add_relu_kernel(y_ref, r_ref, s_ref, b_ref, o_ref):
    # Final epilogue: BN3 (precomputed scale/bias) + residual add + ReLU.
    y = y_ref[...].astype(jnp.float32) * s_ref[...] + b_ref[...]
    o_ref[...] = jnp.maximum(y + r_ref[...].astype(jnp.float32),
                             0.0).astype(o_ref.dtype)


# ------------------------------ pallas_call glue -----------------------------

_PARALLEL = pltpu.CompilerParams(dimension_semantics=("parallel",))


def _conv_stats(x2d, w, tr):
    r, cin = x2d.shape
    cout = w.shape[1]
    nt = r // tr
    return pl.pallas_call(
        conv_stats_kernel,
        out_shape=(jax.ShapeDtypeStruct((r, cout), jnp.bfloat16),
                   jax.ShapeDtypeStruct((nt, 2, cout), jnp.float32)),
        grid=(nt,),
        in_specs=[pl.BlockSpec((tr, cin), lambda i: (i, 0)),
                  pl.BlockSpec((cin, cout), lambda i: (0, 0))],
        out_specs=(pl.BlockSpec((tr, cout), lambda i: (i, 0)),
                   pl.BlockSpec((1, 2, cout), lambda i: (i, 0, 0))),
        compiler_params=_PARALLEL,
    )(x2d, w)


def _bn_relu_conv_stats(x2d, s, b, w, tr):
    r, cin = x2d.shape
    cout = w.shape[1]
    nt = r // tr
    return pl.pallas_call(
        bn_relu_conv_stats_kernel,
        out_shape=(jax.ShapeDtypeStruct((r, cout), jnp.bfloat16),
                   jax.ShapeDtypeStruct((nt, 2, cout), jnp.float32)),
        grid=(nt,),
        in_specs=[pl.BlockSpec((tr, cin), lambda i: (i, 0)),
                  pl.BlockSpec((1, cin), lambda i: (0, 0)),
                  pl.BlockSpec((1, cin), lambda i: (0, 0)),
                  pl.BlockSpec((cin, cout), lambda i: (0, 0))],
        out_specs=(pl.BlockSpec((tr, cout), lambda i: (i, 0)),
                   pl.BlockSpec((1, 2, cout), lambda i: (i, 0, 0))),
        compiler_params=_PARALLEL,
    )(x2d, s, b, w)


def _bn_relu_conv3x3_stats(xpad, s, b, w2):
    n, hp, wp, c = xpad.shape
    h, wd = hp - 2, wp - 2
    hw = h * wd
    cout = w2.shape[2]
    return pl.pallas_call(
        bn_relu_conv3x3_stats_kernel,
        out_shape=(jax.ShapeDtypeStruct((n, hw, cout), jnp.bfloat16),
                   jax.ShapeDtypeStruct((n, 2, cout), jnp.float32)),
        grid=(n,),
        in_specs=[pl.BlockSpec((1, hp, wp, c), lambda i: (i, 0, 0, 0)),
                  pl.BlockSpec((1, c), lambda i: (0, 0)),
                  pl.BlockSpec((1, c), lambda i: (0, 0)),
                  pl.BlockSpec((9, c, cout), lambda i: (0, 0, 0))],
        out_specs=(pl.BlockSpec((1, hw, cout), lambda i: (i, 0, 0)),
                   pl.BlockSpec((1, 2, cout), lambda i: (i, 0, 0))),
        compiler_params=_PARALLEL,
    )(xpad, s, b, w2)


def _bn_add_relu(y2d, r2d, s, b, tr):
    r, c = y2d.shape
    nt = r // tr
    return pl.pallas_call(
        bn_add_relu_kernel,
        out_shape=jax.ShapeDtypeStruct((r, c), jnp.float32),
        grid=(nt,),
        in_specs=[pl.BlockSpec((tr, c), lambda i: (i, 0)),
                  pl.BlockSpec((tr, c), lambda i: (i, 0)),
                  pl.BlockSpec((1, c), lambda i: (0, 0)),
                  pl.BlockSpec((1, c), lambda i: (0, 0))],
        out_specs=pl.BlockSpec((tr, c), lambda i: (i, 0)),
        compiler_params=_PARALLEL,
    )(y2d, r2d, s, b)


# ------------------------------ Bottleneck forward ---------------------------

def bottleneck_forward(x_nchw, params):
    # stride=1, downsample=None (module defaults); requires inplanes == 4*planes.
    n, cin, h, w = x_nchw.shape
    pp = params["w1"].shape[1]       # padded planes
    cp = params["w3"].shape[1]       # padded 4*planes (== padded inplanes)
    r = n * h * w
    tr = _pick_row_tile(r)

    x = jnp.transpose(x_nchw, (0, 2, 3, 1)).reshape(r, cin)   # NCHW -> (R, Cin)
    if cp != cin:
        x = jnp.pad(x, ((0, 0), (0, cp - cin)))                # lane padding

    # ---- stage 1: conv1 (1x1) ------------------------------------------------
    y1, st1 = _conv_stats(x, params["w1"], tr)
    s1, b1 = _finalize_bn(st1, r, params["g1"], params["b1"])

    # ---- stage 2: bn1+relu prologue, conv2 (3x3, stride 1, pad 1) -------------
    y1p = jnp.pad(y1.reshape(n, h, w, pp), ((0, 0), (1, 1), (1, 1), (0, 0)))
    y2, st2 = _bn_relu_conv3x3_stats(y1p, s1, b1, params["w2"])
    s2, b2 = _finalize_bn(st2, r, params["g2"], params["b2"])
    y2 = y2.reshape(r, pp)

    # ---- stage 3: bn2+relu prologue, conv3 (1x1 -> 4*planes) ------------------
    y3, st3 = _bn_relu_conv_stats(y2, s2, b2, params["w3"], tr)
    s3, b3 = _finalize_bn(st3, r, params["g3"], params["b3"])

    # ---- stage 4: bn3 + residual add + relu -----------------------------------
    out = _bn_add_relu(y3, x, s3, b3, tr)                     # (R, Cp) f32
    out = out[:, :cin].reshape(n, h, w, cin)
    return jnp.transpose(out, (0, 3, 1, 2))                   # NHWC -> NCHW


# ------------------------------ parameter init -------------------------------

def init_params(key, inplanes, planes):
    assert inplanes == planes * 4, "downsample=None requires inplanes == 4*planes"
    k1, k2, k3 = jax.random.split(key, 3)
    # PyTorch conv weight shapes: (Cout, Cin, kH, kW), bias=False
    w1 = jax.random.normal(k1, (planes, inplanes, 1, 1), jnp.float32) * (2.0 / inplanes) ** 0.5
    w2 = jax.random.normal(k2, (planes, planes, 3, 3), jnp.float32) * (2.0 / (9 * planes)) ** 0.5
    w3 = jax.random.normal(k3, (4 * planes, planes, 1, 1), jnp.float32) * (2.0 / planes) ** 0.5

    # matmul-friendly (cin, cout) layouts for the reference
    w1m = jnp.transpose(w1[:, :, 0, 0], (1, 0))                               # (Cin, P)
    w2m = jnp.transpose(w2, (2, 3, 1, 0)).reshape(9, planes, planes)          # (9, P, P), t = dy*3+dx
    w3m = jnp.transpose(w3[:, :, 0, 0], (1, 0))                               # (P, 4P)

    pp = _round_up(planes, LANE)
    cp = _round_up(4 * planes, LANE)

    # zero-padded, bf16 kernel weights (lane-dense, MXU-friendly)
    w1k = jnp.zeros((cp, pp), jnp.float32).at[:inplanes, :planes].set(w1m)
    w2k = jnp.zeros((9, pp, pp), jnp.float32).at[:, :planes, :planes].set(w2m)
    w3k = jnp.zeros((pp, cp), jnp.float32).at[:planes, :4 * planes].set(w3m)

    params = {
        "w1": w1k.astype(jnp.bfloat16),
        "w2": w2k.astype(jnp.bfloat16),
        "w3": w3k.astype(jnp.bfloat16),
        # BatchNorm affine params (PyTorch init: weight=1, bias=0), padded
        "g1": jnp.ones((1, pp), jnp.float32), "b1": jnp.zeros((1, pp), jnp.float32),
        "g2": jnp.ones((1, pp), jnp.float32), "b2": jnp.zeros((1, pp), jnp.float32),
        "g3": jnp.ones((1, cp), jnp.float32), "b3": jnp.zeros((1, cp), jnp.float32),
    }
    ref_w = {"w1": w1m, "w2": w2m, "w3": w3m}
    return params, ref_w


# ------------------------------ pure-JAX reference ---------------------------

def reference_forward(x_nchw, ref_w):
    def bn(y):  # training-mode BN: batch mean, biased variance, gamma=1, beta=0
        mean = jnp.mean(y, axis=(0, 1, 2), keepdims=True)
        var = jnp.mean((y - mean) ** 2, axis=(0, 1, 2), keepdims=True)
        return (y - mean) * jax.lax.rsqrt(var + EPS)

    x = jnp.transpose(x_nchw, (0, 2, 3, 1))
    n, h, w, _ = x.shape
    y = jnp.maximum(bn(jnp.einsum("nhwc,cd->nhwd", x, ref_w["w1"])), 0.0)
    yp = jnp.pad(y, ((0, 0), (1, 1), (1, 1), (0, 0)))
    z = sum(jnp.einsum("nhwc,cd->nhwd", yp[:, dy:dy + h, dx:dx + w, :],
                       ref_w["w2"][dy * 3 + dx])
            for dy in range(3) for dx in range(3))
    z = jnp.maximum(bn(z), 0.0)
    u = jnp.maximum(bn(jnp.einsum("nhwc,cd->nhwd", z, ref_w["w3"])) + x, 0.0)
    return jnp.transpose(u, (0, 3, 1, 2))


# ----------------------------------- main ------------------------------------

if __name__ == "__main__":
    key = jax.random.PRNGKey(0)
    kx, kp = jax.random.split(key)

    planes = 4
    inplanes = planes * 4          # required so the residual add works (downsample=None)
    n, h, w = 2, 16, 16

    x = jax.random.normal(kx, (n, inplanes, h, w), jnp.float32)   # NCHW, like PyTorch
    params, ref_w = init_params(kp, inplanes, planes)

    fwd = jax.jit(bottleneck_forward)
    y = jax.block_until_ready(fwd(x, params))

    assert y.shape == (n, 4 * planes, h, w)
    assert bool(jnp.all(y >= 0.0))              # ReLU output
    assert bool(jnp.all(jnp.isfinite(y)))

    # loose tolerance: intermediates stored/fed to the MXU in bf16
    y_ref = reference_forward(x, ref_w)
    max_err = float(jnp.max(jnp.abs(y - y_ref)))
    assert max_err < 0.15, f"mismatch vs f32 reference: {max_err}"

    print("KERNEL_OK")
</pallas_src>

<mosaic_0001>
module attributes {stable_mosaic.version = 11 : i64} {
  func.func @conv_stats_kernel(%arg0: i32, %arg1: memref<256x128xf32, #tpu.memory_space<vmem>>, %arg2: memref<128x128xbf16, #tpu.memory_space<vmem>>, %arg3: memref<256x128xbf16, #tpu.memory_space<vmem>>, %arg4: memref<1x2x128xf32, #tpu.memory_space<vmem>>) attributes {dimension_semantics = [#tpu.dimension_semantics<parallel>], iteration_bounds = array<i64: 2>, scalar_prefetch = 0 : i64, scratch_operands = 0 : i64, tpu.core_type = #tpu.core_type<tc>, window_params = [{transform_indices = @transform_0, window_bounds = array<i64: 256, 128>}, {pipeline_mode = #tpu.pipeline_mode<synchronous>, transform_indices = @transform_1, window_bounds = array<i64: 128, 128>}, {transform_indices = @transform_2, window_bounds = array<i64: 256, 128>}, {transform_indices = @transform_3, window_bounds = array<i64: 1, 2, 128>}]} {
    %c0 = arith.constant 0 : index
    %c0_0 = arith.constant 0 : index
    %0 = vector.load %arg1[%c0, %c0_0] : memref<256x128xf32, #tpu.memory_space<vmem>>, vector<256x128xf32>
    %1 = arith.truncf %0 : vector<256x128xf32> to vector<256x128xbf16>
    %c0_1 = arith.constant 0 : index
    %c0_2 = arith.constant 0 : index
    %2 = vector.load %arg2[%c0_1, %c0_2] : memref<128x128xbf16, #tpu.memory_space<vmem>>, vector<128x128xbf16>
    %cst = arith.constant dense<0.000000e+00> : vector<256x128xf32>
    %3 = tpu.matmul %1, %2, %cst {dimension_numbers = #tpu.dot_dimension_numbers<[1], [0], [0], [1], [0, 0, 1, 1], [], []>} : vector<256x128xbf16>, vector<128x128xbf16>, vector<256x128xf32> -> vector<256x128xf32>
    %cst_3 = arith.constant dense<0.000000e+00> : vector<128xf32>
    %4 = vector.multi_reduction <add>, %3, %cst_3 [0] : vector<256x128xf32> to vector<128xf32>
    %5 = vector.shape_cast %4 : vector<128xf32> to vector<1x128xf32>
    %6 = arith.mulf %3, %3 : vector<256x128xf32>
    %cst_4 = arith.constant dense<0.000000e+00> : vector<128xf32>
    %7 = vector.multi_reduction <add>, %6, %cst_4 [0] : vector<256x128xf32> to vector<128xf32>
    %8 = vector.shape_cast %7 : vector<128xf32> to vector<1x128xf32>
    %9 = tpu.concatenate %5, %8 in 0 : vector<1x128xf32>, vector<1x128xf32> -> vector<2x128xf32>
    %10 = vector.shape_cast %9 : vector<2x128xf32> to vector<1x2x128xf32>
    %c0_5 = arith.constant 0 : index
    %c0_6 = arith.constant 0 : index
    %c0_7 = arith.constant 0 : index
    %11 = vector.load %arg4[%c0_5, %c0_6, %c0_7] : memref<1x2x128xf32, #tpu.memory_space<vmem>>, vector<1x2x128xf32>
    tpu.vector_store %arg4[%c0_5, %c0_6, %c0_7], %10 {strides = array<i32>} : memref<1x2x128xf32, #tpu.memory_space<vmem>>, vector<1x2x128xf32>,
    %12 = arith.truncf %3 : vector<256x128xf32> to vector<256x128xbf16>
    %c0_8 = arith.constant 0 : index
    %c0_9 = arith.constant 0 : index
    %13 = vector.load %arg3[%c0_8, %c0_9] : memref<256x128xbf16, #tpu.memory_space<vmem>>, vector<256x128xbf16>
    tpu.vector_store %arg3[%c0_8, %c0_9], %12 {strides = array<i32>} : memref<256x128xbf16, #tpu.memory_space<vmem>>, vector<256x128xbf16>,
    return
  }
  func.func @transform_0(%arg0: i32) -> (i32, i32) {
    %c0_i32 = arith.constant 0 : i32
    %c0_i32_0 = arith.constant 0 : i32
    return %arg0, %c0_i32 : i32, i32
  }
  func.func @transform_1(%arg0: i32) -> (i32, i32) {
    %c0_i32 = arith.constant 0 : i32
    %c0_i32_0 = arith.constant 0 : i32
    %c0_i32_1 = arith.constant 0 : i32
    return %c0_i32, %c0_i32_0 : i32, i32
  }
  func.func @transform_2(%arg0: i32) -> (i32, i32) {
    %c0_i32 = arith.constant 0 : i32
    %c0_i32_0 = arith.constant 0 : i32
    return %arg0, %c0_i32 : i32, i32
  }
  func.func @transform_3(%arg0: i32) -> (i32, i32, i32) {
    %c0_i32 = arith.constant 0 : i32
    %c0_i32_0 = arith.constant 0 : i32
    %c0_i32_1 = arith.constant 0 : i32
    return %arg0, %c0_i32, %c0_i32_0 : i32, i32, i32
  }
}

module attributes {stable_mosaic.version = 11 : i64} {
  func.func @bn_relu_conv3x3_stats_kernel(%arg0: i32, %arg1: memref<1x18x18x128xbf16, #tpu.memory_space<vmem>>, %arg2: memref<1x128xf32, #tpu.memory_space<vmem>>, %arg3: memref<1x128xf32, #tpu.memory_space<vmem>>, %arg4: memref<9x128x128xbf16, #tpu.memory_space<vmem>>, %arg5: memref<1x256x128xbf16, #tpu.memory_space<vmem>>, %arg6: memref<1x2x128xf32, #tpu.memory_space<vmem>>) attributes {dimension_semantics = [#tpu.dimension_semantics<parallel>], iteration_bounds = array<i64: 2>, scalar_prefetch = 0 : i64, scratch_operands = 0 : i64, tpu.core_type = #tpu.core_type<tc>, window_params = [{transform_indices = @transform_0, window_bounds = array<i64: 1, 18, 18, 128>}, {pipeline_mode = #tpu.pipeline_mode<synchronous>, transform_indices = @transform_1, window_bounds = array<i64: 1, 128>}, {pipeline_mode = #tpu.pipeline_mode<synchronous>, transform_indices = @transform_2, window_bounds = array<i64: 1, 128>}, {pipeline_mode = #tpu.pipeline_mode<synchronous>, transform_indices = @transform_3, window_bounds = array<i64: 9, 128, 128>}, {transform_indices = @transform_4, window_bounds = array<i64: 1, 256, 128>}, {transform_indices = @transform_5, window_bounds = array<i64: 1, 2, 128>}]} {
    %c0 = arith.constant 0 : index
    %c0_0 = arith.constant 0 : index
    %c0_1 = arith.constant 0 : index
    %c0_2 = arith.constant 0 : index
    %0 = vector.load %arg1[%c0, %c0_0, %c0_1, %c0_2] : memref<1x18x18x128xbf16, #tpu.memory_space<vmem>>, vector<1x18x18x128xbf16>
    %1 = vector.shape_cast %0 : vector<1x18x18x128xbf16> to vector<18x18x128xbf16>
    %2 = arith.extf %1 : vector<18x18x128xbf16> to vector<18x18x128xf32>
    %c0_3 = arith.constant 0 : index
    %c0_4 = arith.constant 0 : index
    %3 = vector.load %arg2[%c0_3, %c0_4] : memref<1x128xf32, #tpu.memory_space<vmem>>, vector<1x128xf32>
    %4 = vector.shape_cast %3 : vector<1x128xf32> to vector<1x1x128xf32>
    %5 = vector.broadcast %4 : vector<1x1x128xf32> to vector<18x18x128xf32>
    %6 = arith.mulf %2, %5 : vector<18x18x128xf32>
    %c0_5 = arith.constant 0 : index
    %c0_6 = arith.constant 0 : index
    %7 = vector.load %arg3[%c0_5, %c0_6] : memref<1x128xf32, #tpu.memory_space<vmem>>, vector<1x128xf32>
    %8 = vector.shape_cast %7 : vector<1x128xf32> to vector<1x1x128xf32>
    %9 = vector.broadcast %8 : vector<1x1x128xf32> to vector<18x18x128xf32>
    %10 = arith.addf %6, %9 : vector<18x18x128xf32>
    %cst = arith.constant 0.000000e+00 : f32
    %11 = vector.broadcast %cst : f32 to vector<18x18x128xf32>
    %12 = arith.maximumf %10, %11 : vector<18x18x128xf32>
    %13 = tpu.iota {dimensions = array<i32: 0>} : vector<18x18x1xi32>
    %14 = tpu.iota {dimensions = array<i32: 1>} : vector<18x18x1xi32>
    %c1_i32 = arith.constant 1 : i32
    %15 = vector.broadcast %c1_i32 : i32 to vector<18x18x1xi32>
    %16 = arith.cmpi sge, %13, %15 : vector<18x18x1xi32>
    %c16_i32 = arith.constant 16 : i32
    %17 = vector.broadcast %c16_i32 : i32 to vector<18x18x1xi32>
    %18 = arith.cmpi sle, %13, %17 : vector<18x18x1xi32>
    %19 = arith.andi %16, %18 : vector<18x18x1xi1>
    %c1_i32_7 = arith.constant 1 : i32
    %20 = vector.broadcast %c1_i32_7 : i32 to vector<18x18x1xi32>
    %21 = arith.cmpi sge, %14, %20 : vector<18x18x1xi32>
    %22 = arith.andi %19, %21 : vector<18x18x1xi1>
    %c16_i32_8 = arith.constant 16 : i32
    %23 = vector.broadcast %c16_i32_8 : i32 to vector<18x18x1xi32>
    %24 = arith.cmpi sle, %14, %23 : vector<18x18x1xi32>
    %25 = arith.andi %22, %24 : vector<18x18x1xi1>
    %cst_9 = arith.constant 0.000000e+00 : f32
    %26 = vector.shape_cast %25 : vector<18x18x1xi1> to vector<18x18x1xi1>
    %27 = vector.broadcast %26 : vector<18x18x1xi1> to vector<18x18x128xi1>
    %28 = vector.broadcast %cst_9 : f32 to vector<18x18x128xf32>
    %29 = arith.select %27, %12, %28 : vector<18x18x128xi1>, vector<18x18x128xf32>
    %30 = arith.truncf %29 : vector<18x18x128xf32> to vector<18x18x128xbf16>
    %cst_10 = arith.constant 0.000000e+00 : f32
    %31 = vector.broadcast %cst_10 : f32 to vector<256x128xf32>
    %32 = vector.extract_strided_slice %30 {offsets = [0, 0, 0], sizes = [16, 16, 128], strides = [1, 1, 1]} : vector<18x18x128xbf16> to vector<16x16x128xbf16>
    %33 = vector.shape_cast %32 : vector<16x16x128xbf16> to vector<256x128xbf16>
    %c0_11 = arith.constant 0 : index
    %c0_12 = arith.constant 0 : index
    %c0_13 = arith.constant 0 : index
    %34 = vector.load %arg4[%c0_11, %c0_12, %c0_13] : memref<9x128x128xbf16, #tpu.memory_space<vmem>>, vector<1x128x128xbf16>
    %35 = vector.shape_cast %34 : vector<1x128x128xbf16> to vector<128x128xbf16>
    %cst_14 = arith.constant dense<0.000000e+00> : vector<256x128xf32>
    %36 = tpu.matmul %33, %35, %cst_14 {dimension_numbers = #tpu.dot_dimension_numbers<[1], [0], [0], [1], [0, 0, 1, 1], [], []>} : vector<256x128xbf16>, vector<128x128xbf16>, vector<256x128xf32> -> vector<256x128xf32>
    %37 = arith.addf %31, %36 : vector<256x128xf32>
    %38 = vector.extract_strided_slice %30 {offsets = [0, 1, 0], sizes = [16, 16, 128], strides = [1, 1, 1]} : vector<18x18x128xbf16> to vector<16x16x128xbf16>
    %39 = vector.shape_cast %38 : vector<16x16x128xbf16> to vector<256x128xbf16>
    %c1 = arith.constant 1 : index
    %c0_15 = arith.constant 0 : index
    %c0_16 = arith.constant 0 : index
    %40 = vector.load %arg4[%c1, %c0_15, %c0_16] : memref<9x128x128xbf16, #tpu.memory_space<vmem>>, vector<1x128x128xbf16>
    %41 = vector.shape_cast %40 : vector<1x128x128xbf16> to vector<128x128xbf16>
    %cst_17 = arith.constant dense<0.000000e+00> : vector<256x128xf32>
    %42 = tpu.matmul %39, %41, %cst_17 {dimension_numbers = #tpu.dot_dimension_numbers<[1], [0], [0], [1], [0, 0, 1, 1], [], []>} : vector<256x128xbf16>, vector<128x128xbf16>, vector<256x128xf32> -> vector<256x128xf32>
    %43 = arith.addf %37, %42 : vector<256x128xf32>
    %44 = vector.extract_strided_slice %30 {offsets = [0, 2, 0], sizes = [16, 16, 128], strides = [1, 1, 1]} : vector<18x18x128xbf16> to vector<16x16x128xbf16>
    %45 = vector.shape_cast %44 : vector<16x16x128xbf16> to vector<256x128xbf16>
    %c2 = arith.constant 2 : index
    %c0_18 = arith.constant 0 : index
    %c0_19 = arith.constant 0 : index
    %46 = vector.load %arg4[%c2, %c0_18, %c0_19] : memref<9x128x128xbf16, #tpu.memory_space<vmem>>, vector<1x128x128xbf16>
    %47 = vector.shape_cast %46 : vector<1x128x128xbf16> to vector<128x128xbf16>
    %cst_20 = arith.constant dense<0.000000e+00> : vector<256x128xf32>
    %48 = tpu.matmul %45, %47, %cst_20 {dimension_numbers = #tpu.dot_dimension_numbers<[1], [0], [0], [1], [0, 0, 1, 1], [], []>} : vector<256x128xbf16>, vector<128x128xbf16>, vector<256x128xf32> -> vector<256x128xf32>
    %49 = arith.addf %43, %48 : vector<256x128xf32>
    %50 = vector.extract_strided_slice %30 {offsets = [1, 0, 0], sizes = [16, 16, 128], strides = [1, 1, 1]} : vector<18x18x128xbf16> to vector<16x16x128xbf16>
    %51 = vector.shape_cast %50 : vector<16x16x128xbf16> to vector<256x128xbf16>
    %c3 = arith.constant 3 : index
    %c0_21 = arith.constant 0 : index
    %c0_22 = arith.constant 0 : index
    %52 = vector.load %arg4[%c3, %c0_21, %c0_22] : memref<9x128x128xbf16, #tpu.memory_space<vmem>>, vector<1x128x128xbf16>
    %53 = vector.shape_cast %52 : vector<1x128x128xbf16> to vector<128x128xbf16>
    %cst_23 = arith.constant dense<0.000000e+00> : vector<256x128xf32>
    %54 = tpu.matmul %51, %53, %cst_23 {dimension_numbers = #tpu.dot_dimension_numbers<[1], [0], [0], [1], [0, 0, 1, 1], [], []>} : vector<256x128xbf16>, vector<128x128xbf16>, vector<256x128xf32> -> vector<256x128xf32>
    %55 = arith.addf %49, %54 : vector<256x128xf32>
    %56 = vector.extract_strided_slice %30 {offsets = [1, 1, 0], sizes = [16, 16, 128], strides = [1, 1, 1]} : vector<18x18x128xbf16> to vector<16x16x128xbf16>
    %57 = vector.shape_cast %56 : vector<16x16x128xbf16> to vector<256x128xbf16>
    %c4 = arith.constant 4 : index
    %c0_24 = arith.constant 0 : index
    %c0_25 = arith.constant 0 : index
    %58 = vector.load %arg4[%c4, %c0_24, %c0_25] : memref<9x128x128xbf16, #tpu.memory_space<vmem>>, vector<1x128x128xbf16>
    %59 = vector.shape_cast %58 : vector<1x128x128xbf16> to vector<128x128xbf16>
    %cst_26 = arith.constant dense<0.000000e+00> : vector<256x128xf32>
    %60 = tpu.matmul %57, %59, %cst_26 {dimension_numbers = #tpu.dot_dimension_numbers<[1], [0], [0], [1], [0, 0, 1, 1], [], []>} : vector<256x128xbf16>, vector<128x128xbf16>, vector<256x128xf32> -> vector<256x128xf32>
    %61 = arith.addf %55, %60 : vector<256x128xf32>
    %62 = vector.extract_strided_slice %30 {offsets = [1, 2, 0], sizes = [16, 16, 128], strides = [1, 1, 1]} : vector<18x18x128xbf16> to vector<16x16x128xbf16>
    %63 = vector.shape_cast %62 : vector<16x16x128xbf16> to vector<256x128xbf16>
    %c5 = arith.constant 5 : index
    %c0_27 = arith.constant 0 : index
    %c0_28 = arith.constant 0 : index
    %64 = vector.load %arg4[%c5, %c0_27, %c0_28] : memref<9x128x128xbf16, #tpu.memory_space<vmem>>, vector<1x128x128xbf16>
    %65 = vector.shape_cast %64 : vector<1x128x128xbf16> to vector<128x128xbf16>
    %cst_29 = arith.constant dense<0.000000e+00> : vector<256x128xf32>
    %66 = tpu.matmul %63, %65, %cst_29 {dimension_numbers = #tpu.dot_dimension_numbers<[1], [0], [0], [1], [0, 0, 1, 1], [], []>} : vector<256x128xbf16>, vector<128x128xbf16>, vector<256x128xf32> -> vector<256x128xf32>
    %67 = arith.addf %61, %66 : vector<256x128xf32>
    %68 = vector.extract_strided_slice %30 {offsets = [2, 0, 0], sizes = [16, 16, 128], strides = [1, 1, 1]} : vector<18x18x128xbf16> to vector<16x16x128xbf16>
    %69 = vector.shape_cast %68 : vector<16x16x128xbf16> to vector<256x128xbf16>
    %c6 = arith.constant 6 : index
    %c0_30 = arith.constant 0 : index
    %c0_31 = arith.constant 0 : index
    %70 = vector.load %arg4[%c6, %c0_30, %c0_31] : memref<9x128x128xbf16, #tpu.memory_space<vmem>>, vector<1x128x128xbf16>
    %71 = vector.shape_cast %70 : vector<1x128x128xbf16> to vector<128x128xbf16>
    %cst_32 = arith.constant dense<0.000000e+00> : vector<256x128xf32>
    %72 = tpu.matmul %69, %71, %cst_32 {dimension_numbers = #tpu.dot_dimension_numbers<[1], [0], [0], [1], [0, 0, 1, 1], [], []>} : vector<256x128xbf16>, vector<128x128xbf16>, vector<256x128xf32> -> vector<256x128xf32>
    %73 = arith.addf %67, %72 : vector<256x128xf32>
    %74 = vector.extract_strided_slice %30 {offsets = [2, 1, 0], sizes = [16, 16, 128], strides = [1, 1, 1]} : vector<18x18x128xbf16> to vector<16x16x128xbf16>
    %75 = vector.shape_cast %74 : vector<16x16x128xbf16> to vector<256x128xbf16>
    %c7 = arith.constant 7 : index
    %c0_33 = arith.constant 0 : index
    %c0_34 = arith.constant 0 : index
    %76 = vector.load %arg4[%c7, %c0_33, %c0_34] : memref<9x128x128xbf16, #tpu.memory_space<vmem>>, vector<1x128x128xbf16>
    %77 = vector.shape_cast %76 : vector<1x128x128xbf16> to vector<128x128xbf16>
    %cst_35 = arith.constant dense<0.000000e+00> : vector<256x128xf32>
    %78 = tpu.matmul %75, %77, %cst_35 {dimension_numbers = #tpu.dot_dimension_numbers<[1], [0], [0], [1], [0, 0, 1, 1], [], []>} : vector<256x128xbf16>, vector<128x128xbf16>, vector<256x128xf32> -> vector<256x128xf32>
    %79 = arith.addf %73, %78 : vector<256x128xf32>
    %80 = vector.extract_strided_slice %30 {offsets = [2, 2, 0], sizes = [16, 16, 128], strides = [1, 1, 1]} : vector<18x18x128xbf16> to vector<16x16x128xbf16>
    %81 = vector.shape_cast %80 : vector<16x16x128xbf16> to vector<256x128xbf16>
    %c8 = arith.constant 8 : index
    %c0_36 = arith.constant 0 : index
    %c0_37 = arith.constant 0 : index
    %82 = vector.load %arg4[%c8, %c0_36, %c0_37] : memref<9x128x128xbf16, #tpu.memory_space<vmem>>, vector<1x128x128xbf16>
    %83 = vector.shape_cast %82 : vector<1x128x128xbf16> to vector<128x128xbf16>
    %cst_38 = arith.constant dense<0.000000e+00> : vector<256x128xf32>
    %84 = tpu.matmul %81, %83, %cst_38 {dimension_numbers = #tpu.dot_dimension_numbers<[1], [0], [0], [1], [0, 0, 1, 1], [], []>} : vector<256x128xbf16>, vector<128x128xbf16>, vector<256x128xf32> -> vector<256x128xf32>
    %85 = arith.addf %79, %84 : vector<256x128xf32>
    %cst_39 = arith.constant dense<0.000000e+00> : vector<128xf32>
    %86 = vector.multi_reduction <add>, %85, %cst_39 [0] : vector<256x128xf32> to vector<128xf32>
    %87 = vector.shape_cast %86 : vector<128xf32> to vector<1x128xf32>
    %88 = arith.mulf %85, %85 : vector<256x128xf32>
    %cst_40 = arith.constant dense<0.000000e+00> : vector<128xf32>
    %89 = vector.multi_reduction <add>, %88, %cst_40 [0] : vector<256x128xf32> to vector<128xf32>
    %90 = vector.shape_cast %89 : vector<128xf32> to vector<1x128xf32>
    %91 = tpu.concatenate %87, %90 in 0 : vector<1x128xf32>, vector<1x128xf32> -> vector<2x128xf32>
    %92 = vector.shape_cast %91 : vector<2x128xf32> to vector<1x2x128xf32>
    %c0_41 = arith.constant 0 : index
    %c0_42 = arith.constant 0 : index
    %c0_43 = arith.constant 0 : index
    %93 = vector.load %arg6[%c0_41, %c0_42, %c0_43] : memref<1x2x128xf32, #tpu.memory_space<vmem>>, vector<1x2x128xf32>
    tpu.vector_store %arg6[%c0_41, %c0_42, %c0_43], %92 {strides = array<i32>} : memref<1x2x128xf32, #tpu.memory_space<vmem>>, vector<1x2x128xf32>,
    %94 = vector.shape_cast %85 : vector<256x128xf32> to vector<1x256x128xf32>
    %95 = arith.truncf %94 : vector<1x256x128xf32> to vector<1x256x128xbf16>
    %c0_44 = arith.constant 0 : index
    %c0_45 = arith.constant 0 : index
    %c0_46 = arith.constant 0 : index
    %96 = vector.load %arg5[%c0_44, %c0_45, %c0_46] : memref<1x256x128xbf16, #tpu.memory_space<vmem>>, vector<1x256x128xbf16>
    tpu.vector_store %arg5[%c0_44, %c0_45, %c0_46], %95 {strides = array<i32>} : memref<1x256x128xbf16, #tpu.memory_space<vmem>>, vector<1x256x128xbf16>,
    return
  }
  func.func @transform_0(%arg0: i32) -> (i32, i32, i32, i32) {
    %c0_i32 = arith.constant 0 : i32
    %c0_i32_0 = arith.constant 0 : i32
    %c0_i32_1 = arith.constant 0 : i32
    %c0_i32_2 = arith.constant 0 : i32
    return %arg0, %c0_i32, %c0_i32_0, %c0_i32_1 : i32, i32, i32, i32
  }
  func.func @transform_1(%arg0: i32) -> (i32, i32) {
    %c0_i32 = arith.constant 0 : i32
    %c0_i32_0 = arith.constant 0 : i32
    %c0_i32_1 = arith.constant 0 : i32
    return %c0_i32, %c0_i32_0 : i32, i32
  }
  func.func @transform_2(%arg0: i32) -> (i32, i32) {
    %c0_i32 = arith.constant 0 : i32
    %c0_i32_0 = arith.constant 0 : i32
    %c0_i32_1 = arith.constant 0 : i32
    return %c0_i32, %c0_i32_0 : i32, i32
  }
  func.func @transform_3(%arg0: i32) -> (i32, i32, i32) {
    %c0_i32 = arith.constant 0 : i32
    %c0_i32_0 = arith.constant 0 : i32
    %c0_i32_1 = arith.constant 0 : i32
    %c0_i32_2 = arith.constant 0 : i32
    return %c0_i32, %c0_i32_0, %c0_i32_1 : i32, i32, i32
  }
  func.func @transform_4(%arg0: i32) -> (i32, i32, i32) {
    %c0_i32 = arith.constant 0 : i32
    %c0_i32_0 = arith.constant 0 : i32
    %c0_i32_1 = arith.constant 0 : i32
    return %arg0, %c0_i32, %c0_i32_0 : i32, i32, i32
  }
  func.func @transform_5(%arg0: i32) -> (i32, i32, i32) {
    %c0_i32 = arith.constant 0 : i32
    %c0_i32_0 = arith.constant 0 : i32
    %c0_i32_1 = arith.constant 0 : i32
    return %arg0, %c0_i32, %c0_i32_0 : i32, i32, i32
  }
}

module attributes {stable_mosaic.version = 11 : i64} {
  func.func @bn_relu_conv_stats_kernel(%arg0: i32, %arg1: memref<256x128xbf16, #tpu.memory_space<vmem>>, %arg2: memref<1x128xf32, #tpu.memory_space<vmem>>, %arg3: memref<1x128xf32, #tpu.memory_space<vmem>>, %arg4: memref<128x128xbf16, #tpu.memory_space<vmem>>, %arg5: memref<256x128xbf16, #tpu.memory_space<vmem>>, %arg6: memref<1x2x128xf32, #tpu.memory_space<vmem>>) attributes {dimension_semantics = [#tpu.dimension_semantics<parallel>], iteration_bounds = array<i64: 2>, scalar_prefetch = 0 : i64, scratch_operands = 0 : i64, tpu.core_type = #tpu.core_type<tc>, window_params = [{transform_indices = @transform_0, window_bounds = array<i64: 256, 128>}, {pipeline_mode = #tpu.pipeline_mode<synchronous>, transform_indices = @transform_1, window_bounds = array<i64: 1, 128>}, {pipeline_mode = #tpu.pipeline_mode<synchronous>, transform_indices = @transform_2, window_bounds = array<i64: 1, 128>}, {pipeline_mode = #tpu.pipeline_mode<synchronous>, transform_indices = @transform_3, window_bounds = array<i64: 128, 128>}, {transform_indices = @transform_4, window_bounds = array<i64: 256, 128>}, {transform_indices = @transform_5, window_bounds = array<i64: 1, 2, 128>}]} {
    %c0 = arith.constant 0 : index
    %c0_0 = arith.constant 0 : index
    %0 = vector.load %arg1[%c0, %c0_0] : memref<256x128xbf16, #tpu.memory_space<vmem>>, vector<256x128xbf16>
    %1 = arith.extf %0 : vector<256x128xbf16> to vector<256x128xf32>
    %c0_1 = arith.constant 0 : index
    %c0_2 = arith.constant 0 : index
    %2 = vector.load %arg2[%c0_1, %c0_2] : memref<1x128xf32, #tpu.memory_space<vmem>>, vector<1x128xf32>
    %3 = vector.broadcast %2 : vector<1x128xf32> to vector<256x128xf32>
    %4 = arith.mulf %1, %3 : vector<256x128xf32>
    %c0_3 = arith.constant 0 : index
    %c0_4 = arith.constant 0 : index
    %5 = vector.load %arg3[%c0_3, %c0_4] : memref<1x128xf32, #tpu.memory_space<vmem>>, vector<1x128xf32>
    %6 = vector.broadcast %5 : vector<1x128xf32> to vector<256x128xf32>
    %7 = arith.addf %4, %6 : vector<256x128xf32>
    %cst = arith.constant 0.000000e+00 : f32
    %8 = vector.broadcast %cst : f32 to vector<256x128xf32>
    %9 = arith.maximumf %7, %8 : vector<256x128xf32>
    %10 = arith.truncf %9 : vector<256x128xf32> to vector<256x128xbf16>
    %c0_5 = arith.constant 0 : index
    %c0_6 = arith.constant 0 : index
    %11 = vector.load %arg4[%c0_5, %c0_6] : memref<128x128xbf16, #tpu.memory_space<vmem>>, vector<128x128xbf16>
    %cst_7 = arith.constant dense<0.000000e+00> : vector<256x128xf32>
    %12 = tpu.matmul %10, %11, %cst_7 {dimension_numbers = #tpu.dot_dimension_numbers<[1], [0], [0], [1], [0, 0, 1, 1], [], []>} : vector<256x128xbf16>, vector<128x128xbf16>, vector<256x128xf32> -> vector<256x128xf32>
    %cst_8 = arith.constant dense<0.000000e+00> : vector<128xf32>
    %13 = vector.multi_reduction <add>, %12, %cst_8 [0] : vector<256x128xf32> to vector<128xf32>
    %14 = vector.shape_cast %13 : vector<128xf32> to vector<1x128xf32>
    %15 = arith.mulf %12, %12 : vector<256x128xf32>
    %cst_9 = arith.constant dense<0.000000e+00> : vector<128xf32>
    %16 = vector.multi_reduction <add>, %15, %cst_9 [0] : vector<256x128xf32> to vector<128xf32>
    %17 = vector.shape_cast %16 : vector<128xf32> to vector<1x128xf32>
    %18 = tpu.concatenate %14, %17 in 0 : vector<1x128xf32>, vector<1x128xf32> -> vector<2x128xf32>
    %19 = vector.shape_cast %18 : vector<2x128xf32> to vector<1x2x128xf32>
    %c0_10 = arith.constant 0 : index
    %c0_11 = arith.constant 0 : index
    %c0_12 = arith.constant 0 : index
    %20 = vector.load %arg6[%c0_10, %c0_11, %c0_12] : memref<1x2x128xf32, #tpu.memory_space<vmem>>, vector<1x2x128xf32>
    tpu.vector_store %arg6[%c0_10, %c0_11, %c0_12], %19 {strides = array<i32>} : memref<1x2x128xf32, #tpu.memory_space<vmem>>, vector<1x2x128xf32>,
    %21 = arith.truncf %12 : vector<256x128xf32> to vector<256x128xbf16>
    %c0_13 = arith.constant 0 : index
    %c0_14 = arith.constant 0 : index
    %22 = vector.load %arg5[%c0_13, %c0_14] : memref<256x128xbf16, #tpu.memory_space<vmem>>, vector<256x128xbf16>
    tpu.vector_store %arg5[%c0_13, %c0_14], %21 {strides = array<i32>} : memref<256x128xbf16, #tpu.memory_space<vmem>>, vector<256x128xbf16>,
    return
  }
  func.func @transform_0(%arg0: i32) -> (i32, i32) {
    %c0_i32 = arith.constant 0 : i32
    %c0_i32_0 = arith.constant 0 : i32
    return %arg0, %c0_i32 : i32, i32
  }
  func.func @transform_1(%arg0: i32) -> (i32, i32) {
    %c0_i32 = arith.constant 0 : i32
    %c0_i32_0 = arith.constant 0 : i32
    %c0_i32_1 = arith.constant 0 : i32
    return %c0_i32, %c0_i32_0 : i32, i32
  }
  func.func @transform_2(%arg0: i32) -> (i32, i32) {
    %c0_i32 = arith.constant 0 : i32
    %c0_i32_0 = arith.constant 0 : i32
    %c0_i32_1 = arith.constant 0 : i32
    return %c0_i32, %c0_i32_0 : i32, i32
  }
  func.func @transform_3(%arg0: i32) -> (i32, i32) {
    %c0_i32 = arith.constant 0 : i32
    %c0_i32_0 = arith.constant 0 : i32
    %c0_i32_1 = arith.constant 0 : i32
    return %c0_i32, %c0_i32_0 : i32, i32
  }
  func.func @transform_4(%arg0: i32) -> (i32, i32) {
    %c0_i32 = arith.constant 0 : i32
    %c0_i32_0 = arith.constant 0 : i32
    return %arg0, %c0_i32 : i32, i32
  }
  func.func @transform_5(%arg0: i32) -> (i32, i32, i32) {
    %c0_i32 = arith.constant 0 : i32
    %c0_i32_0 = arith.constant 0 : i32
    %c0_i32_1 = arith.constant 0 : i32
    return %arg0, %c0_i32, %c0_i32_0 : i32, i32, i32
  }
}

module attributes {stable_mosaic.version = 11 : i64} {
  func.func @bn_add_relu_kernel(%arg0: i32, %arg1: memref<256x128xbf16, #tpu.memory_space<vmem>>, %arg2: memref<256x128xf32, #tpu.memory_space<vmem>>, %arg3: memref<1x128xf32, #tpu.memory_space<vmem>>, %arg4: memref<1x128xf32, #tpu.memory_space<vmem>>, %arg5: memref<256x128xf32, #tpu.memory_space<vmem>>) attributes {dimension_semantics = [#tpu.dimension_semantics<parallel>], iteration_bounds = array<i64: 2>, scalar_prefetch = 0 : i64, scratch_operands = 0 : i64, tpu.core_type = #tpu.core_type<tc>, window_params = [{transform_indices = @transform_0, window_bounds = array<i64: 256, 128>}, {transform_indices = @transform_1, window_bounds = array<i64: 256, 128>}, {pipeline_mode = #tpu.pipeline_mode<synchronous>, transform_indices = @transform_2, window_bounds = array<i64: 1, 128>}, {pipeline_mode = #tpu.pipeline_mode<synchronous>, transform_indices = @transform_3, window_bounds = array<i64: 1, 128>}, {transform_indices = @transform_4, window_bounds = array<i64: 256, 128>}]} {
    %c0 = arith.constant 0 : index
    %c0_0 = arith.constant 0 : index
    %0 = vector.load %arg1[%c0, %c0_0] : memref<256x128xbf16, #tpu.memory_space<vmem>>, vector<256x128xbf16>
    %1 = arith.extf %0 : vector<256x128xbf16> to vector<256x128xf32>
    %c0_1 = arith.constant 0 : index
    %c0_2 = arith.constant 0 : index
    %2 = vector.load %arg3[%c0_1, %c0_2] : memref<1x128xf32, #tpu.memory_space<vmem>>, vector<1x128xf32>
    %3 = vector.broadcast %2 : vector<1x128xf32> to vector<256x128xf32>
    %4 = arith.mulf %1, %3 : vector<256x128xf32>
    %c0_3 = arith.constant 0 : index
    %c0_4 = arith.constant 0 : index
    %5 = vector.load %arg4[%c0_3, %c0_4] : memref<1x128xf32, #tpu.memory_space<vmem>>, vector<1x128xf32>
    %6 = vector.broadcast %5 : vector<1x128xf32> to vector<256x128xf32>
    %7 = arith.addf %4, %6 : vector<256x128xf32>
    %c0_5 = arith.constant 0 : index
    %c0_6 = arith.constant 0 : index
    %8 = vector.load %arg2[%c0_5, %c0_6] : memref<256x128xf32, #tpu.memory_space<vmem>>, vector<256x128xf32>
    %9 = arith.addf %7, %8 : vector<256x128xf32>
    %cst = arith.constant 0.000000e+00 : f32
    %10 = vector.broadcast %cst : f32 to vector<256x128xf32>
    %11 = arith.maximumf %9, %10 : vector<256x128xf32>
    %c0_7 = arith.constant 0 : index
    %c0_8 = arith.constant 0 : index
    %12 = vector.load %arg5[%c0_7, %c0_8] : memref<256x128xf32, #tpu.memory_space<vmem>>, vector<256x128xf32>
    tpu.vector_store %arg5[%c0_7, %c0_8], %11 {strides = array<i32>} : memref<256x128xf32, #tpu.memory_space<vmem>>, vector<256x128xf32>,
    return
  }
  func.func @transform_0(%arg0: i32) -> (i32, i32) {
    %c0_i32 = arith.constant 0 : i32
    %c0_i32_0 = arith.constant 0 : i32
    return %arg0, %c0_i32 : i32, i32
  }
  func.func @transform_1(%arg0: i32) -> (i32, i32) {
    %c0_i32 = arith.constant 0 : i32
    %c0_i32_0 = arith.constant 0 : i32
    return %arg0, %c0_i32 : i32, i32
  }
  func.func @transform_2(%arg0: i32) -> (i32, i32) {
    %c0_i32 = arith.constant 0 : i32
    %c0_i32_0 = arith.constant 0 : i32
    %c0_i32_1 = arith.constant 0 : i32
    return %c0_i32, %c0_i32_0 : i32, i32
  }
  func.func @transform_3(%arg0: i32) -> (i32, i32) {
    %c0_i32 = arith.constant 0 : i32
    %c0_i32_0 = arith.constant 0 : i32
    %c0_i32_1 = arith.constant 0 : i32
    return %c0_i32, %c0_i32_0 : i32, i32
  }
  func.func @transform_4(%arg0: i32) -> (i32, i32) {
    %c0_i32 = arith.constant 0 : i32
    %c0_i32_0 = arith.constant 0 : i32
    return %arg0, %c0_i32 : i32, i32
  }
}

</mosaic_0001>

<bundles_post_ra>
// kernel: bottleneck_forward.4
= control target key start
LH: loop header
LB: loop body
LE: loop exit
PB: predicated region body
PF: predicated region fallthrough
CT: control target
= control target key end

     0   :  { %s1126_s12 = smov 0   ;;  %s1315_s0 = inlined_call_operand.vmem [shape: f32[512,128], index: 0, kind: input, shape index: {}]   ;;  %s1316_s1 = inlined_call_operand.vmem [shape: bf16[128,128], index: 1, kind: input, shape index: {}]   ;;  %s1317_s2 = inlined_call_operand.vmem [shape: bf16[512,128], index: 2, kind: output, shape index: {0}]   ;;  %s1318_s3 = inlined_call_operand.vmem [shape: f32[2,2,128], index: 3, kind: output, shape index: {1}]  }
   0x1 LB: > { %s1132_s13 = sadd.s32 4294967295, %s1104_s12   ;;  %p819_p0 = scmp.ge.s32.totalorder %s1104_s12, 1  ;;  %s1104_s12 = sphi %s1126_s12, %s14_s12  }
   0x2   : > { %p141_p1 = scmp.lt.s32.totalorder %s1104_s12, 3 }
   0x4   : > { %p142_p2 = pnand %p819_p0, %p141_p1 }
   0x5   : > { %v1090_v0 = vld [vmem:[%s1316_s1] sm:$0xff] (!%p142_p2)   ;;  %s820_s16 = sshll.u32 (!%p142_p2), %s1132_s13, 5  ;;  %v1091_v1 = vld [vmem:[%s1316_s1 + $0x8] sm:$0xff] (!%p142_p2)   ;;  %v1092_v2 = vld [vmem:[%s1316_s1 + $0x10] sm:$0xff] (!%p142_p2)   ;;  %p181_p4 = scmp.lt.s32.totalorder (!%p142_p2), %s1132_s13, 1  ;;  %vm565_vm0 = vcmask (!%p142_p2), 1040384  }
   0x6   : > { %145 = sbr.rel (%p142_p2) target bundleno = 331 (0x14b), region = 28  ;;  %p170_p3 = scmp.lt.s32.totalorder (!%p142_p2), %s820_s16, 63  ;;  %1018 = vmatprep.subr.bf16.mxu0 (!%p142_p2), %v1090_v0  ;;  %1066 = vmatprep.subr.bf16.mxu1 (!%p142_p2), %v1090_v0  ;;  %v1093_v3 = vld [vmem:[%s1316_s1 + $0x18] sm:$0xff] (!%p142_p2)   ;;  %v1094_v7 = vld [vmem:[%s1316_s1 + $0x20] sm:$0xff] (!%p142_p2)   ;;  %v1095_v11 = vld [vmem:[%s1316_s1 + $0x28] sm:$0xff] (!%p142_p2)  }
   0x7   : > { %1019 = vmatpush3.bf16.msra.mxu0 (!%p142_p2), %v1090_v0  ;;  %1074 = vmatpush3.bf16.msra.mxu1 (!%p142_p2), %v1090_v0  ;;  %v1096_v12 = vld [vmem:[%s1316_s1 + $0x30] sm:$0xff] (!%p142_p2)   ;;  %v1097_v13 = vld [vmem:[%s1316_s1 + $0x38] sm:$0xff] (!%p142_p2)  }
   0x8   : > { %1020 = vmatprep.subr.bf16.mxu0 (!%p142_p2), %v1091_v1  ;;  %1067 = vmatprep.subr.bf16.mxu1 (!%p142_p2), %v1091_v1 }
   0xb   : > { %1021 = vmatpush3.bf16.msra.mxu0 (!%p142_p2), %v1091_v1  ;;  %1075 = vmatpush3.bf16.msra.mxu1 (!%p142_p2), %v1091_v1 }
   0xc   : > { %1022 = vmatprep.subr.bf16.mxu0 (!%p142_p2), %v1092_v2  ;;  %1068 = vmatprep.subr.bf16.mxu1 (!%p142_p2), %v1092_v2 }
   0xd   : > { %s1320_s16 = smov (!%p170_p3, %s820_s16), 63  ;;  %s1322_s13 = smov (!%p181_p4, %s1132_s13), 1 }
   0xe   : > { %s821_s21 = sshll.u32 %s1320_s16, 3  ;;  %s823_s8 = sshll.u32 %s1320_s16, 2 }
   0xf   : > { %s1152_s24 = scalar_lea.vmem %s1315_s0, %s821_s21  ;;  %1023 = vmatpush3.bf16.msra.mxu0 %v1092_v2  ;;  %1076 = vmatpush3.bf16.msra.mxu1 %v1092_v2  ;;  %s1207_s11 = scalar_lea.vmem %s1317_s2, %s823_s8 }
  0x10   : > { %v186_v4 = vld [vmem:[%s1152_s24] sm:$0xff]  ;;  %v187_v5 = vld [vmem:[%s1152_s24 + $0x8] sm:$0xff]  ;;  %1024 = vmatprep.subr.bf16.mxu0 %v1093_v3  ;;  %1069 = vmatprep.subr.bf16.mxu1 %v1093_v3  ;;  %v188_v14 = vld [vmem:[%s1152_s24 + $0x10] sm:$0xff]  ;;  %s824_s14 = sshll.u32 %s1322_s13, 1 }
  0x11   : > { %v218_v6 = vpack.c.bf16 %v187_v5, %v186_v4  ;;  %v202_v8 = vld [vmem:[%s1152_s24 + $0x80] sm:$0xff]  ;;  %v203_v9 = vld [vmem:[%s1152_s24 + $0x88] sm:$0xff]  ;;  %v189_v15 = vld [vmem:[%s1152_s24 + $0x18] sm:$0xff]  ;;  %s184_s17 = scalar_lea.vmem %s1318_s3, %s824_s14 }
  0x12   : > { %v226_v10 = vpack.c.bf16 %v203_v9, %v202_v8  ;;  %v190_v16 = vld [vmem:[%s1152_s24 + $0x20] sm:$0xff]  ;;  %v191_v17 = vld [vmem:[%s1152_s24 + $0x28] sm:$0xff]  ;;  %v204_v18 = vld [vmem:[%s1152_s24 + $0x90] sm:$0xff]  ;;  %v219_v22 = vpack.c.bf16 %v189_v15, %v188_v14 }
  0x13   : > { %1034 = vmatprep.mubr.bf16.mxu0 %v218_v6  ;;  %1025 = vmatpush3.bf16.msra.mxu0 %v1093_v3  ;;  %v205_v19 = vld [vmem:[%s1152_s24 + $0x98] sm:$0xff]  ;;  %v206_v20 = vld [vmem:[%s1152_s24 + $0xa0] sm:$0xff]  ;;  %v207_v21 = vld [vmem:[%s1152_s24 + $0xa8] sm:$0xff]  ;;  %v220_v23 = vpack.c.bf16 %v191_v17, %v190_v16 }
  0x14   : > { %1026 = vmatprep.subr.bf16.mxu0 %v1094_v7  ;;  %1077 = vmatpush3.bf16.msra.mxu1 %v1093_v3  ;;  %v227_v24 = vpack.c.bf16 %v205_v19, %v204_v18  ;;  %v228_v25 = vpack.c.bf16 %v207_v21, %v206_v20  ;;  %v192_v26 = vld [vmem:[%s1152_s24 + $0x30] sm:$0xff]  ;;  %v193_v27 = vld [vmem:[%s1152_s24 + $0x38] sm:$0xff]  ;;  %v194_v28 = vld [vmem:[%s1152_s24 + $0x40] sm:$0xff] }
  0x15   : > { %1070 = vmatprep.subr.bf16.mxu1 %v1094_v7  ;;  %1050 = vmatprep.mubr.bf16.mxu1 %v226_v10  ;;  %v195_v29 = vld [vmem:[%s1152_s24 + $0x48] sm:$0xff]  ;;  %v208_v30 = vld [vmem:[%s1152_s24 + $0xb0] sm:$0xff]  ;;  %v209_v31 = vld [vmem:[%s1152_s24 + $0xb8] sm:$0xff]  ;;  %v221_v34 = vpack.c.bf16 %v193_v27, %v192_v26 }
  0x16   : > { %v210_v32 = vld [vmem:[%s1152_s24 + $0xc0] sm:$0xff]  ;;  %v211_v33 = vld [vmem:[%s1152_s24 + $0xc8] sm:$0xff]  ;;  %v222_v35 = vpack.c.bf16 %v195_v29, %v194_v28  ;;  %v229_v36 = vpack.c.bf16 %v209_v31, %v208_v30  ;;  %v196_v38 = vld [vmem:[%s1152_s24 + $0x50] sm:$0xff] }
  0x17   : > { %1027 = vmatpush3.bf16.msra.mxu0 %v1094_v7  ;;  %v230_v37 = vpack.c.bf16 %v211_v33, %v210_v32  ;;  %v197_v39 = vld [vmem:[%s1152_s24 + $0x58] sm:$0xff]  ;;  %v198_v40 = vld [vmem:[%s1152_s24 + $0x60] sm:$0xff]  ;;  %v199_v41 = vld [vmem:[%s1152_s24 + $0x68] sm:$0xff] }
  0x18   : > { %1028 = vmatprep.subr.bf16.mxu0 %v1095_v11  ;;  %1078 = vmatpush3.bf16.msra.mxu1 %v1094_v7  ;;  %v212_v42 = vld [vmem:[%s1152_s24 + $0xd0] sm:$0xff]  ;;  %v213_v43 = vld [vmem:[%s1152_s24 + $0xd8] sm:$0xff]  ;;  %v214_v44 = vld [vmem:[%s1152_s24 + $0xe0] sm:$0xff]  ;;  %v223_v46 = vpack.c.bf16 %v197_v39, %v196_v38  ;;  %v224_v47 = vpack.c.bf16 %v199_v41, %v198_v40 }
  0x19   : > { %1071 = vmatprep.subr.bf16.mxu1 %v1095_v11  ;;  %v215_v45 = vld [vmem:[%s1152_s24 + $0xe8] sm:$0xff]  ;;  %v231_v48 = vpack.c.bf16 %v213_v43, %v212_v42  ;;  %v200_v50 = vld [vmem:[%s1152_s24 + $0x70] sm:$0xff]  ;;  %v201_v51 = vld [vmem:[%s1152_s24 + $0x78] sm:$0xff] }
  0x1a   : > { %v232_v49 = vpack.c.bf16 %v215_v45, %v214_v44  ;;  %v216_v52 = vld [vmem:[%s1152_s24 + $0xf0] sm:$0xff]  ;;  %v217_v53 = vld [vmem:[%s1152_s24 + $0xf8] sm:$0xff]  ;;  %v225_v54 = vpack.c.bf16 %v201_v51, %v200_v50 }
  0x1b   : > { %1029 = vmatpush3.bf16.msra.mxu0 %v1095_v11  ;;  %v233_v55 = vpack.c.bf16 %v217_v53, %v216_v52 }
  0x1c   : > { %1030 = vmatprep.subr.bf16.mxu0 %v1096_v12  ;;  %1079 = vmatpush3.bf16.msra.mxu1 %v1095_v11 }
  0x1d   : > { %1072 = vmatprep.subr.bf16.mxu1 %v1096_v12 }
  0x1f   : > { %1031 = vmatpush3.bf16.msra.mxu0 %v1096_v12 }
  0x20   : > { %1032 = vmatprep.subr.bf16.mxu0 %v1097_v13  ;;  %1080 = vmatpush3.bf16.msra.mxu1 %v1096_v12 }
  0x21   : > { %1073 = vmatprep.subr.bf16.mxu1 %v1097_v13 }
  0x23   : > { %1033 = vmatpush3.bf16.msra.mxu0 %v1097_v13 }
  0x24   : > { %1081 = vmatpush3.bf16.msra.mxu1 %v1097_v13 }
  0x26   : > { %1035 = vmatmul.mubr.bf16.vlgmr.msra.gmra.mrb[0].mxu0 %v219_v22 }
  0x27   : > { %1038 = vmatprep.mubr.bf16.mxu0 %v220_v23  ;;  %1051 = vmatmul.mubr.bf16.vlgmr.msra.gmra.mrb[0].mxu1 %v227_v24 }
  0x28   : > { %1054 = vmatprep.mubr.bf16.mxu1 %v228_v25 }
  0x2e   : > { %1039 = vmatmul.mubr.bf16.gmra.mrb[4].mxu0 %v221_v34 }
  0x2f   : > { %1042 = vmatprep.mubr.bf16.mxu0 %v222_v35  ;;  %1055 = vmatmul.mubr.bf16.gmra.mrb[4].mxu1 %v229_v36 }
  0x30   : > { %1058 = vmatprep.mubr.bf16.mxu1 %v230_v37 }
  0x36   : > { %1043 = vmatmul.mubr.bf16.gmra.mrb[8].mxu0 %v223_v46 }
  0x37   : > { %1046 = vmatprep.mubr.bf16.mxu0 %v224_v47  ;;  %1059 = vmatmul.mubr.bf16.gmra.mrb[8].mxu1 %v231_v48 }
  0x38   : > { %1062 = vmatprep.mubr.bf16.mxu1 %v232_v49 }
  0x3e   : > { %1047 = vmatmul.mubr.bf16.gmra.mrb[12].mxu0 %v225_v54 }
  0x3f   : > { %1063 = vmatmul.mubr.bf16.gmra.mrb[12].mxu1 %v233_v55 }
  0xf9   : > { %v1036_v56 = vpop.f32.mrb[0].mxu0 }
  0xfa   : > { %v332_v57 = vpop.f32.mrb[1].mxu0  ;;  %v1202_v58 = vpop.f32.mrb[0].mxu1  ;;  %v498_v7 = vmul.f32 %v1036_v56, %v1036_v56 }
  0xfb   : > { %v1037_v59 = vpop.f32.mrb[2].mxu0  ;;  %v1209_v60 = vpop.f32.mrb[1].mxu1  ;;  %v496_v0 = vmul.f32 %v332_v57, %v332_v57 }
  0xfc   : > { %v907_v61 = vpack.c.bf16 %v1037_v59, %v1036_v56  ;;  %v335_v62 = vpop.f32.mrb[3].mxu0  ;;  %v1211_v63 = vpop.f32.mrb[2].mxu1  ;;  %v499_v10 = vmul.f32 %v1037_v59, %v1037_v59 }
  0xfd   : > { %v459_v1 = vadd.f32 %v335_v62, %v332_v57  ;;  %v497_v2 = vmul.f32 %v335_v62, %v335_v62  ;;  %v902_v3 = vpack.c.bf16 %v335_v62, %v332_v57  ;;  %v1213_v4 = vpop.f32.mrb[3].mxu1  ;;  %v947_v5 = vpack.c.bf16 %v1211_v63, %v1202_v58 }
  0xfe   : > { %979 = vst [vmem:[%s1207_s11 + $0x8] sm:$0xff] %v907_v61   ;;  %v942_v6 = vpack.c.bf16 %v1213_v4, %v1209_v60 }
  0xff   : > { %v460_v8 = vadd.f32 %v1036_v56, %v459_v1  ;;  %v528_v9 = vadd.f32 %v497_v2, %v496_v0  ;;  %903 = vst [vmem:[%s1207_s11] sm:$0xff] %v902_v3   ;;  %987 = vst [vmem:[%s1207_s11 + $0x48] sm:$0xff] %v947_v5  }
 0x100   : > { %986 = vst [vmem:[%s1207_s11 + $0x40] sm:$0xff] %v942_v6  }
 0x101   : > { %v529_v11 = vadd.f32 %v528_v9, %v498_v7  ;;  %v1040_v12 = vpop.f32.mrb[4].mxu0  ;;  %v461_v13 = vadd.f32 %v1037_v59, %v460_v8 }
 0x102   : > { %v348_v14 = vpop.f32.mrb[5].mxu0  ;;  %v1223_v15 = vpop.f32.mrb[4].mxu1  ;;  %v502_v31 = vmul.f32 %v1040_v12, %v1040_v12 }
 0x103   : > { %v462_v16 = vadd.f32 %v461_v13, %v348_v14  ;;  %v500_v17 = vmul.f32 %v348_v14, %v348_v14  ;;  %v530_v18 = vadd.f32 %v529_v11, %v499_v10  ;;  %v1041_v19 = vpop.f32.mrb[6].mxu0  ;;  %v1225_v20 = vpop.f32.mrb[5].mxu1 }
 0x104   : > { %v917_v21 = vpack.c.bf16 %v1041_v19, %v1040_v12  ;;  %v351_v22 = vpop.f32.mrb[7].mxu0  ;;  %v1227_v23 = vpop.f32.mrb[6].mxu1  ;;  %v503_v34 = vmul.f32 %v1041_v19, %v1041_v19 }
 0x105   : > { %v531_v24 = vadd.f32 %v530_v18, %v500_v17  ;;  %v463_v25 = vadd.f32 %v462_v16, %v351_v22  ;;  %v501_v26 = vmul.f32 %v351_v22, %v351_v22  ;;  %v912_v27 = vpack.c.bf16 %v351_v22, %v348_v14  ;;  %v1229_v28 = vpop.f32.mrb[7].mxu1 }
 0x106   : > { %981 = vst [vmem:[%s1207_s11 + $0x18] sm:$0xff] %v917_v21   ;;  %v957_v29 = vpack.c.bf16 %v1227_v23, %v1223_v15  ;;  %v952_v30 = vpack.c.bf16 %v1229_v28, %v1225_v20 }
 0x107   : > { %v464_v32 = vadd.f32 %v1040_v12, %v463_v25  ;;  %v532_v33 = vadd.f32 %v531_v24, %v501_v26  ;;  %980 = vst [vmem:[%s1207_s11 + $0x10] sm:$0xff] %v912_v27  }
 0x108   : > { %989 = vst [vmem:[%s1207_s11 + $0x58] sm:$0xff] %v957_v29   ;;  %988 = vst [vmem:[%s1207_s11 + $0x50] sm:$0xff] %v952_v30   ;;  %v512_v29 = vmul.f32 %v1209_v60, %v1209_v60 }
 0x109   : > { %v533_v35 = vadd.f32 %v532_v33, %v502_v31  ;;  %v1044_v36 = vpop.f32.mrb[8].mxu0  ;;  %v465_v37 = vadd.f32 %v1041_v19, %v464_v32 }
 0x10a   : > { %v364_v38 = vpop.f32.mrb[9].mxu0  ;;  %v1239_v39 = vpop.f32.mrb[8].mxu1  ;;  %v506_v55 = vmul.f32 %v1044_v36, %v1044_v36 }
 0x10b   : > { %v466_v40 = vadd.f32 %v465_v37, %v364_v38  ;;  %v504_v41 = vmul.f32 %v364_v38, %v364_v38  ;;  %v534_v42 = vadd.f32 %v533_v35, %v503_v34  ;;  %v1045_v43 = vpop.f32.mrb[10].mxu0  ;;  %v1241_v44 = vpop.f32.mrb[9].mxu1  ;;  %v513_v34 = vmul.f32 %v1213_v4, %v1213_v4 }
 0x10c   : > { %v927_v45 = vpack.c.bf16 %v1045_v43, %v1044_v36  ;;  %v367_v46 = vpop.f32.mrb[11].mxu0  ;;  %v1243_v47 = vpop.f32.mrb[10].mxu1  ;;  %v507_v59 = vmul.f32 %v1045_v43, %v1045_v43  ;;  %v514_v35 = vmul.f32 %v1202_v58, %v1202_v58 }
 0x10d   : > { %v535_v48 = vadd.f32 %v534_v42, %v504_v41  ;;  %v467_v49 = vadd.f32 %v466_v40, %v367_v46  ;;  %v505_v50 = vmul.f32 %v367_v46, %v367_v46  ;;  %v922_v51 = vpack.c.bf16 %v367_v46, %v364_v38  ;;  %v1245_v52 = vpop.f32.mrb[11].mxu1 }
 0x10e   : > { %983 = vst [vmem:[%s1207_s11 + $0x28] sm:$0xff] %v927_v45   ;;  %v967_v53 = vpack.c.bf16 %v1243_v47, %v1239_v39  ;;  %v962_v54 = vpack.c.bf16 %v1245_v52, %v1241_v44  ;;  %v515_v38 = vmul.f32 %v1211_v63, %v1211_v63  ;;  %v517_v46 = vmul.f32 %v1229_v28, %v1229_v28 }
 0x10f   : > { %v468_v56 = vadd.f32 %v1044_v36, %v467_v49  ;;  %v536_v57 = vadd.f32 %v535_v48, %v505_v50  ;;  %982 = vst [vmem:[%s1207_s11 + $0x20] sm:$0xff] %v922_v51  }
 0x110   : > { %991 = vst [vmem:[%s1207_s11 + $0x68] sm:$0xff] %v967_v53   ;;  %990 = vst [vmem:[%s1207_s11 + $0x60] sm:$0xff] %v962_v54  }
 0x111   : > { %v537_v61 = vadd.f32 %v536_v57, %v506_v55  ;;  %v1048_v62 = vpop.f32.mrb[12].mxu0  ;;  %v469_v0 = vadd.f32 %v1045_v43, %v468_v56  ;;  %v521_v56 = vmul.f32 %v1245_v52, %v1245_v52 }
 0x112   : > { %v380_v1 = vpop.f32.mrb[13].mxu0  ;;  %v1255_v2 = vpop.f32.mrb[12].mxu1  ;;  %v510_v21 = vmul.f32 %v1048_v62, %v1048_v62 }
 0x113   : > { %v470_v3 = vadd.f32 %v469_v0, %v380_v1  ;;  %v508_v5 = vmul.f32 %v380_v1, %v380_v1  ;;  %v538_v6 = vadd.f32 %v537_v61, %v507_v59  ;;  %v1049_v7 = vpop.f32.mrb[14].mxu0  ;;  %v444_v8 = vpop.f32.mrb[13].mxu1 }
 0x114   : > { %v937_v9 = vpack.c.bf16 %v1049_v7, %v1048_v62  ;;  %v383_v10 = vpop.f32.mrb[15].mxu0  ;;  %v1257_v11 = vpop.f32.mrb[14].mxu1  ;;  %v511_v25 = vmul.f32 %v1049_v7, %v1049_v7 }
 0x115   : > { %v539_v12 = vadd.f32 %v538_v6, %v508_v5  ;;  %v471_v13 = vadd.f32 %v470_v3, %v383_v10  ;;  %v509_v14 = vmul.f32 %v383_v10, %v383_v10  ;;  %v932_v16 = vpack.c.bf16 %v383_v10, %v380_v1  ;;  %v447_v17 = vpop.f32.mrb[15].mxu1 }
 0x116   : > { %985 = vst [vmem:[%s1207_s11 + $0x38] sm:$0xff] %v937_v9   ;;  %v977_v18 = vpack.c.bf16 %v1257_v11, %v1255_v2  ;;  %v972_v19 = vpack.c.bf16 %v447_v17, %v444_v8  ;;  %v526_v6 = vmul.f32 %v1255_v2, %v1255_v2  ;;  %v527_v9 = vmul.f32 %v1257_v11, %v1257_v11 }
 0x117   : > { %v472_v22 = vadd.f32 %v1048_v62, %v471_v13  ;;  %v540_v24 = vadd.f32 %v539_v12, %v509_v14  ;;  %984 = vst [vmem:[%s1207_s11 + $0x30] sm:$0xff] %v932_v16   ;;  %v524_v62 = vmul.f32 %v444_v8, %v444_v8 }
 0x118   : > { %993 = vst [vmem:[%s1207_s11 + $0x78] sm:$0xff] %v977_v18   ;;  %992 = vst [vmem:[%s1207_s11 + $0x70] sm:$0xff] %v972_v19  }
 0x119   : > { %v541_v26 = vadd.f32 %v540_v24, %v510_v21  ;;  %v473_v27 = vadd.f32 %v1049_v7, %v472_v22 }
 0x11b   : > { %v474_v30 = vadd.f32 %v473_v27, %v1209_v60  ;;  %v542_v31 = vadd.f32 %v541_v26, %v511_v25  ;;  %v516_v60 = vmul.f32 %v1225_v20, %v1225_v20 }
 0x11d   : > { %v543_v32 = vadd.f32 %v542_v31, %v512_v29  ;;  %v475_v33 = vadd.f32 %v474_v30, %v1213_v4 }
 0x11f   : > { %v476_v36 = vadd.f32 %v1202_v58, %v475_v33  ;;  %v544_v37 = vadd.f32 %v543_v32, %v513_v34  ;;  %v518_v58 = vmul.f32 %v1223_v15, %v1223_v15 }
 0x121   : > { %v545_v40 = vadd.f32 %v544_v37, %v514_v35  ;;  %v477_v41 = vadd.f32 %v1211_v63, %v476_v36  ;;  %v519_v63 = vmul.f32 %v1227_v23, %v1227_v23 }
 0x123   : > { %v478_v42 = vadd.f32 %v477_v41, %v1225_v20  ;;  %v546_v43 = vadd.f32 %v545_v40, %v515_v38  ;;  %v520_v20 = vmul.f32 %v1241_v44, %v1241_v44 }
 0x125   : > { %v547_v45 = vadd.f32 %v546_v43, %v516_v60  ;;  %v479_v4 = vadd.f32 %v478_v42, %v1229_v28 }
 0x127   : > { %v480_v48 = vadd.f32 %v1223_v15, %v479_v4  ;;  %v548_v49 = vadd.f32 %v547_v45, %v517_v46  ;;  %v522_v15 = vmul.f32 %v1239_v39, %v1239_v39 }
 0x129   : > { %v549_v50 = vadd.f32 %v548_v49, %v518_v58  ;;  %v481_v51 = vadd.f32 %v1227_v23, %v480_v48  ;;  %v523_v23 = vmul.f32 %v1243_v47, %v1243_v47 }
 0x12b   : > { %v482_v53 = vadd.f32 %v481_v51, %v1241_v44  ;;  %v550_v54 = vadd.f32 %v549_v50, %v519_v63 }
 0x12d   : > { %v551_v55 = vadd.f32 %v550_v54, %v520_v20  ;;  %v483_v28 = vadd.f32 %v482_v53, %v1245_v52  ;;  %v525_v52 = vmul.f32 %v447_v17, %v447_v17 }
 0x12f   : > { %v484_v57 = vadd.f32 %v1239_v39, %v483_v28  ;;  %v552_v59 = vadd.f32 %v551_v55, %v521_v56 }
 0x131   : > { %v553_v61 = vadd.f32 %v552_v59, %v522_v15  ;;  %v485_v44 = vadd.f32 %v1243_v47, %v484_v57 }
 0x133   : > { %v486_v0 = vadd.f32 %v485_v44, %v444_v8  ;;  %v554_v1 = vadd.f32 %v553_v61, %v523_v23 }
 0x135   : > { %v555_v3 = vadd.f32 %v554_v1, %v524_v62  ;;  %v487_v5 = vadd.f32 %v486_v0, %v447_v17 }
 0x137   : > { %v488_v39 = vadd.f32 %v1255_v2, %v487_v5  ;;  %v556_v7 = vadd.f32 %v555_v3, %v525_v52 }
 0x139   : > { %v489_v10 = vadd.f32 %v1257_v11, %v488_v39  ;;  %v557_v12 = vadd.f32 %v556_v7, %v526_v6 }
 0x13b   : > { %v490_v47 = vrot.slane %v489_v10, 4  ;;  %v558_v13 = vadd.f32 %v557_v12, %v527_v9 }
 0x13d   : > { %v491_v8 = vadd.f32 %v490_v47, %v489_v10  ;;  %v559_v14 = vrot.slane %v558_v13, 4 }
 0x13f   : > { %v492_v16 = vrot.slane %v491_v8, 2  ;;  %v560_v18 = vadd.f32 %v559_v14, %v558_v13 }
 0x141   : > { %v493_v17 = vadd.f32 %v492_v16, %v491_v8  ;;  %v561_v19 = vrot.slane %v560_v18, 2 }
 0x143   : > { %v494_v21 = vrot.slane %v493_v17, 1  ;;  %v562_v22 = vadd.f32 %v561_v19, %v560_v18 }
 0x145   : > { %v563_v2 = vrot.slane %v562_v22, 1  ;;  %v495_v11 = vadd.f32 %v494_v21, %v493_v17 }
 0x147   : > { %v564_v24 = vadd.f32 %v563_v2, %v562_v22 }
 0x149   : > { %v566_v25 = vsel %vm565_vm0, %v495_v11, %v564_v24 }
 0x14a   : > { %567 = vst [vmem:[%s184_s17] sm:$0x3] %v566_v25 }
 0x14b PF: > { %s14_s12 = sadd.s32 1, %s1104_s12  }
 0x14c   : > { %p11_p5 = scmp.ge.s32.totalorder %s14_s12, 4  }
 0x14e   :  { %13 = sbr.rel (!%p11_p5) target bundleno = 1 (0x1), region = 70 }

// kernel: bottleneck_forward.6
= control target key start
LH: loop header
LB: loop body
LE: loop exit
PB: predicated region body
PF: predicated region fallthrough
CT: control target
= control target key end

     0   :  { %s1413_s18 = smov 0   ;;  %s1681_s0 = inlined_call_operand.vmem [shape: bf16[512,128], index: 0, kind: input, shape index: {}]   ;;  %s1682_s1 = inlined_call_operand.vmem [shape: f32[1,128], index: 1, kind: input, shape index: {}]   ;;  %s1683_s2 = inlined_call_operand.vmem [shape: f32[1,128], index: 2, kind: input, shape index: {}]   ;;  %s1684_s3 = inlined_call_operand.vmem [shape: bf16[128,128], index: 3, kind: input, shape index: {}]   ;;  %s1685_s4 = inlined_call_operand.vmem [shape: bf16[512,128], index: 4, kind: output, shape index: {0}]   ;;  %s1686_s5 = inlined_call_operand.vmem [shape: f32[2,2,128], index: 5, kind: output, shape index: {1}]  }
   0x1 LB: > { %s1419_s19 = sadd.s32 4294967295, %s1381_s18   ;;  %p1015_p0 = scmp.ge.s32.totalorder %s1381_s18, 1  ;;  %s1381_s18 = sphi %s1413_s18, %s16_s18  }
   0x2   : > { %p191_p1 = scmp.lt.s32.totalorder %s1381_s18, 3 }
   0x4   : > { %p192_p2 = pnand %p1015_p0, %p191_p1 }
   0x5   : > { %v1367_v0 = vld [vmem:[%s1684_s3] sm:$0xff] (!%p192_p2)   ;;  %s1016_s22 = sshll.u32 (!%p192_p2), %s1419_s19, 5  ;;  %v1368_v1 = vld [vmem:[%s1684_s3 + $0x8] sm:$0xff] (!%p192_p2)   ;;  %v1369_v2 = vld [vmem:[%s1684_s3 + $0x10] sm:$0xff] (!%p192_p2)   ;;  %p235_p4 = scmp.lt.s32.totalorder (!%p192_p2), %s1419_s19, 1  ;;  %vm761_vm0 = vcmask (!%p192_p2), 1040384  }
   0x6   : > { %195 = sbr.rel (%p192_p2) target bundleno = 331 (0x14b), region = 36  ;;  %p224_p3 = scmp.lt.s32.totalorder (!%p192_p2), %s1016_s22, 63  ;;  %1295 = vmatprep.subr.bf16.mxu0 (!%p192_p2), %v1367_v0  ;;  %1343 = vmatprep.subr.bf16.mxu1 (!%p192_p2), %v1367_v0  ;;  %v1370_v3 = vld [vmem:[%s1684_s3 + $0x18] sm:$0xff] (!%p192_p2)   ;;  %v1450_v5 = vld [vmem:[%s1682_s1] ss:$0 sm:$0xff] (!%p192_p2)  ;;  %v1372_v34 = vld [vmem:[%s1684_s3 + $0x28] sm:$0xff] (!%p192_p2)  }
   0x7   : > { %1296 = vmatpush3.bf16.msra.mxu0 (!%p192_p2), %v1367_v0  ;;  %1351 = vmatpush3.bf16.msra.mxu1 (!%p192_p2), %v1367_v0  ;;  %v1458_v11 = vld [vmem:[%s1683_s2] ss:$0 sm:$0xff] (!%p192_p2)  ;;  %v1373_v49 = vld [vmem:[%s1684_s3 + $0x30] sm:$0xff] (!%p192_p2)   ;;  %v1374_v63 = vld [vmem:[%s1684_s3 + $0x38] sm:$0xff] (!%p192_p2)  }
   0x8   : > { %1297 = vmatprep.subr.bf16.mxu0 (!%p192_p2), %v1368_v1  ;;  %1344 = vmatprep.subr.bf16.mxu1 (!%p192_p2), %v1368_v1  ;;  %v1371_v20 = vld [vmem:[%s1684_s3 + $0x20] sm:$0xff] (!%p192_p2)  }
   0xb   : > { %1298 = vmatpush3.bf16.msra.mxu0 (!%p192_p2), %v1368_v1  ;;  %1352 = vmatpush3.bf16.msra.mxu1 (!%p192_p2), %v1368_v1 }
   0xc   : > { %1299 = vmatprep.subr.bf16.mxu0 (!%p192_p2), %v1369_v2  ;;  %1345 = vmatprep.subr.bf16.mxu1 (!%p192_p2), %v1369_v2 }
   0xd   : > { %s1688_s22 = smov (!%p224_p3, %s1016_s22), 63  ;;  %s1690_s19 = smov (!%p235_p4, %s1419_s19), 1 }
   0xe   : > { %s1017_s27 = sshll.u32 %s1688_s22, 2  ;;  %s1020_s22 = sshll.u32 %s1690_s19, 1 }
   0xf   : > { %s1441_s30 = scalar_lea.vmem %s1681_s0, %s1017_s27  ;;  %1300 = vmatpush3.bf16.msra.mxu0 %v1369_v2  ;;  %1353 = vmatpush3.bf16.msra.mxu1 %v1369_v2  ;;  %s1583_s25 = scalar_lea.vmem %s1685_s4, %s1017_s27 }
  0x10   : > { %v1098_v4 = vld [vmem:[%s1441_s30] sm:$0xff]   ;;  %v1241_v8 = vld [vmem:[%s1441_s30 + $0x8] sm:$0xff]   ;;  %v1242_v9 = vld [vmem:[%s1441_s30 + $0x10] sm:$0xff]   ;;  %1301 = vmatprep.subr.bf16.mxu0 %v1370_v3  ;;  %1346 = vmatprep.subr.bf16.mxu1 %v1370_v3  ;;  %s238_s28 = scalar_lea.vmem %s1686_s5, %s1020_s22 }
  0x11   : > { %v1099_v6 = vunpack.c.l.bf16 %v1098_v4  ;;  %v1100_v7 = vunpack.c.h.bf16 %v1098_v4  ;;  %v1243_v10 = vld [vmem:[%s1441_s30 + $0x18] sm:$0xff]   ;;  %v1103_v12 = vunpack.c.l.bf16 %v1241_v8  ;;  %v1104_v13 = vunpack.c.h.bf16 %v1241_v8  ;;  %v1244_v29 = vld [vmem:[%s1441_s30 + $0x20] sm:$0xff]   ;;  %v1245_v33 = vld [vmem:[%s1441_s30 + $0x28] sm:$0xff]  }
  0x12   : > { %v1107_v14 = vunpack.c.l.bf16 %v1242_v9  ;;  %v1108_v15 = vunpack.c.h.bf16 %v1242_v9  ;;  %v1111_v18 = vunpack.c.l.bf16 %v1243_v10  ;;  %v1112_v19 = vunpack.c.h.bf16 %v1243_v10  ;;  %v1246_v42 = vld [vmem:[%s1441_s30 + $0x30] sm:$0xff]   ;;  %v1487_v48 = vld [vmem:[%s1441_s30 + $0x38] sm:$0xff]   ;;  %v1248_v60 = vld [vmem:[%s1441_s30 + $0x40] sm:$0xff]  }
  0x13   : > { %v311_v16 = vmul.f32 %v1099_v6, %v1450_v5  ;;  %v312_v17 = vmul.f32 %v1100_v7, %v1450_v5  ;;  %v313_v21 = vmul.f32 %v1103_v12, %v1450_v5  ;;  %v314_v22 = vmul.f32 %v1104_v13, %v1450_v5  ;;  %1302 = vmatpush3.bf16.msra.mxu0 %v1370_v3  ;;  %v1250_v9 = vld [vmem:[%s1441_s30 + $0x50] sm:$0xff]  }
  0x14   : > { %v315_v23 = vmul.f32 %v1107_v14, %v1450_v5  ;;  %v316_v24 = vmul.f32 %v1108_v15, %v1450_v5  ;;  %v317_v27 = vmul.f32 %v1111_v18, %v1450_v5  ;;  %v318_v28 = vmul.f32 %v1112_v19, %v1450_v5  ;;  %1354 = vmatpush3.bf16.msra.mxu1 %v1370_v3  ;;  %v1249_v3 = vld [vmem:[%s1441_s30 + $0x48] sm:$0xff]   ;;  %v1251_v19 = vld [vmem:[%s1441_s30 + $0x58] sm:$0xff]  }
  0x15   : > { %v350_v25 = vadd.f32 %v1458_v11, %v311_v16  ;;  %v351_v26 = vadd.f32 %v1458_v11, %v312_v17  ;;  %v352_v32 = vadd.f32 %v1458_v11, %v313_v21  ;;  %1303 = vmatprep.subr.bf16.mxu0 %v1371_v20  ;;  %v353_v35 = vadd.f32 %v1458_v11, %v314_v22 }
  0x16   : > { %v354_v36 = vadd.f32 %v1458_v11, %v315_v23  ;;  %v355_v37 = vadd.f32 %v1458_v11, %v316_v24  ;;  %1347 = vmatprep.subr.bf16.mxu1 %v1371_v20  ;;  %v356_v39 = vadd.f32 %v1458_v11, %v317_v27  ;;  %v357_v40 = vadd.f32 %v1458_v11, %v318_v28 }
  0x17   : > { %v382_v30 = vmax.f32 %v350_v25, 0.0  ;;  %v383_v31 = vmax.f32 %v351_v26, 0.0  ;;  %v1115_v41 = vunpack.c.l.bf16 %v1244_v29  ;;  %v1116_v43 = vunpack.c.h.bf16 %v1244_v29  ;;  %1304 = vmatpush3.bf16.msra.mxu0 %v1371_v20 }
  0x18   : > { %v1119_v44 = vunpack.c.l.bf16 %v1245_v33  ;;  %v384_v45 = vmax.f32 %v352_v32, 0.0  ;;  %v1120_v47 = vunpack.c.h.bf16 %v1245_v33  ;;  %1305 = vmatprep.subr.bf16.mxu0 %v1372_v34  ;;  %v385_v50 = vmax.f32 %v353_v35, 0.0  ;;  %1355 = vmatpush3.bf16.msra.mxu1 %v1371_v20  ;;  %v1252_v32 = vld [vmem:[%s1441_s30 + $0x60] sm:$0xff]  }
  0x19   : > { %v414_v38 = vpack.c.bf16 %v383_v31, %v382_v30  ;;  %v319_v46 = vmul.f32 %v1115_v41, %v1450_v5  ;;  %v386_v51 = vmax.f32 %v354_v36, 0.0  ;;  %v387_v52 = vmax.f32 %v355_v37, 0.0  ;;  %1348 = vmatprep.subr.bf16.mxu1 %v1372_v34 }
  0x1a   : > { %v1123_v53 = vunpack.c.l.bf16 %v1246_v42  ;;  %v388_v54 = vmax.f32 %v356_v39, 0.0  ;;  %v389_v55 = vmax.f32 %v357_v40, 0.0  ;;  %v320_v56 = vmul.f32 %v1116_v43, %v1450_v5 }
  0x1b   : > { %1311 = vmatprep.mubr.bf16.mxu0 %v414_v38  ;;  %v321_v57 = vmul.f32 %v1119_v44, %v1450_v5  ;;  %v1124_v58 = vunpack.c.h.bf16 %v1246_v42  ;;  %v1127_v59 = vunpack.c.l.bf16 %v1487_v48  ;;  %1306 = vmatpush3.bf16.msra.mxu0 %v1372_v34  ;;  %v1497_v61 = vadd.f32 %v1458_v11, %v319_v46 }
  0x1c   : > { %v322_v62 = vmul.f32 %v1120_v47, %v1450_v5  ;;  %1307 = vmatprep.subr.bf16.mxu0 %v1373_v49  ;;  %v415_v0 = vpack.c.bf16 %v385_v50, %v384_v45  ;;  %v416_v1 = vpack.c.bf16 %v387_v52, %v386_v51  ;;  %1356 = vmatpush3.bf16.msra.mxu1 %v1372_v34  ;;  %v1128_v7 = vunpack.c.h.bf16 %v1487_v48  ;;  %v1253_v45 = vld [vmem:[%s1441_s30 + $0x68] sm:$0xff]  }
  0x1d   : > { %v323_v2 = vmul.f32 %v1123_v53, %v1450_v5  ;;  %v1505_v4 = vpack.c.bf16 %v389_v55, %v388_v54  ;;  %v1508_v6 = vadd.f32 %v1458_v11, %v320_v56  ;;  %1349 = vmatprep.subr.bf16.mxu1 %v1373_v49  ;;  %v1131_v8 = vunpack.c.l.bf16 %v1248_v60  ;;  %v1254_v55 = vld [vmem:[%s1441_s30 + $0x70] sm:$0xff]  }
  0x1e   : > { %v1513_v10 = vadd.f32 %v1458_v11, %v321_v57  ;;  %v1516_v12 = vmul.f32 %v1124_v58, %v1450_v5  ;;  %v1519_v13 = vmul.f32 %v1127_v59, %v1450_v5  ;;  %v1132_v14 = vunpack.c.h.bf16 %v1248_v60 }
  0x1f   : > { %1308 = vmatpush3.bf16.msra.mxu0 %v1373_v49  ;;  %v390_v15 = vmax.f32 %v1497_v61, 0.0  ;;  %v1523_v16 = vadd.f32 %v1458_v11, %v322_v62  ;;  %v327_v17 = vmul.f32 %v1131_v8, %v1450_v5  ;;  %v1135_v18 = vunpack.c.l.bf16 %v1249_v3 }
  0x20   : > { %1309 = vmatprep.subr.bf16.mxu0 %v1374_v63  ;;  %1357 = vmatpush3.bf16.msra.mxu1 %v1373_v49  ;;  %v1528_v20 = vadd.f32 %v1458_v11, %v323_v2  ;;  %v328_v21 = vmul.f32 %v1132_v14, %v1450_v5  ;;  %v1136_v22 = vunpack.c.h.bf16 %v1249_v3  ;;  %v1139_v23 = vunpack.c.l.bf16 %v1250_v9 }
  0x21   : > { %v391_v24 = vmax.f32 %v1508_v6, 0.0  ;;  %1350 = vmatprep.subr.bf16.mxu1 %v1374_v63  ;;  %v366_v25 = vadd.f32 %v1458_v11, %v327_v17  ;;  %v329_v26 = vmul.f32 %v1135_v18, %v1450_v5  ;;  %v1140_v27 = vunpack.c.h.bf16 %v1250_v9  ;;  %v1255_v17 = vld [vmem:[%s1441_s30 + $0x78] sm:$0xff]  }
  0x22   : > { %v367_v28 = vadd.f32 %v1458_v11, %v328_v21  ;;  %v330_v29 = vmul.f32 %v1136_v22, %v1450_v5  ;;  %v331_v30 = vmul.f32 %v1139_v23, %v1450_v5  ;;  %v1143_v31 = vunpack.c.l.bf16 %v1251_v19 }
  0x23   : > { %1310 = vmatpush3.bf16.msra.mxu0 %v1374_v63  ;;  %v398_v33 = vmax.f32 %v366_v25, 0.0  ;;  %v368_v34 = vadd.f32 %v1458_v11, %v329_v26  ;;  %v332_v35 = vmul.f32 %v1140_v27, %v1450_v5  ;;  %v1144_v36 = vunpack.c.h.bf16 %v1251_v19 }
  0x24   : > { %1358 = vmatpush3.bf16.msra.mxu1 %v1374_v63  ;;  %v399_v37 = vmax.f32 %v367_v28, 0.0  ;;  %v369_v38 = vadd.f32 %v1458_v11, %v330_v29  ;;  %v370_v39 = vadd.f32 %v1458_v11, %v331_v30  ;;  %v333_v40 = vmul.f32 %v1143_v31, %v1450_v5 }
  0x25   : > { %v400_v41 = vmax.f32 %v368_v34, 0.0  ;;  %v371_v42 = vadd.f32 %v1458_v11, %v332_v35  ;;  %v334_v43 = vmul.f32 %v1144_v36, %v1450_v5  ;;  %v1147_v44 = vunpack.c.l.bf16 %v1252_v32 }
  0x26   : > { %1312 = vmatmul.mubr.bf16.vlgmr.msra.gmra.mrb[0].mxu0 %v415_v0  ;;  %v422_v46 = vpack.c.bf16 %v399_v37, %v398_v33  ;;  %v401_v47 = vmax.f32 %v369_v38, 0.0  ;;  %v402_v49 = vmax.f32 %v370_v39, 0.0  ;;  %v372_v50 = vadd.f32 %v1458_v11, %v333_v40 }
  0x27   : > { %1315 = vmatprep.mubr.bf16.mxu0 %v416_v1  ;;  %v403_v51 = vmax.f32 %v371_v42, 0.0  ;;  %v373_v52 = vadd.f32 %v1458_v11, %v334_v43  ;;  %v1148_v53 = vunpack.c.h.bf16 %v1252_v32  ;;  %v335_v54 = vmul.f32 %v1147_v44, %v1450_v5 }
  0x28   : > { %1327 = vmatprep.mubr.bf16.mxu1 %v422_v46  ;;  %v423_v56 = vpack.c.bf16 %v401_v47, %v400_v41  ;;  %v404_v57 = vmax.f32 %v372_v50, 0.0  ;;  %v1151_v58 = vunpack.c.l.bf16 %v1253_v45  ;;  %v1152_v59 = vunpack.c.h.bf16 %v1253_v45 }
  0x29   : > { %v424_v60 = vpack.c.bf16 %v403_v51, %v402_v49  ;;  %v405_v61 = vmax.f32 %v373_v52, 0.0  ;;  %v336_v62 = vmul.f32 %v1148_v53, %v1450_v5  ;;  %v374_v63 = vadd.f32 %v1458_v11, %v335_v54 }
  0x2a   : > { %1328 = vmatmul.mubr.bf16.vlgmr.msra.gmra.mrb[0].mxu1 %v423_v56  ;;  %v337_v0 = vmul.f32 %v1151_v58, %v1450_v5  ;;  %v338_v1 = vmul.f32 %v1152_v59, %v1450_v5  ;;  %v1155_v2 = vunpack.c.l.bf16 %v1254_v55  ;;  %v1156_v3 = vunpack.c.h.bf16 %v1254_v55 }
  0x2b   : > { %v418_v6 = vpack.c.bf16 %v391_v24, %v390_v15  ;;  %v363_v8 = vadd.f32 %v1458_v11, %v1516_v12  ;;  %1331 = vmatprep.mubr.bf16.mxu1 %v424_v60  ;;  %v375_v9 = vadd.f32 %v1458_v11, %v336_v62  ;;  %v406_v14 = vmax.f32 %v374_v63, 0.0 }
  0x2c   : > { %v392_v18 = vmax.f32 %v1513_v10, 0.0  ;;  %v326_v19 = vmul.f32 %v1128_v7, %v1450_v5  ;;  %v339_v21 = vmul.f32 %v1155_v2, %v1450_v5  ;;  %v340_v22 = vmul.f32 %v1156_v3, %v1450_v5 }
  0x2d   : > { %v393_v15 = vmax.f32 %v1523_v16, 0.0  ;;  %v394_v23 = vmax.f32 %v1528_v20, 0.0  ;;  %v425_v12 = vpack.c.bf16 %v405_v61, %v404_v57  ;;  %v407_v24 = vmax.f32 %v375_v9, 0.0 }
  0x2e   : > { %1316 = vmatmul.mubr.bf16.gmra.mrb[4].mxu0 %v1505_v4  ;;  %v376_v25 = vadd.f32 %v1458_v11, %v337_v0  ;;  %v377_v10 = vadd.f32 %v1458_v11, %v338_v1  ;;  %v1159_v26 = vunpack.c.l.bf16 %v1255_v17  ;;  %v1160_v27 = vunpack.c.h.bf16 %v1255_v17 }
  0x2f   : > { %1319 = vmatprep.mubr.bf16.mxu0 %v418_v6  ;;  %v395_v48 = vmax.f32 %v363_v8, 0.0  ;;  %v426_v7 = vpack.c.bf16 %v407_v24, %v406_v14  ;;  %v378_v28 = vadd.f32 %v1458_v11, %v339_v21  ;;  %v379_v29 = vadd.f32 %v1458_v11, %v340_v22 }
  0x30   : > { %v419_v16 = vpack.c.bf16 %v393_v15, %v392_v18  ;;  %v364_v20 = vadd.f32 %v1458_v11, %v1519_v13  ;;  %v365_v30 = vadd.f32 %v1458_v11, %v326_v19  ;;  %v408_v4 = vmax.f32 %v376_v25, 0.0 }
  0x31   : > { %v409_v31 = vmax.f32 %v377_v10, 0.0  ;;  %v341_v32 = vmul.f32 %v1159_v26, %v1450_v5  ;;  %v342_v33 = vmul.f32 %v1160_v27, %v1450_v5  ;;  %v420_v34 = vpack.c.bf16 %v395_v48, %v394_v23 }
  0x32   : > { %1332 = vmatmul.mubr.bf16.gmra.mrb[4].mxu1 %v425_v12  ;;  %v410_v35 = vmax.f32 %v378_v28, 0.0  ;;  %v411_v36 = vmax.f32 %v379_v29, 0.0  ;;  %v396_v37 = vmax.f32 %v364_v20, 0.0  ;;  %v397_v38 = vmax.f32 %v365_v30, 0.0 }
  0x33   : > { %1335 = vmatprep.mubr.bf16.mxu1 %v426_v7  ;;  %v427_v39 = vpack.c.bf16 %v409_v31, %v408_v4  ;;  %v380_v13 = vadd.f32 %v1458_v11, %v341_v32  ;;  %v381_v40 = vadd.f32 %v1458_v11, %v342_v33 }
  0x34   : > { %v428_v41 = vpack.c.bf16 %v411_v36, %v410_v35  ;;  %v421_v42 = vpack.c.bf16 %v397_v38, %v396_v37 }
  0x35   : > { %v412_v43 = vmax.f32 %v380_v13, 0.0  ;;  %v413_v44 = vmax.f32 %v381_v40, 0.0 }
  0x36   : > { %1320 = vmatmul.mubr.bf16.gmra.mrb[8].mxu0 %v419_v16 }
  0x37   : > { %1323 = vmatprep.mubr.bf16.mxu0 %v420_v34  ;;  %v429_v5 = vpack.c.bf16 %v413_v44, %v412_v43 }
  0x3a   : > { %1336 = vmatmul.mubr.bf16.gmra.mrb[8].mxu1 %v427_v39 }
  0x3b   : > { %1339 = vmatprep.mubr.bf16.mxu1 %v428_v41 }
  0x3e   : > { %1324 = vmatmul.mubr.bf16.gmra.mrb[12].mxu0 %v421_v42 }
  0x42   : > { %1340 = vmatmul.mubr.bf16.gmra.mrb[12].mxu1 %v429_v5 }
  0xf9   : > { %v1313_v45 = vpop.f32.mrb[0].mxu0 }
  0xfa   : > { %v528_v46 = vpop.f32.mrb[1].mxu0  ;;  %v694_v56 = vmul.f32 %v1313_v45, %v1313_v45 }
  0xfb   : > { %v1314_v11 = vpop.f32.mrb[2].mxu0  ;;  %v692_v50 = vmul.f32 %v528_v46, %v528_v46 }
  0xfc   : > { %v1169_v47 = vpack.c.bf16 %v1314_v11, %v1313_v45  ;;  %v531_v49 = vpop.f32.mrb[3].mxu0  ;;  %v695_v62 = vmul.f32 %v1314_v11, %v1314_v11 }
  0xfd   : > { %v655_v51 = vadd.f32 %v531_v49, %v528_v46  ;;  %v693_v52 = vmul.f32 %v531_v49, %v531_v49  ;;  %v1164_v53 = vpack.c.bf16 %v531_v49, %v528_v46  ;;  %v1585_v54 = vpop.f32.mrb[0].mxu1 }
  0xfe   : > { %1256 = vst [vmem:[%s1583_s25 + $0x8] sm:$0xff] %v1169_v47   ;;  %v1588_v55 = vpop.f32.mrb[1].mxu1 }
  0xff   : > { %v656_v57 = vadd.f32 %v1313_v45, %v655_v51  ;;  %v724_v58 = vadd.f32 %v693_v52, %v692_v50  ;;  %1165 = vst [vmem:[%s1583_s25] sm:$0xff] %v1164_v53   ;;  %v1591_v59 = vpop.f32.mrb[2].mxu1 }
 0x100   : > { %v1209_v60 = vpack.c.bf16 %v1591_v59, %v1585_v54  ;;  %v1595_v61 = vpop.f32.mrb[3].mxu1 }
 0x101   : > { %v725_v63 = vadd.f32 %v724_v58, %v694_v56  ;;  %v1317_v0 = vpop.f32.mrb[4].mxu0  ;;  %v657_v1 = vadd.f32 %v1314_v11, %v656_v57  ;;  %v1204_v2 = vpack.c.bf16 %v1595_v61, %v1588_v55 }
 0x102   : > { %v544_v3 = vpop.f32.mrb[5].mxu0  ;;  %1264 = vst [vmem:[%s1583_s25 + $0x48] sm:$0xff] %v1209_v60   ;;  %v698_v24 = vmul.f32 %v1317_v0, %v1317_v0 }
 0x103   : > { %v658_v6 = vadd.f32 %v657_v1, %v544_v3  ;;  %v696_v8 = vmul.f32 %v544_v3, %v544_v3  ;;  %v726_v9 = vadd.f32 %v725_v63, %v695_v62  ;;  %v1318_v14 = vpop.f32.mrb[6].mxu0  ;;  %1263 = vst [vmem:[%s1583_s25 + $0x40] sm:$0xff] %v1204_v2  }
 0x104   : > { %v1179_v17 = vpack.c.bf16 %v1318_v14, %v1317_v0  ;;  %v547_v18 = vpop.f32.mrb[7].mxu0  ;;  %v699_v7 = vmul.f32 %v1318_v14, %v1318_v14 }
 0x105   : > { %v727_v19 = vadd.f32 %v726_v9, %v696_v8  ;;  %v659_v21 = vadd.f32 %v658_v6, %v547_v18  ;;  %v697_v22 = vmul.f32 %v547_v18, %v547_v18  ;;  %v1174_v15 = vpack.c.bf16 %v547_v18, %v544_v3  ;;  %v1601_v23 = vpop.f32.mrb[4].mxu1 }
 0x106   : > { %1258 = vst [vmem:[%s1583_s25 + $0x18] sm:$0xff] %v1179_v17   ;;  %v1604_v12 = vpop.f32.mrb[5].mxu1  ;;  %v708_v17 = vmul.f32 %v1588_v55, %v1588_v55 }
 0x107   : > { %v660_v25 = vadd.f32 %v1317_v0, %v659_v21  ;;  %v728_v10 = vadd.f32 %v727_v19, %v697_v22  ;;  %1257 = vst [vmem:[%s1583_s25 + $0x10] sm:$0xff] %v1174_v15   ;;  %v1607_v26 = vpop.f32.mrb[6].mxu1 }
 0x108   : > { %v1219_v27 = vpack.c.bf16 %v1607_v26, %v1601_v23  ;;  %v1611_v48 = vpop.f32.mrb[7].mxu1 }
 0x109   : > { %v729_v28 = vadd.f32 %v728_v10, %v698_v24  ;;  %v1321_v29 = vpop.f32.mrb[8].mxu0  ;;  %v661_v16 = vadd.f32 %v1318_v14, %v660_v25  ;;  %v1214_v20 = vpack.c.bf16 %v1611_v48, %v1604_v12 }
 0x10a   : > { %v560_v30 = vpop.f32.mrb[9].mxu0  ;;  %1266 = vst [vmem:[%s1583_s25 + $0x58] sm:$0xff] %v1219_v27   ;;  %v702_v41 = vmul.f32 %v1321_v29, %v1321_v29 }
 0x10b   : > { %v662_v4 = vadd.f32 %v661_v16, %v560_v30  ;;  %v700_v31 = vmul.f32 %v560_v30, %v560_v30  ;;  %v730_v32 = vadd.f32 %v729_v28, %v699_v7  ;;  %v1322_v33 = vpop.f32.mrb[10].mxu0  ;;  %1265 = vst [vmem:[%s1583_s25 + $0x50] sm:$0xff] %v1214_v20   ;;  %v709_v28 = vmul.f32 %v1595_v61, %v1595_v61 }
 0x10c   : > { %v1189_v34 = vpack.c.bf16 %v1322_v33, %v1321_v29  ;;  %v563_v35 = vpop.f32.mrb[11].mxu0  ;;  %v703_v46 = vmul.f32 %v1322_v33, %v1322_v33 }
 0x10d   : > { %v731_v36 = vadd.f32 %v730_v32, %v700_v31  ;;  %v663_v37 = vadd.f32 %v662_v4, %v563_v35  ;;  %v701_v38 = vmul.f32 %v563_v35, %v563_v35  ;;  %v1184_v39 = vpack.c.bf16 %v563_v35, %v560_v30  ;;  %v1617_v13 = vpop.f32.mrb[8].mxu1 }
 0x10e   : > { %1260 = vst [vmem:[%s1583_s25 + $0x28] sm:$0xff] %v1189_v34   ;;  %v1620_v40 = vpop.f32.mrb[9].mxu1  ;;  %v711_v30 = vmul.f32 %v1591_v59, %v1591_v59  ;;  %v712_v31 = vmul.f32 %v1604_v12, %v1604_v12  ;;  %v713_v35 = vmul.f32 %v1611_v48, %v1611_v48 }
 0x10f   : > { %v664_v42 = vadd.f32 %v1321_v29, %v663_v37  ;;  %v732_v43 = vadd.f32 %v731_v36, %v701_v38  ;;  %1259 = vst [vmem:[%s1583_s25 + $0x20] sm:$0xff] %v1184_v39   ;;  %v1623_v44 = vpop.f32.mrb[10].mxu1  ;;  %v710_v29 = vmul.f32 %v1585_v54, %v1585_v54 }
 0x110   : > { %v1229_v5 = vpack.c.bf16 %v1623_v44, %v1617_v13  ;;  %v1627_v45 = vpop.f32.mrb[11].mxu1 }
 0x111   : > { %v733_v11 = vadd.f32 %v732_v43, %v702_v41  ;;  %v1325_v47 = vpop.f32.mrb[12].mxu0  ;;  %v665_v49 = vadd.f32 %v1322_v33, %v664_v42  ;;  %v1224_v50 = vpack.c.bf16 %v1627_v45, %v1620_v40 }
 0x112   : > { %v576_v51 = vpop.f32.mrb[13].mxu0  ;;  %1268 = vst [vmem:[%s1583_s25 + $0x68] sm:$0xff] %v1229_v5   ;;  %v706_v6 = vmul.f32 %v1325_v47, %v1325_v47  ;;  %v717_v5 = vmul.f32 %v1627_v45, %v1627_v45 }
 0x113   : > { %v666_v52 = vadd.f32 %v665_v49, %v576_v51  ;;  %v704_v53 = vmul.f32 %v576_v51, %v576_v51  ;;  %v734_v56 = vadd.f32 %v733_v11, %v703_v46  ;;  %v1326_v57 = vpop.f32.mrb[14].mxu0  ;;  %1267 = vst [vmem:[%s1583_s25 + $0x60] sm:$0xff] %v1224_v50  }
 0x114   : > { %v1199_v58 = vpack.c.bf16 %v1326_v57, %v1325_v47  ;;  %v579_v60 = vpop.f32.mrb[15].mxu0  ;;  %v707_v21 = vmul.f32 %v1326_v57, %v1326_v57 }
 0x115   : > { %v735_v62 = vadd.f32 %v734_v56, %v704_v53  ;;  %v667_v63 = vadd.f32 %v666_v52, %v579_v60  ;;  %v705_v0 = vmul.f32 %v579_v60, %v579_v60  ;;  %v1194_v1 = vpack.c.bf16 %v579_v60, %v576_v51  ;;  %v1341_v2 = vpop.f32.mrb[12].mxu1 }
 0x116   : > { %1262 = vst [vmem:[%s1583_s25 + $0x38] sm:$0xff] %v1199_v58   ;;  %v640_v3 = vpop.f32.mrb[13].mxu1  ;;  %v722_v56 = vmul.f32 %v1341_v2, %v1341_v2 }
 0x117   : > { %v668_v8 = vadd.f32 %v1325_v47, %v667_v63  ;;  %v736_v9 = vadd.f32 %v735_v62, %v705_v0  ;;  %1261 = vst [vmem:[%s1583_s25 + $0x30] sm:$0xff] %v1194_v1   ;;  %v1342_v14 = vpop.f32.mrb[14].mxu1  ;;  %v720_v49 = vmul.f32 %v640_v3, %v640_v3 }
 0x118   : > { %v1239_v18 = vpack.c.bf16 %v1342_v14, %v1341_v2  ;;  %v643_v19 = vpop.f32.mrb[15].mxu1  ;;  %v723_v60 = vmul.f32 %v1342_v14, %v1342_v14 }
 0x119   : > { %v737_v22 = vadd.f32 %v736_v9, %v706_v6  ;;  %v669_v15 = vadd.f32 %v1326_v57, %v668_v8  ;;  %v1234_v24 = vpack.c.bf16 %v643_v19, %v640_v3 }
 0x11a   : > { %1270 = vst [vmem:[%s1583_s25 + $0x78] sm:$0xff] %v1239_v18  }
 0x11b   : > { %v670_v25 = vadd.f32 %v669_v15, %v1588_v55  ;;  %v738_v10 = vadd.f32 %v737_v22, %v707_v21  ;;  %1269 = vst [vmem:[%s1583_s25 + $0x70] sm:$0xff] %v1234_v24  }
 0x11d   : > { %v739_v27 = vadd.f32 %v738_v10, %v708_v17  ;;  %v671_v7 = vadd.f32 %v670_v25, %v1595_v61 }
 0x11f   : > { %v672_v16 = vadd.f32 %v1585_v54, %v671_v7  ;;  %v740_v20 = vadd.f32 %v739_v27, %v709_v28  ;;  %v714_v54 = vmul.f32 %v1601_v23, %v1601_v23 }
 0x121   : > { %v741_v4 = vadd.f32 %v740_v20, %v710_v29  ;;  %v673_v55 = vadd.f32 %v1591_v59, %v672_v16  ;;  %v715_v59 = vmul.f32 %v1607_v26, %v1607_v26 }
 0x123   : > { %v674_v32 = vadd.f32 %v673_v55, %v1604_v12  ;;  %v742_v33 = vadd.f32 %v741_v4, %v711_v30  ;;  %v716_v12 = vmul.f32 %v1620_v40, %v1620_v40 }
 0x125   : > { %v743_v34 = vadd.f32 %v742_v33, %v712_v31  ;;  %v675_v61 = vadd.f32 %v674_v32, %v1611_v48 }
 0x127   : > { %v676_v36 = vadd.f32 %v1601_v23, %v675_v61  ;;  %v744_v37 = vadd.f32 %v743_v34, %v713_v35  ;;  %v718_v23 = vmul.f32 %v1617_v13, %v1617_v13 }
 0x129   : > { %v745_v38 = vadd.f32 %v744_v37, %v714_v54  ;;  %v677_v39 = vadd.f32 %v1607_v26, %v676_v36  ;;  %v719_v26 = vmul.f32 %v1623_v44, %v1623_v44 }
 0x12b   : > { %v678_v41 = vadd.f32 %v677_v39, %v1620_v40  ;;  %v746_v42 = vadd.f32 %v745_v38, %v715_v59 }
 0x12d   : > { %v747_v43 = vadd.f32 %v746_v42, %v716_v12  ;;  %v679_v48 = vadd.f32 %v678_v41, %v1627_v45  ;;  %v721_v45 = vmul.f32 %v643_v19, %v643_v19 }
 0x12f   : > { %v680_v46 = vadd.f32 %v1617_v13, %v679_v48  ;;  %v748_v11 = vadd.f32 %v747_v43, %v717_v5 }
 0x131   : > { %v749_v47 = vadd.f32 %v748_v11, %v718_v23  ;;  %v681_v40 = vadd.f32 %v1623_v44, %v680_v46 }
 0x133   : > { %v682_v50 = vadd.f32 %v681_v40, %v640_v3  ;;  %v750_v51 = vadd.f32 %v749_v47, %v719_v26 }
 0x135   : > { %v751_v52 = vadd.f32 %v750_v51, %v720_v49  ;;  %v683_v53 = vadd.f32 %v682_v50, %v643_v19 }
 0x137   : > { %v684_v57 = vadd.f32 %v1341_v2, %v683_v53  ;;  %v752_v58 = vadd.f32 %v751_v52, %v721_v45 }
 0x139   : > { %v685_v13 = vadd.f32 %v1342_v14, %v684_v57  ;;  %v753_v62 = vadd.f32 %v752_v58, %v722_v56 }
 0x13b   : > { %v686_v63 = vrot.slane %v685_v13, 4  ;;  %v754_v0 = vadd.f32 %v753_v62, %v723_v60 }
 0x13d   : > { %v687_v1 = vadd.f32 %v686_v63, %v685_v13  ;;  %v755_v6 = vrot.slane %v754_v0, 4 }
 0x13f   : > { %v688_v8 = vrot.slane %v687_v1, 2  ;;  %v756_v44 = vadd.f32 %v755_v6, %v754_v0 }
 0x141   : > { %v689_v3 = vadd.f32 %v688_v8, %v687_v1  ;;  %v757_v9 = vrot.slane %v756_v44, 2 }
 0x143   : > { %v690_v17 = vrot.slane %v689_v3, 1  ;;  %v758_v18 = vadd.f32 %v757_v9, %v756_v44 }
 0x145   : > { %v759_v19 = vrot.slane %v758_v18, 1  ;;  %v691_v2 = vadd.f32 %v690_v17, %v689_v3 }
 0x147   : > { %v760_v14 = vadd.f32 %v759_v19, %v758_v18 }
 0x149   : > { %v762_v21 = vsel %vm761_vm0, %v691_v2, %v760_v14 }
 0x14a   : > { %763 = vst [vmem:[%s238_s28] sm:$0x3] %v762_v21 }
 0x14b PF: > { %s16_s18 = sadd.s32 1, %s1381_s18  }
 0x14c   : > { %p13_p5 = scmp.ge.s32.totalorder %s16_s18, 4  }
 0x14e   :  { %15 = sbr.rel (!%p13_p5) target bundleno = 1 (0x1), region = 78 }

// kernel: bottleneck_forward.7
= control target key start
LH: loop header
LB: loop body
LE: loop exit
PB: predicated region body
PF: predicated region fallthrough
CT: control target
= control target key end

     0   :  { %s696_s15 = smov 0   ;;  %s884_s0 = inlined_call_operand.vmem [shape: bf16[512,128], index: 0, kind: input, shape index: {}]   ;;  %s885_s1 = inlined_call_operand.vmem [shape: f32[512,128], index: 1, kind: input, shape index: {}]   ;;  %s886_s2 = inlined_call_operand.vmem [shape: f32[1,128], index: 2, kind: input, shape index: {}]   ;;  %s887_s3 = inlined_call_operand.vmem [shape: f32[1,128], index: 3, kind: input, shape index: {}]   ;;  %s888_s4 = inlined_call_operand.vmem [shape: f32[512,128], index: 4, kind: output, shape index: {}]  }
   0x1 LB: > { %s561_s16 = sadd.s32 4294967295, %s669_s15   ;;  %p565_p0 = scmp.ge.s32.totalorder %s669_s15, 1  ;;  %s669_s15 = sphi %s696_s15, %s14_s15  }
   0x2   : > { %p174_p1 = scmp.lt.s32.totalorder %s669_s15, 3 }
   0x4   : > { %p175_p2 = pnand %p565_p0, %p174_p1 }
   0x5   : > { %s566_s17 = sshll.u32 (!%p175_p2), %s561_s16, 5  ;;  %v717_v1 = vld [vmem:[%s886_s2] ss:$0 sm:$0xff] (!%p175_p2) }
   0x6   : > { %178 = sbr.rel (%p175_p2) target bundleno = 60 (0x3c), region = 36  ;;  %p206_p3 = scmp.lt.s32.totalorder (!%p175_p2), %s566_s17, 63  ;;  %v730_v5 = vld [vmem:[%s887_s3] ss:$0 sm:$0xff] (!%p175_p2) }
   0xd   : > { %s890_s17 = smov (!%p206_p3, %s566_s17), 63 }
   0xe   : > { %s567_s18 = sshll.u32 %s890_s17, 2  ;;  %s569_s19 = sshll.u32 %s890_s17, 3 }
   0xf   : > { %s711_s22 = scalar_lea.vmem %s884_s0, %s567_s18  ;;  %s724_s27 = scalar_lea.vmem %s885_s1, %s569_s19 }
  0x10   : > { %v577_v0 = vld [vmem:[%s711_s22] sm:$0xff]   ;;  %v640_v4 = vld [vmem:[%s711_s22 + $0x8] sm:$0xff]   ;;  %v641_v8 = vld [vmem:[%s711_s22 + $0x10] sm:$0xff]   ;;  %s761_s6 = scalar_lea.vmem %s888_s4, %s569_s19 }
  0x11   : > { %v578_v2 = vunpack.c.l.bf16 %v577_v0  ;;  %v579_v3 = vunpack.c.h.bf16 %v577_v0  ;;  %v582_v6 = vunpack.c.l.bf16 %v640_v4  ;;  %v583_v7 = vunpack.c.h.bf16 %v640_v4  ;;  %v642_v13 = vld [vmem:[%s711_s22 + $0x18] sm:$0xff]   ;;  %v365_v14 = vld [vmem:[%s724_s27] sm:$0xff]  ;;  %v366_v15 = vld [vmem:[%s724_s27 + $0x8] sm:$0xff] }
  0x12   : > { %v586_v11 = vunpack.c.l.bf16 %v641_v8  ;;  %v587_v12 = vunpack.c.h.bf16 %v641_v8  ;;  %v590_v18 = vunpack.c.l.bf16 %v642_v13  ;;  %v591_v19 = vunpack.c.h.bf16 %v642_v13  ;;  %v367_v22 = vld [vmem:[%s724_s27 + $0x10] sm:$0xff]  ;;  %v368_v23 = vld [vmem:[%s724_s27 + $0x18] sm:$0xff]  ;;  %v369_v28 = vld [vmem:[%s724_s27 + $0x20] sm:$0xff] }
  0x13   : > { %v294_v9 = vmul.f32 %v578_v2, %v717_v1  ;;  %v295_v10 = vmul.f32 %v579_v3, %v717_v1  ;;  %v296_v16 = vmul.f32 %v582_v6, %v717_v1  ;;  %v297_v17 = vmul.f32 %v583_v7, %v717_v1  ;;  %v370_v29 = vld [vmem:[%s724_s27 + $0x28] sm:$0xff]  ;;  %v371_v36 = vld [vmem:[%s724_s27 + $0x30] sm:$0xff]  ;;  %v372_v37 = vld [vmem:[%s724_s27 + $0x38] sm:$0xff] }
  0x14   : > { %v298_v24 = vmul.f32 %v586_v11, %v717_v1  ;;  %v299_v25 = vmul.f32 %v587_v12, %v717_v1  ;;  %v300_v30 = vmul.f32 %v590_v18, %v717_v1  ;;  %v301_v31 = vmul.f32 %v591_v19, %v717_v1  ;;  %v643_v42 = vld [vmem:[%s711_s22 + $0x20] sm:$0xff]   ;;  %v644_v47 = vld [vmem:[%s711_s22 + $0x28] sm:$0xff]   ;;  %v645_v52 = vld [vmem:[%s711_s22 + $0x30] sm:$0xff]  }
  0x15   : > { %v333_v20 = vadd.f32 %v730_v5, %v294_v9  ;;  %v334_v21 = vadd.f32 %v730_v5, %v295_v10  ;;  %v335_v26 = vadd.f32 %v730_v5, %v296_v16  ;;  %v336_v27 = vadd.f32 %v730_v5, %v297_v17  ;;  %v646_v57 = vld [vmem:[%s711_s22 + $0x38] sm:$0xff]   ;;  %v373_v3 = vld [vmem:[%s724_s27 + $0x40] sm:$0xff]  ;;  %v374_v4 = vld [vmem:[%s724_s27 + $0x48] sm:$0xff] }
  0x16   : > { %v337_v34 = vadd.f32 %v730_v5, %v298_v24  ;;  %v338_v35 = vadd.f32 %v730_v5, %v299_v25  ;;  %v339_v40 = vadd.f32 %v730_v5, %v300_v30  ;;  %v340_v41 = vadd.f32 %v730_v5, %v301_v31  ;;  %v375_v12 = vld [vmem:[%s724_s27 + $0x50] sm:$0xff]  ;;  %v376_v13 = vld [vmem:[%s724_s27 + $0x58] sm:$0xff]  ;;  %v377_v18 = vld [vmem:[%s724_s27 + $0x60] sm:$0xff] }
  0x17   : > { %v397_v32 = vadd.f32 %v365_v14, %v333_v20  ;;  %v398_v33 = vadd.f32 %v366_v15, %v334_v21  ;;  %v399_v38 = vadd.f32 %v367_v22, %v335_v26  ;;  %v400_v39 = vadd.f32 %v368_v23, %v336_v27  ;;  %v378_v19 = vld [vmem:[%s724_s27 + $0x68] sm:$0xff]  ;;  %v379_v26 = vld [vmem:[%s724_s27 + $0x70] sm:$0xff]  ;;  %v380_v27 = vld [vmem:[%s724_s27 + $0x78] sm:$0xff] }
  0x18   : > { %v401_v45 = vadd.f32 %v369_v28, %v337_v34  ;;  %v402_v46 = vadd.f32 %v370_v29, %v338_v35  ;;  %v403_v50 = vadd.f32 %v371_v36, %v339_v40  ;;  %v404_v51 = vadd.f32 %v372_v37, %v340_v41  ;;  %v648_v37 = vld [vmem:[%s711_s22 + $0x48] sm:$0xff]  }
  0x19   : > { %v429_v43 = vmax.f32 %v397_v32, 0.0  ;;  %v430_v44 = vmax.f32 %v398_v33, 0.0  ;;  %v431_v48 = vmax.f32 %v399_v38, 0.0  ;;  %v432_v49 = vmax.f32 %v400_v39, 0.0  ;;  %v647_v32 = vld [vmem:[%s711_s22 + $0x40] sm:$0xff]  }
  0x1a   : > { %v433_v53 = vmax.f32 %v401_v45, 0.0  ;;  %v434_v54 = vmax.f32 %v402_v46, 0.0  ;;  %v594_v55 = vunpack.c.l.bf16 %v643_v42  ;;  %v595_v56 = vunpack.c.h.bf16 %v643_v42  ;;  %v649_v42 = vld [vmem:[%s711_s22 + $0x50] sm:$0xff]  }
  0x1b   : > { %461 = vst [vmem:[%s761_s6] sm:$0xff] %v429_v43  ;;  %462 = vst [vmem:[%s761_s6 + $0x8] sm:$0xff] %v430_v44  ;;  %v435_v58 = vmax.f32 %v403_v50, 0.0  ;;  %v436_v59 = vmax.f32 %v404_v51, 0.0  ;;  %v598_v60 = vunpack.c.l.bf16 %v644_v47  ;;  %v599_v61 = vunpack.c.h.bf16 %v644_v47  ;;  %v650_v47 = vld [vmem:[%s711_s22 + $0x58] sm:$0xff]  }
  0x1c   : > { %463 = vst [vmem:[%s761_s6 + $0x10] sm:$0xff] %v431_v48  ;;  %464 = vst [vmem:[%s761_s6 + $0x18] sm:$0xff] %v432_v49  ;;  %v302_v62 = vmul.f32 %v594_v55, %v717_v1  ;;  %v303_v63 = vmul.f32 %v595_v56, %v717_v1  ;;  %v602_v0 = vunpack.c.l.bf16 %v645_v52  ;;  %v603_v2 = vunpack.c.h.bf16 %v645_v52  ;;  %v381_v56 = vld [vmem:[%s724_s27 + $0x80] sm:$0xff] }
  0x1d   : > { %465 = vst [vmem:[%s761_s6 + $0x20] sm:$0xff] %v433_v53  ;;  %466 = vst [vmem:[%s761_s6 + $0x28] sm:$0xff] %v434_v54  ;;  %v304_v6 = vmul.f32 %v598_v60, %v717_v1  ;;  %v305_v7 = vmul.f32 %v599_v61, %v717_v1  ;;  %v606_v8 = vunpack.c.l.bf16 %v646_v57  ;;  %v607_v9 = vunpack.c.h.bf16 %v646_v57  ;;  %v382_v57 = vld [vmem:[%s724_s27 + $0x88] sm:$0xff] }
  0x1e   : > { %467 = vst [vmem:[%s761_s6 + $0x30] sm:$0xff] %v435_v58  ;;  %468 = vst [vmem:[%s761_s6 + $0x38] sm:$0xff] %v436_v59  ;;  %v341_v10 = vadd.f32 %v730_v5, %v302_v62  ;;  %v342_v11 = vadd.f32 %v730_v5, %v303_v63  ;;  %v306_v14 = vmul.f32 %v602_v0, %v717_v1  ;;  %v610_v45 = vunpack.c.l.bf16 %v647_v32  ;;  %v383_v0 = vld [vmem:[%s724_s27 + $0x90] sm:$0xff] }
  0x1f   : > { %v307_v15 = vmul.f32 %v603_v2, %v717_v1  ;;  %v343_v16 = vadd.f32 %v730_v5, %v304_v6  ;;  %v344_v17 = vadd.f32 %v730_v5, %v305_v7  ;;  %v308_v20 = vmul.f32 %v606_v8, %v717_v1  ;;  %v384_v2 = vld [vmem:[%s724_s27 + $0x98] sm:$0xff]  ;;  %v385_v8 = vld [vmem:[%s724_s27 + $0xa0] sm:$0xff] }
  0x20   : > { %v309_v21 = vmul.f32 %v607_v9, %v717_v1  ;;  %v405_v22 = vadd.f32 %v373_v3, %v341_v10  ;;  %v406_v23 = vadd.f32 %v374_v4, %v342_v11  ;;  %v345_v24 = vadd.f32 %v730_v5, %v306_v14  ;;  %v386_v9 = vld [vmem:[%s724_s27 + $0xa8] sm:$0xff] }
  0x21   : > { %v346_v25 = vadd.f32 %v730_v5, %v307_v15  ;;  %v407_v28 = vadd.f32 %v375_v12, %v343_v16  ;;  %v408_v29 = vadd.f32 %v376_v13, %v344_v17  ;;  %v347_v30 = vadd.f32 %v730_v5, %v308_v20  ;;  %v387_v16 = vld [vmem:[%s724_s27 + $0xb0] sm:$0xff]  ;;  %v388_v17 = vld [vmem:[%s724_s27 + $0xb8] sm:$0xff] }
  0x22   : > { %v348_v31 = vadd.f32 %v730_v5, %v309_v21  ;;  %v437_v33 = vmax.f32 %v405_v22, 0.0  ;;  %v438_v34 = vmax.f32 %v406_v23, 0.0  ;;  %v409_v35 = vadd.f32 %v377_v18, %v345_v24  ;;  %v651_v22 = vld [vmem:[%s711_s22 + $0x60] sm:$0xff]  }
  0x23   : > { %v410_v36 = vadd.f32 %v378_v19, %v346_v25  ;;  %v439_v38 = vmax.f32 %v407_v28, 0.0  ;;  %v440_v39 = vmax.f32 %v408_v29, 0.0  ;;  %v411_v40 = vadd.f32 %v379_v26, %v347_v30 }
  0x24   : > { %v412_v41 = vadd.f32 %v380_v27, %v348_v31  ;;  %469 = vst [vmem:[%s761_s6 + $0x40] sm:$0xff] %v437_v33  ;;  %470 = vst [vmem:[%s761_s6 + $0x48] sm:$0xff] %v438_v34  ;;  %v441_v43 = vmax.f32 %v409_v35, 0.0  ;;  %v611_v46 = vunpack.c.h.bf16 %v647_v32  ;;  %v614_v50 = vunpack.c.l.bf16 %v648_v37  ;;  %v652_v27 = vld [vmem:[%s711_s22 + $0x68] sm:$0xff]   ;;  %v653_v32 = vld [vmem:[%s711_s22 + $0x70] sm:$0xff]  }
  0x25   : > { %v442_v44 = vmax.f32 %v410_v36, 0.0  ;;  %471 = vst [vmem:[%s761_s6 + $0x50] sm:$0xff] %v439_v38  ;;  %472 = vst [vmem:[%s761_s6 + $0x58] sm:$0xff] %v440_v39  ;;  %v443_v48 = vmax.f32 %v411_v40, 0.0  ;;  %v615_v51 = vunpack.c.h.bf16 %v648_v37  ;;  %v310_v52 = vmul.f32 %v610_v45, %v717_v1  ;;  %v654_v37 = vld [vmem:[%s711_s22 + $0x78] sm:$0xff]  }
  0x26   : > { %v444_v49 = vmax.f32 %v412_v41, 0.0  ;;  %473 = vst [vmem:[%s761_s6 + $0x60] sm:$0xff] %v441_v43  ;;  %v311_v53 = vmul.f32 %v611_v46, %v717_v1  ;;  %v618_v54 = vunpack.c.l.bf16 %v649_v42  ;;  %v619_v55 = vunpack.c.h.bf16 %v649_v42  ;;  %v389_v46 = vld [vmem:[%s724_s27 + $0xc0] sm:$0xff] }
  0x27   : > { %474 = vst [vmem:[%s761_s6 + $0x68] sm:$0xff] %v442_v44  ;;  %475 = vst [vmem:[%s761_s6 + $0x70] sm:$0xff] %v443_v48  ;;  %v312_v58 = vmul.f32 %v614_v50, %v717_v1  ;;  %v313_v59 = vmul.f32 %v615_v51, %v717_v1  ;;  %v622_v60 = vunpack.c.l.bf16 %v650_v47  ;;  %v623_v61 = vunpack.c.h.bf16 %v650_v47  ;;  %v390_v47 = vld [vmem:[%s724_s27 + $0xc8] sm:$0xff] }
  0x28   : > { %476 = vst [vmem:[%s761_s6 + $0x78] sm:$0xff] %v444_v49  ;;  %v349_v62 = vadd.f32 %v730_v5, %v310_v52  ;;  %v350_v63 = vadd.f32 %v730_v5, %v311_v53  ;;  %v314_v3 = vmul.f32 %v618_v54, %v717_v1  ;;  %v315_v4 = vmul.f32 %v619_v55, %v717_v1  ;;  %v391_v54 = vld [vmem:[%s724_s27 + $0xd0] sm:$0xff]  ;;  %v392_v55 = vld [vmem:[%s724_s27 + $0xd8] sm:$0xff] }
  0x29   : > { %v351_v6 = vadd.f32 %v730_v5, %v312_v58  ;;  %v352_v7 = vadd.f32 %v730_v5, %v313_v59  ;;  %v316_v10 = vmul.f32 %v622_v60, %v717_v1  ;;  %v317_v11 = vmul.f32 %v623_v61, %v717_v1  ;;  %v393_v60 = vld [vmem:[%s724_s27 + $0xe0] sm:$0xff]  ;;  %v394_v61 = vld [vmem:[%s724_s27 + $0xe8] sm:$0xff] }
  0x2a   : > { %v413_v12 = vadd.f32 %v381_v56, %v349_v62  ;;  %v414_v13 = vadd.f32 %v382_v57, %v350_v63  ;;  %v353_v14 = vadd.f32 %v730_v5, %v314_v3  ;;  %v354_v15 = vadd.f32 %v730_v5, %v315_v4 }
  0x2b   : > { %v415_v18 = vadd.f32 %v383_v0, %v351_v6  ;;  %v416_v19 = vadd.f32 %v384_v2, %v352_v7  ;;  %v355_v20 = vadd.f32 %v730_v5, %v316_v10  ;;  %v356_v21 = vadd.f32 %v730_v5, %v317_v11  ;;  %v395_v6 = vld [vmem:[%s724_s27 + $0xf0] sm:$0xff]  ;;  %v396_v7 = vld [vmem:[%s724_s27 + $0xf8] sm:$0xff] }
  0x2c   : > { %v445_v23 = vmax.f32 %v413_v12, 0.0  ;;  %v446_v24 = vmax.f32 %v414_v13, 0.0  ;;  %v417_v25 = vadd.f32 %v385_v8, %v353_v14  ;;  %v418_v26 = vadd.f32 %v386_v9, %v354_v15 }
  0x2d   : > { %v447_v28 = vmax.f32 %v415_v18, 0.0  ;;  %v448_v29 = vmax.f32 %v416_v19, 0.0  ;;  %v419_v30 = vadd.f32 %v387_v16, %v355_v20  ;;  %v420_v31 = vadd.f32 %v388_v17, %v356_v21 }
  0x2e   : > { %477 = vst [vmem:[%s761_s6 + $0x80] sm:$0xff] %v445_v23  ;;  %478 = vst [vmem:[%s761_s6 + $0x88] sm:$0xff] %v446_v24  ;;  %v449_v33 = vmax.f32 %v417_v25, 0.0  ;;  %v450_v34 = vmax.f32 %v418_v26, 0.0  ;;  %v626_v35 = vunpack.c.l.bf16 %v651_v22  ;;  %v627_v36 = vunpack.c.h.bf16 %v651_v22 }
  0x2f   : > { %479 = vst [vmem:[%s761_s6 + $0x90] sm:$0xff] %v447_v28  ;;  %480 = vst [vmem:[%s761_s6 + $0x98] sm:$0xff] %v448_v29  ;;  %v451_v38 = vmax.f32 %v419_v30, 0.0  ;;  %v452_v39 = vmax.f32 %v420_v31, 0.0  ;;  %v630_v40 = vunpack.c.l.bf16 %v652_v27  ;;  %v631_v41 = vunpack.c.h.bf16 %v652_v27 }
  0x30   : > { %481 = vst [vmem:[%s761_s6 + $0xa0] sm:$0xff] %v449_v33  ;;  %482 = vst [vmem:[%s761_s6 + $0xa8] sm:$0xff] %v450_v34  ;;  %v318_v42 = vmul.f32 %v626_v35, %v717_v1  ;;  %v319_v43 = vmul.f32 %v627_v36, %v717_v1  ;;  %v634_v44 = vunpack.c.l.bf16 %v653_v32  ;;  %v635_v45 = vunpack.c.h.bf16 %v653_v32 }
  0x31   : > { %483 = vst [vmem:[%s761_s6 + $0xb0] sm:$0xff] %v451_v38  ;;  %484 = vst [vmem:[%s761_s6 + $0xb8] sm:$0xff] %v452_v39  ;;  %v320_v48 = vmul.f32 %v630_v40, %v717_v1  ;;  %v321_v49 = vmul.f32 %v631_v41, %v717_v1  ;;  %v638_v50 = vunpack.c.l.bf16 %v654_v37  ;;  %v639_v51 = vunpack.c.h.bf16 %v654_v37 }
  0x32   : > { %v357_v52 = vadd.f32 %v730_v5, %v318_v42  ;;  %v358_v53 = vadd.f32 %v730_v5, %v319_v43  ;;  %v322_v56 = vmul.f32 %v634_v44, %v717_v1  ;;  %v323_v57 = vmul.f32 %v635_v45, %v717_v1 }
  0x33   : > { %v359_v58 = vadd.f32 %v730_v5, %v320_v48  ;;  %v360_v59 = vadd.f32 %v730_v5, %v321_v49  ;;  %v324_v62 = vmul.f32 %v638_v50, %v717_v1  ;;  %v325_v63 = vmul.f32 %v639_v51, %v717_v1 }
  0x34   : > { %v421_v0 = vadd.f32 %v389_v46, %v357_v52  ;;  %v422_v2 = vadd.f32 %v390_v47, %v358_v53  ;;  %v361_v3 = vadd.f32 %v730_v5, %v322_v56  ;;  %v362_v4 = vadd.f32 %v730_v5, %v323_v57 }
  0x35   : > { %v423_v8 = vadd.f32 %v391_v54, %v359_v58  ;;  %v424_v9 = vadd.f32 %v392_v55, %v360_v59  ;;  %v363_v10 = vadd.f32 %v730_v5, %v324_v62  ;;  %v364_v11 = vadd.f32 %v730_v5, %v325_v63 }
  0x36   : > { %v453_v12 = vmax.f32 %v421_v0, 0.0  ;;  %v454_v1 = vmax.f32 %v422_v2, 0.0  ;;  %v425_v13 = vadd.f32 %v393_v60, %v361_v3  ;;  %v426_v14 = vadd.f32 %v394_v61, %v362_v4 }
  0x37   : > { %v455_v15 = vmax.f32 %v423_v8, 0.0  ;;  %v456_v16 = vmax.f32 %v424_v9, 0.0  ;;  %v427_v17 = vadd.f32 %v395_v6, %v363_v10  ;;  %v428_v18 = vadd.f32 %v396_v7, %v364_v11 }
  0x38   : > { %485 = vst [vmem:[%s761_s6 + $0xc0] sm:$0xff] %v453_v12  ;;  %486 = vst [vmem:[%s761_s6 + $0xc8] sm:$0xff] %v454_v1  ;;  %v457_v19 = vmax.f32 %v425_v13, 0.0  ;;  %v458_v20 = vmax.f32 %v426_v14, 0.0 }
  0x39   : > { %487 = vst [vmem:[%s761_s6 + $0xd0] sm:$0xff] %v455_v15  ;;  %488 = vst [vmem:[%s761_s6 + $0xd8] sm:$0xff] %v456_v16  ;;  %v459_v21 = vmax.f32 %v427_v17, 0.0  ;;  %v460_v5 = vmax.f32 %v428_v18, 0.0 }
  0x3a   : > { %489 = vst [vmem:[%s761_s6 + $0xe0] sm:$0xff] %v457_v19  ;;  %490 = vst [vmem:[%s761_s6 + $0xe8] sm:$0xff] %v458_v20 }
  0x3b   : > { %491 = vst [vmem:[%s761_s6 + $0xf0] sm:$0xff] %v459_v21  ;;  %492 = vst [vmem:[%s761_s6 + $0xf8] sm:$0xff] %v460_v5 }
  0x3c PF: > { %s14_s15 = sadd.s32 1, %s669_s15  }
  0x3d   : > { %p11_p4 = scmp.ge.s32.totalorder %s14_s15, 4  }
  0x3f   :  { %13 = sbr.rel (!%p11_p4) target bundleno = 1 (0x1), region = 69 }

// kernel: bottleneck_forward.5
= control target key start
LH: loop header
LB: loop body
LE: loop exit
PB: predicated region body
PF: predicated region fallthrough
CT: control target
= control target key end

     0   :  { %s5207_s18 = smov 0   ;;  %s6447_s0 = inlined_call_operand.vmem [shape: bf16[2,18,18,128], index: 0, kind: input, shape index: {}]   ;;  %s6448_s1 = inlined_call_operand.vmem [shape: f32[1,128], index: 1, kind: input, shape index: {}]   ;;  %s6449_s2 = inlined_call_operand.vmem [shape: f32[1,128], index: 2, kind: input, shape index: {}]   ;;  %s6450_s3 = inlined_call_operand.vmem [shape: bf16[9,128,128], index: 3, kind: input, shape index: {}]   ;;  %s6451_s4 = inlined_call_operand.vmem [shape: bf16[2,256,128], index: 4, kind: output, shape index: {0}]   ;;  %s6452_s5 = inlined_call_operand.vmem [shape: f32[2,2,128], index: 5, kind: output, shape index: {1}]  }
   0x1 LB: > { %s3601_s19 = sadd.s32 4294967295, %s5172_s18   ;;  %p3605_p0 = scmp.ge.s32.totalorder %s5172_s18, 1  ;;  %s5172_s18 = sphi %s5207_s18, %s16_s18  }
   0x2   : > { %p190_p1 = scmp.lt.s32.totalorder %s5172_s18, 3 }
   0x4   : > { %p191_p2 = pnand %p3605_p0, %p190_p1 }
   0x6   : > { %194 = sbr.rel (%p191_p2) target bundleno = 589 (0x24d), region = 36 }
   0xd   : > { %v5084_v0 = vld [vmem:[%s6450_s3 + $0x40] sm:$0xff]   ;;  %v5174_v2 = vmov 0   ;;  %v5086_v4 = vld [vmem:[%s6450_s3 + $0x48] sm:$0xff]   ;;  %p222_p3 = scmp.lt.s32.totalorder %s3601_s19, 1  ;;  %v5088_v6 = vld [vmem:[%s6450_s3 + $0x50] sm:$0xff]   ;;  %v521_v9 = vlaneseq  ;;  %vm1337_vm3 = vcmask 1046528  }
   0xe   : > { %v5085_v1 = vld [vmem:[%s6450_s3 + $0x100] sm:$0xff]   ;;  %v5221_v3 = vrot.slane %v5174_v2, 1  ;;  %4368 = vmatprep.subr.bf16.mxu1 %v5084_v0  ;;  %v5087_v5 = vld [vmem:[%s6450_s3 + $0x108] sm:$0xff]   ;;  %v5089_v7 = vld [vmem:[%s6450_s3 + $0x110] sm:$0xff]   ;;  %vm661_vm2 = vsmask.f32 7424 }
   0xf   : > { %4560 = vmatprep.subr.bf16.mxu0 %v5085_v1  ;;  %4369 = vmatpush3.bf16.msra.mxu1 %v5084_v0  ;;  %s6577_s19 = smov (!%p222_p3, %s3601_s19), 1  ;;  %v5090_v8 = vld [vmem:[%s6450_s3 + $0x58] sm:$0xff]   ;;  %v5092_v11 = vld [vmem:[%s6450_s3 + $0x60] sm:$0xff]   ;;  %v5248_v12 = vshrl.u32 %v521_v9, 7  ;;  %v5094_v14 = vld [vmem:[%s6450_s3 + $0x68] sm:$0xff]   ;;  %vm5176_vm4 = vmmov 1  }
  0x10   : > { %6507 = vst [vmem:[#allocation2_spill] sm:$0xff] %v5221_v3  ;;  %4561 = vmatpush3.bf16.msra.mxu0 %v5085_v1  ;;  %4370 = vmatprep.subr.bf16.mxu1 %v5086_v4  ;;  %v5091_v10 = vld [vmem:[%s6450_s3 + $0x118] sm:$0xff]   ;;  %s5072_s11 = smul.u32 216, %s6577_s19  ;;  %v5093_v13 = vld [vmem:[%s6450_s3 + $0x120] sm:$0xff]   ;;  %v5095_v19 = vld [vmem:[%s6450_s3 + $0x128] sm:$0xff]   ;;  %s3984_s8 = sshll.u32 %s6577_s19, 7 }
  0x11   : > { %4562 = vmatprep.subr.bf16.mxu0 %v5087_v5  ;;  %4384 = vmatprep.mubr.bf16.mxu1 %v5221_v3  ;;  %v5266_v17 = vld [vmem:[%s6448_s1] ss:$0 sm:$0xff]  ;;  %v5269_v18 = vadd.s32 16, %v5248_v12  ;;  %vm525_vm0 = vcmp.ge.s32.totalorder %v5248_v12, 1  ;;  %v5096_v30 = vld [vmem:[%s6450_s3 + $0x70] sm:$0xff]   ;;  %v5098_v48 = vld [vmem:[%s6450_s3 + $0x78] sm:$0xff]  }
  0x12   : > { %s5256_s20 = scalar_lea.vmem %s6447_s0, %s5072_s11  ;;  %v5277_v23 = vld [vmem:[%s6449_s2] ss:$0 sm:$0xff]  ;;  %v5097_v33 = vld [vmem:[%s6450_s3 + $0x130] sm:$0xff]   ;;  %v5099_v53 = vld [vmem:[%s6450_s3 + $0x138] sm:$0xff]   ;;  %s6416_s11 = scalar_lea.vmem %s6451_s4, %s3984_s8  ;;  %vm3352_vm6 = vcmask 1040384  }
  0x13   : > { %4371 = vmatpush3.bf16.msra.mxu1 %v5086_v4  ;;  %v240_v15 = vld [vmem:[%s5256_s20 + $0xc] sm:$0xff]   ;;  %v242_v16 = vld [vmem:[%s5256_s20 + $0x14] sm:$0x1]  ;;  %v4129_v24 = vld [vmem:[%s5256_s20 + $0x18] sm:$0xff]   ;;  %vm536_vm1 = vcmp.le.s32.totalorder %v5269_v18, 16  ;;  %s3609_s12 = sshll.u32 %s6577_s19, 1 }
  0x14   : > { %4563 = vmatpush3.bf16.msra.mxu0 %v5087_v5  ;;  %4372 = vmatprep.subr.bf16.mxu1 %v5088_v6  ;;  %v294_v20 = vunpack.c.l.bf16 %v240_v15  ;;  %v295_v21 = vunpack.c.h.bf16 %v240_v15  ;;  %v296_v22 = vunpack.c.l.bf16 %v242_v16  ;;  %v4019_v28 = vunpack.c.l.bf16 %v4129_v24  ;;  %v245_v29 = vld [vmem:[%s5256_s20 + $0x20] sm:$0x1]  ;;  %v246_v38 = vld [vmem:[%s5256_s20 + $0x24] sm:$0xff]   ;;  %v248_v39 = vld [vmem:[%s5256_s20 + $0x2c] sm:$0x1]  ;;  %s235_s15 = scalar_lea.vmem %s6452_s5, %s3609_s12 }
  0x15   : > { %4564 = vmatprep.subr.bf16.mxu0 %v5089_v7  ;;  %v4020_v31 = vunpack.c.h.bf16 %v4129_v24  ;;  %v299_v32 = vunpack.c.l.bf16 %v245_v29  ;;  %v300_v42 = vunpack.c.l.bf16 %v246_v38  ;;  %v301_v43 = vunpack.c.h.bf16 %v246_v38  ;;  %v5100_v60 = vld [vmem:[%s6450_s3] sm:$0xff]   ;;  %v4130_v5 = vld [vmem:[%s5256_s20 + $0x30] sm:$0xff]   ;;  %v251_v15 = vld [vmem:[%s5256_s20 + $0x38] sm:$0x1] }
  0x16   : > { %v355_v25 = vmul.f32 %v5266_v17, %v294_v20  ;;  %v356_v26 = vmul.f32 %v5266_v17, %v295_v21  ;;  %v357_v27 = vmul.f32 %v5266_v17, %v296_v22  ;;  %v358_v37 = vmul.f32 %v4019_v28, %v5266_v17  ;;  %v5336_v0 = vld [vmem:[%s6450_s3 + $0x140] sm:$0xff]   ;;  %vm6021_vm5 = vmpackc.low %vm5176_vm4, %vm525_vm0 }
  0x17   : > { %4373 = vmatpush3.bf16.msra.mxu1 %v5088_v6  ;;  %v359_v40 = vmul.f32 %v4020_v31, %v5266_v17  ;;  %v360_v41 = vmul.f32 %v5266_v17, %v299_v32  ;;  %v302_v51 = vunpack.c.l.bf16 %v248_v39  ;;  %v361_v52 = vmul.f32 %v5266_v17, %v300_v42  ;;  %v252_v32 = vld [vmem:[%s5256_s20 + $0x3c] sm:$0xff]  }
  0x18   : > { %4565 = vmatpush3.bf16.msra.mxu0 %v5089_v7  ;;  %4374 = vmatprep.subr.bf16.mxu1 %v5090_v8  ;;  %v416_v34 = vadd.f32 %v5277_v23, %v355_v25  ;;  %v417_v35 = vadd.f32 %v5277_v23, %v356_v26  ;;  %v418_v36 = vadd.f32 %v5277_v23, %v357_v27  ;;  %v4023_v21 = vunpack.c.l.bf16 %v4130_v5 }
  0x19   : > { %4566 = vmatprep.subr.bf16.mxu0 %v5091_v10  ;;  %v5301_v47 = vadd.f32 %v5277_v23, %v358_v37  ;;  %v5307_v49 = vadd.f32 %v5277_v23, %v359_v40  ;;  %v421_v50 = vadd.f32 %v5277_v23, %v360_v41  ;;  %v362_v1 = vmul.f32 %v5266_v17, %v301_v43  ;;  %v254_v41 = vld [vmem:[%s5256_s20 + $0x44] sm:$0x1] }
  0x1a   : > { %v470_v44 = vmax.f32 %v416_v34, 0.0  ;;  %v471_v45 = vmax.f32 %v417_v35, 0.0  ;;  %v472_v46 = vmax.f32 %v418_v36, 0.0  ;;  %v363_v2 = vmul.f32 %v5266_v17, %v302_v51 }
  0x1b   : > { %4375 = vmatpush3.bf16.msra.mxu1 %v5090_v8  ;;  %v6462_v57 = vmax.f32 %v5301_v47, 0.0  ;;  %v6461_v61 = vmax.f32 %v5307_v49, 0.0  ;;  %v475_v62 = vmax.f32 %v421_v50, 0.0  ;;  %v5341_v4 = vadd.f32 %v5277_v23, %v361_v52 }
  0x1c   : > { %4567 = vmatpush3.bf16.msra.mxu0 %v5091_v10  ;;  %4376 = vmatprep.subr.bf16.mxu1 %v5092_v11  ;;  %v558_v54 = vsel %vm525_vm0, %v470_v44, 0.0  ;;  %v560_v55 = vsel %vm536_vm1, %v472_v46, 0.0  ;;  %v5318_v56 = vpack.c.bf16 %v471_v45, %v470_v44  ;;  %v4024_v31 = vunpack.c.h.bf16 %v4130_v5  ;;  %v5102_v46 = vld [vmem:[%s6450_s3 + $0x148] sm:$0xff]  }
  0x1d   : > { %4568 = vmatprep.subr.bf16.mxu0 %v5093_v13  ;;  %v5321_v58 = vpack.c.bf16 %v471_v45, %v558_v54  ;;  %v5323_v59 = vpack.c.bf16 %v560_v55, %v560_v55  ;;  %v561_v63 = vsel %vm525_vm0, %v6462_v57, 0.0  ;;  %v563_v9 = vsel %vm536_vm1, %v475_v62, 0.0  ;;  %v5106_v62 = vld [vmem:[%s6450_s3 + $0x10] sm:$0xff]  }
  0x1e   : > { %v5351_v10 = vpack.c.bf16 %v6461_v61, %v561_v63  ;;  %v6460_v20 = vmax.f32 %v5341_v4, 0.0  ;;  %v305_v36 = vunpack.c.l.bf16 %v251_v15  ;;  %v364_v39 = vmul.f32 %v4023_v21, %v5266_v17  ;;  %v4131_v63 = vld [vmem:[%s5256_s20 + $0x48] sm:$0xff]   ;;  %v5104_v21 = vld [vmem:[%s6450_s3 + $0x150] sm:$0xff]  }
  0x1f   : > { %4377 = vmatpush3.bf16.msra.mxu1 %v5092_v11  ;;  %v675_v6 = vshrl.u32 %v5321_v58, 16  ;;  %v677_v7 = vshll.u32 %v5321_v58, 16  ;;  %v682_v8 = vshll.u32 %v5323_v59, 16  ;;  %v5353_v11 = vpack.c.bf16 %v563_v9, %v563_v9 }
  0x20   : > { %4569 = vmatpush3.bf16.msra.mxu0 %v5093_v13  ;;  %4378 = vmatprep.subr.bf16.mxu1 %v5094_v14  ;;  %v5356_v13 = vadd.f32 %v5277_v23, %v362_v1  ;;  %v687_v22 = vshrl.u32 %v5351_v10, 16  ;;  %v689_v24 = vshll.u32 %v5351_v10, 16  ;;  %v564_v29 = vsel %vm525_vm0, %v6460_v20, 0.0  ;;  %v257_v1 = vld [vmem:[%s5256_s20 + $0x50] sm:$0x1] }
  0x21   : > { %4570 = vmatprep.subr.bf16.mxu0 %v5095_v19  ;;  %v679_v16 = vrot.slane %v677_v7, 1  ;;  %v694_v25 = vshll.u32 %v5353_v11, 16  ;;  %v365_v40 = vmul.f32 %v4024_v31, %v5266_v17  ;;  %v5393_v50 = vadd.f32 %v5277_v23, %v364_v39  ;;  %v5105_v39 = vld [vmem:[%s6450_s3 + $0x158] sm:$0xff]  }
  0x22   : > { %v6459_v26 = vmax.f32 %v5356_v13, 0.0  ;;  %v306_v52 = vunpack.c.l.bf16 %v252_v32  ;;  %v308_v7 = vunpack.c.l.bf16 %v254_v41  ;;  %v6548_v18 = vmax.f32 %v5341_v4, 0.0  ;;  %v5126_v4 = vld [vmem:[%s6450_s3 + $0x98] sm:$0xff]  }
  0x23   : > { %4379 = vmatpush3.bf16.msra.mxu1 %v5094_v14  ;;  %v424_v14 = vadd.f32 %v5277_v23, %v363_v2  ;;  %v680_v27 = vor.u32 %v679_v16, %v675_v6  ;;  %v696_v34 = vrot.slane %v694_v25, 1  ;;  %v5396_v51 = vadd.f32 %v5277_v23, %v365_v40 }
  0x24   : > { %4571 = vmatpush3.bf16.msra.mxu0 %v5095_v19  ;;  %4380 = vmatprep.subr.bf16.mxu1 %v5096_v30  ;;  %v684_v19 = vrot.slane %v682_v8, 1  ;;  %v5376_v35 = vpack.c.bf16 %v6459_v26, %v564_v29  ;;  %v6458_v5 = vmax.f32 %v5393_v50, 0.0  ;;  %v5109_v29 = vld [vmem:[%s6450_s3 + $0x18] sm:$0xff]  }
  0x25   : > { %4572 = vmatprep.subr.bf16.mxu0 %v5097_v33  ;;  %v478_v28 = vmax.f32 %v424_v14, 0.0  ;;  %v6457_v6 = vmax.f32 %v5396_v51, 0.0  ;;  %v367_v14 = vmul.f32 %v5266_v17, %v306_v52 }
  0x26   : > { %v685_v37 = vsel %vm661_vm2, %v680_v27, %v684_v19  ;;  %v699_v44 = vshrl.u32 %v5376_v35, 16  ;;  %v701_v45 = vshll.u32 %v5376_v35, 16  ;;  %v567_v19 = vsel %vm525_vm0, %v6458_v5, 0.0  ;;  %v4133_v5 = vld [vmem:[%s5256_s20 + $0x78] sm:$0xff]  }
  0x27   : > { %4381 = vmatpush3.bf16.msra.mxu1 %v5096_v30  ;;  %v5103_v30 = vld [vmem:[%s6450_s3 + $0x8] sm:$0xff]   ;;  %v566_v38 = vsel %vm536_vm1, %v478_v28, 0.0  ;;  %4576 = vmatprep.mubr.bf16.mxu0 %v685_v37  ;;  %v5428_v25 = vpack.c.bf16 %v6457_v6, %v567_v19  ;;  %v5431_v27 = vadd.f32 %v5277_v23, %v367_v14 }
  0x28   : > { %4573 = vmatpush3.bf16.msra.mxu0 %v5097_v33  ;;  %4382 = vmatprep.subr.bf16.mxu1 %v5098_v48  ;;  %v691_v33 = vrot.slane %v689_v24, 1  ;;  %v5384_v43 = vpack.c.bf16 %v566_v38, %v566_v38  ;;  %v703_v54 = vrot.slane %v701_v45, 1 }
  0x29   : > { %4574 = vmatprep.subr.bf16.mxu0 %v5099_v53  ;;  %v6456_v38 = vmax.f32 %v5431_v27, 0.0 }
  0x2a   : > { %v692_v42 = vor.u32 %v691_v33, %v687_v22  ;;  %v706_v55 = vshll.u32 %v5384_v43, 16  ;;  %v704_v8 = vor.u32 %v703_v54, %v699_v44  ;;  %v4027_v22 = vunpack.c.l.bf16 %v4131_v63  ;;  %v260_v54 = vld [vmem:[%s5256_s20 + $0x5c] sm:$0x1] }
  0x2b   : > { %4383 = vmatpush3.bf16.msra.mxu1 %v5098_v48  ;;  %v366_v48 = vmul.f32 %v5266_v17, %v305_v36  ;;  %v311_v33 = vunpack.c.l.bf16 %v257_v1  ;;  %v711_v36 = vshrl.u32 %v5428_v25, 16 }
  0x2c   : > { %4575 = vmatpush3.bf16.msra.mxu0 %v5099_v53  ;;  %4416 = vmatprep.subr.bf16.mxu1 %v5100_v60  ;;  %v5399_v53 = vsel %vm661_vm2, %v692_v42, %v696_v34  ;;  %v708_v9 = vrot.slane %v706_v55, 1  ;;  %v370_v42 = vmul.f32 %v4027_v22, %v5266_v17  ;;  %v5112_v55 = vld [vmem:[%s6450_s3 + $0x20] sm:$0xff]  }
  0x2d   : > { %4608 = vmatprep.subr.bf16.mxu0 %v5336_v0  ;;  %6508 = vst [vmem:[#allocation3_spill] sm:$0xff] %v5399_v53  ;;  %v427_v2 = vadd.f32 %v5277_v23, %v366_v48  ;;  %v570_v48 = vsel %vm525_vm0, %v6456_v38, 0.0  ;;  %v372_v52 = vmul.f32 %v5266_v17, %v311_v33  ;;  %v5107_v22 = vld [vmem:[%s6450_s3 + $0x160] sm:$0xff]  }
  0x2e   : > { %4385 = vmatmul.mubr.bf16.vlgmr.msra.gmra.mrb[0].mxu1 %v685_v37  ;;  %v5424_v24 = vsel %vm661_vm2, %v704_v8, %v708_v9  ;;  %v713_v37 = vshll.u32 %v5428_v25, 16  ;;  %v4132_v33 = vld [vmem:[%s5256_s20 + $0x60] sm:$0xff]  }
  0x2f   : > { %4417 = vmatpush3.bf16.msra.mxu1 %v5100_v60  ;;  %v307_v60 = vunpack.c.h.bf16 %v252_v32  ;;  %4577 = vmatmul.mubr.bf16.vlgmr.msra.gmra.mrb[0].mxu0 %v5399_v53  ;;  %v481_v16 = vmax.f32 %v427_v2, 0.0  ;;  %6509 = vst [vmem:[#allocation4_spill] sm:$0xff] %v5424_v24  ;;  %v4028_v32 = vunpack.c.h.bf16 %v4131_v63  ;;  %v5472_v63 = vadd.f32 %v5277_v23, %v370_v42  ;;  %v258_v2 = vld [vmem:[%s5256_s20 + $0x54] sm:$0xff]   ;;  %v5585_v38 = vld [vmem:[%s6450_s3 + $0x80] sm:$0xff]  }
  0x30   : > { %4418 = vmatprep.subr.bf16.mxu1 %v5103_v30  ;;  %4388 = vmatprep.mubr.bf16.mxu1 %v5399_v53  ;;  %v715_v45 = vrot.slane %v713_v37, 1  ;;  %v433_v14 = vadd.f32 %v5277_v23, %v372_v52  ;;  %v314_v42 = vunpack.c.l.bf16 %v260_v54 }
  0x31   : > { %4609 = vmatpush3.bf16.msra.mxu0 %v5336_v0  ;;  %v368_v15 = vmul.f32 %v5266_v17, %v307_v60  ;;  %v369_v0 = vmul.f32 %v5266_v17, %v308_v7  ;;  %4580 = vmatprep.mubr.bf16.mxu0 %v5424_v24  ;;  %v371_v44 = vmul.f32 %v4028_v32, %v5266_v17  ;;  %v6454_v19 = vmax.f32 %v5472_v63, 0.0 }
  0x32   : > { %4610 = vmatprep.subr.bf16.mxu0 %v5102_v46  ;;  %6510 = vst [vmem:[#allocation5_spill] sm:$0xff] %v5472_v63  ;;  %v716_v7 = vor.u32 %v715_v45, %v711_v36  ;;  %v312_v32 = vunpack.c.l.bf16 %v258_v2  ;;  %v5114_v36 = vld [vmem:[%s6450_s3 + $0x28] sm:$0xff]   ;;  %v375_v54 = vmul.f32 %v5266_v17, %v314_v42  ;;  %v4032_v42 = vunpack.c.h.bf16 %v4132_v33 }
  0x33   : > { %4419 = vmatpush3.bf16.msra.mxu1 %v5103_v30  ;;  %v5434_v28 = vadd.f32 %v5277_v23, %v368_v15  ;;  %v569_v30 = vsel %vm536_vm1, %v481_v16, 0.0  ;;  %v430_v31 = vadd.f32 %v5277_v23, %v369_v0  ;;  %v5475_v1 = vadd.f32 %v5277_v23, %v371_v44 }
  0x34   : > { %4420 = vmatprep.subr.bf16.mxu1 %v5106_v62  ;;  %v5444_v34 = vpack.c.bf16 %v569_v30, %v569_v30 }
  0x35   : > { %4611 = vmatpush3.bf16.msra.mxu0 %v5102_v46  ;;  %v6455_v40 = vmax.f32 %v5434_v28, 0.0  ;;  %v484_v41 = vmax.f32 %v430_v31, 0.0  ;;  %6511 = vst [vmem:[#allocation6_spill] sm:$0xff] %v5475_v1  ;;  %v6453_v0 = vmax.f32 %v5475_v1, 0.0  ;;  %v487_v31 = vmax.f32 %v433_v14, 0.0  ;;  %v5108_v14 = vld [vmem:[%s6450_s3 + $0x168] sm:$0xff]  }
  0x36   : > { %4389 = vmatmul.mubr.bf16.gmra.mrb[4].mxu1 %v5424_v24  ;;  %4612 = vmatprep.subr.bf16.mxu0 %v5104_v21  ;;  %v718_v46 = vshll.u32 %v5444_v34, 16  ;;  %v276_v24 = vld [vmem:[%s5256_s20 + $0x9c] sm:$0xff]  }
  0x37   : > { %4421 = vmatpush3.bf16.msra.mxu1 %v5106_v62  ;;  %v572_v60 = vsel %vm536_vm1, %v484_v41, 0.0  ;;  %v5469_v62 = vpack.c.bf16 %v6455_v40, %v570_v48  ;;  %v313_v41 = vunpack.c.h.bf16 %v258_v2  ;;  %v575_v45 = vsel %vm536_vm1, %v487_v31, 0.0 }
  0x38   : > { %4422 = vmatprep.subr.bf16.mxu1 %v5109_v29  ;;  %v720_v8 = vrot.slane %v718_v46, 1  ;;  %v5478_v9 = vpack.c.bf16 %v572_v60, %v572_v60  ;;  %v373_v48 = vmul.f32 %v5266_v17, %v312_v32  ;;  %v5509_v60 = vpack.c.bf16 %v575_v45, %v575_v45 }
  0x39   : > { %4613 = vmatpush3.bf16.msra.mxu0 %v5104_v21  ;;  %v723_v15 = vshrl.u32 %v5469_v62, 16  ;;  %v725_v16 = vshll.u32 %v5469_v62, 16 }
  0x3a   : > { %4614 = vmatprep.subr.bf16.mxu0 %v5105_v39  ;;  %v5489_v21 = vsel %vm661_vm2, %v716_v7, %v720_v8  ;;  %v730_v30 = vshll.u32 %v5478_v9, 16  ;;  %v374_v7 = vmul.f32 %v5266_v17, %v313_v41  ;;  %v742_v31 = vshll.u32 %v5509_v60, 16 }
  0x3b   : > { %4423 = vmatpush3.bf16.msra.mxu1 %v5109_v29  ;;  %6512 = vst [vmem:[#allocation7_spill] sm:$0xff] %v5489_v21  ;;  %4581 = vmatmul.mubr.bf16.gmra.mrb[4].mxu0 %v5489_v21  ;;  %v727_v37 = vrot.slane %v725_v16, 1  ;;  %v573_v29 = vsel %vm525_vm0, %v6454_v19, 0.0  ;;  %v5520_v16 = vadd.f32 %v5277_v23, %v373_v48 }
  0x3c   : > { %4424 = vmatprep.subr.bf16.mxu1 %v5112_v55  ;;  %4392 = vmatprep.mubr.bf16.mxu1 %v5489_v21  ;;  %v732_v44 = vrot.slane %v730_v30, 1  ;;  %v5506_v46 = vpack.c.bf16 %v6453_v0, %v573_v29  ;;  %v5527_v32 = vadd.f32 %v5277_v23, %v374_v7  ;;  %v5116_v29 = vld [vmem:[%s6450_s3 + $0x30] sm:$0xff]   ;;  %v744_v45 = vrot.slane %v742_v31, 1 }
  0x3d   : > { %4615 = vmatpush3.bf16.msra.mxu0 %v5105_v39  ;;  %v728_v52 = vor.u32 %v727_v37, %v723_v15  ;;  %v263_v39 = vld [vmem:[%s5256_s20 + $0x68] sm:$0x1]  ;;  %v4031_v15 = vunpack.c.l.bf16 %v4132_v33  ;;  %v436_v37 = vadd.f32 %v5277_v23, %v375_v54  ;;  %v6466_v41 = vmax.f32 %v5520_v16, 0.0  ;;  %v5110_v54 = vld [vmem:[%s6450_s3 + $0x170] sm:$0xff]  }
  0x3e   : > { %4616 = vmatprep.subr.bf16.mxu0 %v5107_v22  ;;  %v735_v2 = vshrl.u32 %v5506_v46, 16  ;;  %v737_v8 = vshll.u32 %v5506_v46, 16  ;;  %v6464_v48 = vmax.f32 %v5527_v32, 0.0  ;;  %v264_v0 = vld [vmem:[%s5256_s20 + $0x6c] sm:$0xff]   ;;  %v1354_v21 = vrot.slane %v5478_v9, 1 }
  0x3f   : > { %4425 = vmatpush3.bf16.msra.mxu1 %v5112_v55  ;;  %v5523_v30 = vsel %vm661_vm2, %v728_v52, %v732_v44  ;;  %v317_v44 = vunpack.c.l.bf16 %v263_v39  ;;  %v490_v52 = vmax.f32 %v436_v37, 0.0  ;;  %v376_v7 = vmul.f32 %v4031_v15, %v5266_v17 }
  0x40   : > { %6513 = vst [vmem:[#allocation8_spill] sm:$0xff] %v5523_v30  ;;  %4426 = vmatprep.subr.bf16.mxu1 %v5114_v36  ;;  %4584 = vmatprep.mubr.bf16.mxu0 %v5523_v30  ;;  %v739_v55 = vrot.slane %v737_v8, 1  ;;  %v576_v33 = vsel %vm525_vm0, %v6466_v41, 0.0  ;;  %v377_v39 = vmul.f32 %v4032_v42, %v5266_v17  ;;  %v5118_v8 = vld [vmem:[%s6450_s3 + $0x38] sm:$0xff]   ;;  %v1341_v37 = vrot.slane %v5321_v58, 1 }
  0x41   : > { %4393 = vmatmul.mubr.bf16.gmra.mrb[8].mxu1 %v5523_v30  ;;  %4617 = vmatpush3.bf16.msra.mxu0 %v5107_v22  ;;  %v378_v22 = vmul.f32 %v5266_v17, %v317_v44  ;;  %v578_v15 = vsel %vm536_vm1, %v490_v52, 0.0  ;;  %v5558_v31 = vadd.f32 %v5277_v23, %v376_v7  ;;  %v318_v40 = vunpack.c.l.bf16 %v264_v0 }
  0x42   : > { %v740_v19 = vor.u32 %v739_v55, %v735_v2  ;;  %4618 = vmatprep.subr.bf16.mxu0 %v5108_v14  ;;  %v5555_v2 = vpack.c.bf16 %v6464_v48, %v576_v33  ;;  %v5564_v55 = vpack.c.bf16 %v578_v15, %v578_v15  ;;  %v5567_v42 = vadd.f32 %v5277_v23, %v377_v39  ;;  %v5111_v15 = vld [vmem:[%s6450_s3 + $0x178] sm:$0xff]  }
  0x43   : > { %4427 = vmatpush3.bf16.msra.mxu1 %v5114_v36  ;;  %v439_v44 = vadd.f32 %v5277_v23, %v378_v22  ;;  %v6463_v58 = vmax.f32 %v5558_v31, 0.0  ;;  %v319_v6 = vunpack.c.h.bf16 %v264_v0  ;;  %v1344_v48 = vrot.slane %v5351_v10, 1 }
  0x44   : > { %4428 = vmatprep.subr.bf16.mxu1 %v5116_v29  ;;  %v5562_v36 = vsel %vm661_vm2, %v740_v19, %v744_v45  ;;  %v747_v52 = vshrl.u32 %v5555_v2, 16  ;;  %v749_v7 = vshll.u32 %v5555_v2, 16  ;;  %v1342_v19 = vrot.slane %v5323_v59, 1  ;;  %v266_v45 = vld [vmem:[%s5256_s20 + $0x74] sm:$0x1] }
  0x45   : > { %6514 = vst [vmem:[#allocation9_spill] sm:$0xff] %v5562_v36  ;;  %4585 = vmatmul.mubr.bf16.gmra.mrb[8].mxu0 %v5562_v36  ;;  %4396 = vmatprep.mubr.bf16.mxu1 %v5562_v36  ;;  %v754_v33 = vshll.u32 %v5564_v55, 16  ;;  %v6465_v39 = vmax.f32 %v5567_v42, 0.0  ;;  %v493_v22 = vmax.f32 %v439_v44, 0.0 }
  0x46   : > { %4619 = vmatpush3.bf16.msra.mxu0 %v5108_v14  ;;  %v751_v59 = vrot.slane %v749_v7, 1  ;;  %v579_v14 = vsel %vm525_vm0, %v6463_v58, 0.0  ;;  %v5592_v44 = vsel %vm1337_vm3, %v1341_v37, %v1342_v19  ;;  %v320_v7 = vunpack.c.l.bf16 %v266_v45  ;;  %v269_v19 = vld [vmem:[%s5256_s20 + $0x80] sm:$0x1] }
  0x47   : > { %4429 = vmatpush3.bf16.msra.mxu1 %v5116_v29  ;;  %4620 = vmatprep.subr.bf16.mxu0 %v5110_v54  ;;  %6515 = vst [vmem:[#allocation10_spill] sm:$0xff] %v5592_v44  ;;  %v756_v29 = vrot.slane %v754_v33, 1  ;;  %v581_v26 = vsel %vm536_vm1, %v493_v22, 0.0  ;;  %v5599_v20 = vpack.c.bf16 %v6465_v39, %v579_v14  ;;  %v379_v58 = vmul.f32 %v5266_v17, %v318_v40 }
  0x48   : > { %4430 = vmatprep.subr.bf16.mxu1 %v5118_v8  ;;  %v752_v61 = vor.u32 %v751_v59, %v747_v52  ;;  %v5601_v57 = vpack.c.bf16 %v581_v26, %v581_v26  ;;  %v380_v37 = vmul.f32 %v5266_v17, %v319_v6  ;;  %v381_v22 = vmul.f32 %v5266_v17, %v320_v7 }
  0x49   : > { %v759_v0 = vshrl.u32 %v5599_v20, 16  ;;  %v761_v33 = vshll.u32 %v5599_v20, 16  ;;  %v5615_v40 = vadd.f32 %v5277_v23, %v379_v58  ;;  %v4035_v52 = vunpack.c.l.bf16 %v4133_v5 }
  0x4a   : > { %4621 = vmatpush3.bf16.msra.mxu0 %v5110_v54  ;;  %v5611_v45 = vsel %vm661_vm2, %v752_v61, %v756_v29  ;;  %v766_v26 = vshll.u32 %v5601_v57, 16  ;;  %v5618_v6 = vadd.f32 %v5277_v23, %v380_v37  ;;  %v5623_v54 = vld [vmem:[%s6450_s3 + $0x180] sm:$0xff]   ;;  %v442_v10 = vadd.f32 %v5277_v23, %v381_v22 }
  0x4b   : > { %4431 = vmatpush3.bf16.msra.mxu1 %v5118_v8  ;;  %6516 = vst [vmem:[#allocation11_spill] sm:$0xff] %v5611_v45  ;;  %4622 = vmatprep.subr.bf16.mxu0 %v5111_v15  ;;  %v763_v61 = vrot.slane %v761_v33, 1  ;;  %v1345_v8 = vrot.slane %v5353_v11, 1  ;;  %v6468_v59 = vmax.f32 %v5615_v40, 0.0  ;;  %v4036_v29 = vunpack.c.h.bf16 %v4133_v5  ;;  %v270_v33 = vld [vmem:[%s5256_s20 + $0x84] sm:$0xff]  }
  0x4c   : > { %4464 = vmatprep.subr.bf16.mxu1 %v5585_v38  ;;  %4588 = vmatprep.mubr.bf16.mxu0 %v5611_v45  ;;  %v768_v58 = vrot.slane %v766_v26, 1  ;;  %v6467_v14 = vmax.f32 %v5618_v6, 0.0  ;;  %v496_v37 = vmax.f32 %v442_v10, 0.0  ;;  %v323_v41 = vunpack.c.l.bf16 %v269_v19 }
  0x4d   : > { %4397 = vmatmul.mubr.bf16.gmra.mrb[12].mxu1 %v5611_v45  ;;  %v764_v7 = vor.u32 %v763_v61, %v759_v0  ;;  %v5633_v39 = vsel %vm1337_vm3, %v1344_v48, %v1345_v8  ;;  %v582_v11 = vsel %vm525_vm0, %v6468_v59, 0.0  ;;  %v382_v22 = vmul.f32 %v4035_v52, %v5266_v17 }
  0x4e   : > { %4623 = vmatpush3.bf16.msra.mxu0 %v5111_v15  ;;  %6517 = vst [vmem:[#allocation12_spill] sm:$0xff] %v5633_v39  ;;  %v383_v26 = vmul.f32 %v4036_v29, %v5266_v17  ;;  %v1347_v5 = vrot.slane %v5376_v35, 1  ;;  %v272_v15 = vld [vmem:[%s5256_s20 + $0x8c] sm:$0x1]  ;;  %v584_v48 = vsel %vm536_vm1, %v496_v37, 0.0  ;;  %v5652_v19 = vpack.c.bf16 %v6467_v14, %v582_v11 }
  0x4f   : > { %4656 = vmatprep.subr.bf16.mxu0 %v5623_v54  ;;  %v5646_v0 = vsel %vm661_vm2, %v764_v7, %v768_v58  ;;  %v384_v61 = vmul.f32 %v5266_v17, %v323_v41  ;;  %v5657_v10 = vpack.c.bf16 %v584_v48, %v584_v48  ;;  %v5660_v35 = vadd.f32 %v5277_v23, %v382_v22 }
  0x50   : > { %6518 = vst [vmem:[#allocation13_spill] sm:$0xff] %v5646_v0  ;;  %4589 = vmatmul.mubr.bf16.gmra.mrb[12].mxu0 %v5646_v0  ;;  %4400 = vmatprep.mubr.bf16.mxu1 %v5646_v0  ;;  %v5663_v8 = vadd.f32 %v5277_v23, %v383_v26  ;;  %v1348_v52 = vrot.slane %v5384_v43, 1  ;;  %v771_v58 = vshrl.u32 %v5652_v19, 16  ;;  %v773_v41 = vshll.u32 %v5652_v19, 16 }
  0x51   : > { %4624 = vmatprep.mubr.bf16.mxu0 %v5592_v44  ;;  %v445_v29 = vadd.f32 %v5277_v23, %v384_v61  ;;  %v324_v7 = vunpack.c.l.bf16 %v270_v33  ;;  %v778_v37 = vshll.u32 %v5657_v10, 16  ;;  %v6472_v11 = vmax.f32 %v5660_v35, 0.0 }
  0x52   : > { %v5674_v26 = vsel %vm1337_vm3, %v1347_v5, %v1348_v52  ;;  %v775_v48 = vrot.slane %v773_v41, 1  ;;  %v325_v14 = vunpack.c.h.bf16 %v270_v33  ;;  %v326_v59 = vunpack.c.l.bf16 %v272_v15  ;;  %v5115_v15 = vld [vmem:[%s6450_s3 + $0x188] sm:$0xff]  }
  0x53   : > { %6519 = vst [vmem:[#allocation14_spill] sm:$0xff] %v5674_v26  ;;  %v499_v43 = vmax.f32 %v445_v29, 0.0  ;;  %v780_v3 = vrot.slane %v778_v37, 1  ;;  %v585_v61 = vsel %vm525_vm0, %v6472_v11, 0.0  ;;  %v385_v0 = vmul.f32 %v5266_v17, %v324_v7  ;;  %v4134_v37 = vld [vmem:[%s5256_s20 + $0x90] sm:$0xff]  }
  0x54   : > { %v1350_v45 = vrot.slane %v5428_v25, 1  ;;  %v776_v22 = vor.u32 %v775_v48, %v771_v58  ;;  %v6520_v52 = vmax.f32 %v5663_v8, 0.0  ;;  %v386_v33 = vmul.f32 %v5266_v17, %v325_v14 }
  0x55   : > { %v587_v5 = vsel %vm536_vm1, %v499_v43, 0.0  ;;  %v387_v7 = vmul.f32 %v5266_v17, %v326_v59  ;;  %v5696_v25 = vadd.f32 %v5277_v23, %v385_v0  ;;  %v1351_v58 = vrot.slane %v5444_v34, 1 }
  0x56   : > { %v5686_v41 = vpack.c.bf16 %v6520_v52, %v585_v61  ;;  %v5692_v29 = vpack.c.bf16 %v587_v5, %v587_v5  ;;  %v5701_v48 = vsel %vm661_vm2, %v776_v22, %v780_v3  ;;  %v5706_v61 = vadd.f32 %v5277_v23, %v386_v33  ;;  %v275_v5 = vld [vmem:[%s5256_s20 + $0x98] sm:$0x1] }
  0x57   : > { %6521 = vst [vmem:[#allocation15_spill] sm:$0xff] %v5701_v48  ;;  %4401 = vmatmul.mubr.bf16.gmra.mrb[16].mxu1 %v5701_v48  ;;  %v448_v34 = vadd.f32 %v5277_v23, %v387_v7  ;;  %v6477_v0 = vmax.f32 %v5696_v25, 0.0  ;;  %v5715_v3 = vsel %vm1337_vm3, %v1350_v45, %v1351_v58  ;;  %v4039_v33 = vunpack.c.l.bf16 %v4134_v37 }
  0x58   : > { %v783_v43 = vshrl.u32 %v5686_v41, 16  ;;  %v785_v14 = vshll.u32 %v5686_v41, 16  ;;  %4625 = vmatmul.mubr.bf16.vlgmr.msra.gmra.mrb[0].mxu0 %v5633_v39  ;;  %v790_v59 = vshll.u32 %v5692_v29, 16  ;;  %6522 = vst [vmem:[#allocation16_spill] sm:$0xff] %v5715_v3  ;;  %v6480_v52 = vmax.f32 %v5706_v61, 0.0  ;;  %v282_v39 = vld [vmem:[%s5256_s20 + $0xb4] sm:$0xff]  }
  0x59   : > { %4657 = vmatpush3.bf16.msra.mxu0 %v5623_v54  ;;  %4628 = vmatprep.mubr.bf16.mxu0 %v5674_v26  ;;  %v4040_v11 = vunpack.c.h.bf16 %v4134_v37  ;;  %v502_v36 = vmax.f32 %v448_v34, 0.0  ;;  %v588_v7 = vsel %vm525_vm0, %v6477_v0, 0.0  ;;  %v329_v45 = vunpack.c.l.bf16 %v275_v5  ;;  %v5117_v54 = vld [vmem:[%s6450_s3 + $0x190] sm:$0xff]   ;;  %v278_v34 = vld [vmem:[%s5256_s20 + $0xa4] sm:$0x1] }
  0x5a   : > { %v787_v22 = vrot.slane %v785_v14, 1  ;;  %v792_v48 = vrot.slane %v790_v59, 1  ;;  %4658 = vmatprep.subr.bf16.mxu0 %v5115_v15  ;;  %v5729_v14 = vpack.c.bf16 %v6480_v52, %v588_v7  ;;  %v388_v37 = vmul.f32 %v4039_v33, %v5266_v17  ;;  %v4135_v52 = vld [vmem:[%s5256_s20 + $0xa8] sm:$0xff]  }
  0x5b   : > { %v389_v59 = vmul.f32 %v4040_v11, %v5266_v17  ;;  %v590_v30 = vsel %vm536_vm1, %v502_v36, 0.0  ;;  %v390_v0 = vmul.f32 %v5266_v17, %v329_v45  ;;  %v1353_v5 = vrot.slane %v5469_v62, 1 }
  0x5c   : > { %v788_v58 = vor.u32 %v787_v22, %v783_v43  ;;  %v5743_v22 = vpack.c.bf16 %v590_v30, %v590_v30  ;;  %v795_v33 = vshrl.u32 %v5729_v14, 16  ;;  %v797_v11 = vshll.u32 %v5729_v14, 16  ;;  %v5119_v30 = vld [vmem:[%s6450_s3 + $0x198] sm:$0xff]  }
  0x5d   : > { %4659 = vmatpush3.bf16.msra.mxu0 %v5115_v15  ;;  %v5749_v36 = vadd.f32 %v5277_v23, %v388_v37  ;;  %v5752_v17 = vadd.f32 %v5277_v23, %v389_v59  ;;  %v451_v62 = vadd.f32 %v5277_v23, %v390_v0  ;;  %v5756_v9 = vsel %vm1337_vm3, %v1353_v5, %v1354_v21  ;;  %v5769_v5 = vld [vmem:[%s6448_s1] ss:$0 sm:$0xff] }
  0x5e   : > { %v5741_v43 = vsel %vm661_vm2, %v788_v58, %v792_v48  ;;  %6524 = vst [vmem:[#allocation18_spill] sm:$0xff] %v5756_v9  ;;  %v799_v48 = vrot.slane %v797_v11, 1  ;;  %v802_v15 = vshll.u32 %v5743_v22, 16  ;;  %v330_v7 = vunpack.c.l.bf16 %v276_v24  ;;  %4660 = vmatprep.subr.bf16.mxu0 %v5117_v54 }
  0x5f   : > { %6523 = vst [vmem:[#allocation17_spill] sm:$0xff] %v5741_v43  ;;  %4404 = vmatprep.mubr.bf16.mxu1 %v5741_v43  ;;  %v331_v45 = vunpack.c.h.bf16 %v276_v24  ;;  %v6481_v58 = vmax.f32 %v5749_v36, 0.0  ;;  %v6482_v23 = vmax.f32 %v5752_v17, 0.0  ;;  %v505_v21 = vmax.f32 %v451_v62, 0.0 }
  0x60   : > { %4629 = vmatmul.mubr.bf16.gmra.mrb[4].mxu0 %v5715_v3  ;;  %v332_v0 = vunpack.c.l.bf16 %v278_v34  ;;  %v800_v37 = vor.u32 %v799_v48, %v795_v33  ;;  %v804_v59 = vrot.slane %v802_v15, 1  ;;  %v391_v24 = vmul.f32 %v5769_v5, %v330_v7  ;;  %v281_v15 = vld [vmem:[%s5256_s20 + $0xb0] sm:$0x1]  ;;  %v5121_v7 = vld [vmem:[%s6450_s3 + $0x1a0] sm:$0xff]  }
  0x61   : > { %4632 = vmatprep.mubr.bf16.mxu0 %v5756_v9  ;;  %v392_v11 = vmul.f32 %v5769_v5, %v331_v45  ;;  %4661 = vmatpush3.bf16.msra.mxu0 %v5117_v54  ;;  %v591_v34 = vsel %vm525_vm0, %v6481_v58, 0.0  ;;  %v593_v33 = vsel %vm536_vm1, %v505_v21, 0.0  ;;  %v1356_v48 = vrot.slane %v5506_v46, 1  ;;  %v5798_v21 = vld [vmem:[%s6449_s2] ss:$0 sm:$0xff] }
  0x62   : > { %v393_v62 = vmul.f32 %v5769_v5, %v332_v0  ;;  %4662 = vmatprep.subr.bf16.mxu0 %v5119_v30  ;;  %v5787_v54 = vsel %vm661_vm2, %v800_v37, %v804_v59  ;;  %v5791_v45 = vpack.c.bf16 %v6482_v23, %v591_v34  ;;  %v5793_v58 = vpack.c.bf16 %v593_v33, %v593_v33 }
  0x63   : > { %6525 = vst [vmem:[#allocation19_spill] sm:$0xff] %v5787_v54  ;;  %v5801_v46 = vadd.f32 %v5798_v21, %v391_v24  ;;  %4405 = vmatmul.mubr.bf16.gmra.mrb[20].mxu1 %v5787_v54  ;;  %v5805_v0 = vadd.f32 %v5798_v21, %v392_v11  ;;  %v1357_v59 = vrot.slane %v5509_v60, 1  ;;  %v4043_v34 = vunpack.c.l.bf16 %v4135_v52  ;;  %v5123_v60 = vld [vmem:[%s6450_s3 + $0x1a8] sm:$0xff]  }
  0x64   : > { %v454_v37 = vadd.f32 %v5798_v21, %v393_v62  ;;  %v807_v33 = vshrl.u32 %v5791_v45, 16  ;;  %v809_v23 = vshll.u32 %v5791_v45, 16  ;;  %v814_v43 = vshll.u32 %v5793_v58, 16 }
  0x65   : > { %v6494_v9 = vmax.f32 %v5801_v46, 0.0  ;;  %4663 = vmatpush3.bf16.msra.mxu0 %v5119_v30  ;;  %v6497_v24 = vmax.f32 %v5805_v0, 0.0  ;;  %v5815_v11 = vsel %vm1337_vm3, %v1356_v48, %v1357_v59  ;;  %v4044_v53 = vunpack.c.h.bf16 %v4135_v52 }
  0x66   : > { %v508_v54 = vmax.f32 %v454_v37, 0.0  ;;  %6526 = vst [vmem:[#allocation20_spill] sm:$0xff] %v5815_v11  ;;  %4664 = vmatprep.subr.bf16.mxu0 %v5121_v7  ;;  %v811_v62 = vrot.slane %v809_v23, 1  ;;  %v816_v3 = vrot.slane %v814_v43, 1  ;;  %v335_v26 = vunpack.c.l.bf16 %v281_v15 }
  0x67   : > { %v594_v30 = vsel %vm525_vm0, %v6494_v9, 0.0  ;;  %v394_v48 = vmul.f32 %v5769_v5, %v4043_v34  ;;  %v395_v23 = vmul.f32 %v5769_v5, %v4044_v53  ;;  %v1359_v15 = vrot.slane %v5555_v2, 1  ;;  %v5125_v53 = vld [vmem:[%s6450_s3 + $0x1b0] sm:$0xff]  }
  0x68   : > { %v596_v37 = vsel %vm536_vm1, %v508_v54, 0.0  ;;  %v5828_v52 = vpack.c.bf16 %v6497_v24, %v594_v30  ;;  %4633 = vmatmul.mubr.bf16.gmra.mrb[8].mxu0 %v5815_v11  ;;  %v812_v43 = vor.u32 %v811_v62, %v807_v33  ;;  %v396_v9 = vmul.f32 %v5769_v5, %v335_v26  ;;  %v284_v62 = vld [vmem:[%s5256_s20 + $0xbc] sm:$0x1] }
  0x69   : > { %v5833_v59 = vpack.c.bf16 %v596_v37, %v596_v37  ;;  %4665 = vmatpush3.bf16.msra.mxu0 %v5121_v7  ;;  %v5841_v24 = vadd.f32 %v5798_v21, %v394_v48  ;;  %v5844_v34 = vadd.f32 %v5798_v21, %v395_v23  ;;  %v1360_v33 = vrot.slane %v5564_v55, 1 }
  0x6a   : > { %v819_v54 = vshrl.u32 %v5828_v52, 16  ;;  %v821_v30 = vshll.u32 %v5828_v52, 16  ;;  %4666 = vmatprep.subr.bf16.mxu0 %v5123_v60  ;;  %v5850_v26 = vsel %vm661_vm2, %v812_v43, %v816_v3  ;;  %v457_v7 = vadd.f32 %v5798_v21, %v396_v9 }
  0x6b   : > { %v826_v2 = vshll.u32 %v5833_v59, 16  ;;  %4408 = vmatprep.mubr.bf16.mxu1 %v5850_v26  ;;  %v6504_v48 = vmax.f32 %v5841_v24, 0.0  ;;  %v6503_v23 = vmax.f32 %v5844_v34, 0.0  ;;  %v336_v11 = vunpack.c.l.bf16 %v282_v39 }
  0x6c   : > { %v823_v37 = vrot.slane %v821_v30, 1  ;;  %v511_v1 = vmax.f32 %v457_v7, 0.0  ;;  %v5860_v3 = vsel %vm1337_vm3, %v1359_v15, %v1360_v33  ;;  %v337_v43 = vunpack.c.h.bf16 %v282_v39 }
  0x6d   : > { %v828_v44 = vrot.slane %v826_v2, 1  ;;  %4667 = vmatpush3.bf16.msra.mxu0 %v5123_v60  ;;  %v597_v55 = vsel %vm525_vm0, %v6504_v48, 0.0  ;;  %4636 = vmatprep.mubr.bf16.mxu0 %v5860_v3  ;;  %v338_v9 = vunpack.c.l.bf16 %v284_v62  ;;  %v397_v30 = vmul.f32 %v5769_v5, %v336_v11  ;;  %v5127_v2 = vld [vmem:[%s6450_s3 + $0x1b8] sm:$0xff]  }
  0x6e   : > { %v824_v63 = vor.u32 %v823_v37, %v819_v54  ;;  %4668 = vmatprep.subr.bf16.mxu0 %v5125_v53  ;;  %v599_v39 = vsel %vm536_vm1, %v511_v1, 0.0  ;;  %v5875_v60 = vpack.c.bf16 %v6503_v23, %v597_v55  ;;  %v398_v15 = vmul.f32 %v5769_v5, %v337_v43 }
  0x6f   : > { %v1362_v54 = vrot.slane %v5599_v20, 1  ;;  %v5882_v11 = vpack.c.bf16 %v599_v39, %v599_v39  ;;  %v399_v33 = vmul.f32 %v5769_v5, %v338_v9  ;;  %v5886_v62 = vadd.f32 %v5798_v21, %v397_v30  ;;  %v5902_v30 = vld [vmem:[%s6450_s3 + $0x1c0] sm:$0xff]  }
  0x70   : > { %v5880_v7 = vsel %vm661_vm2, %v824_v63, %v828_v44  ;;  %v831_v1 = vshrl.u32 %v5875_v60, 16  ;;  %v833_v37 = vshll.u32 %v5875_v60, 16  ;;  %v5892_v43 = vadd.f32 %v5798_v21, %v398_v15 }
  0x71   : > { %6527 = vst [vmem:[#allocation21_spill] sm:$0xff] %v5880_v7  ;;  %4409 = vmatmul.mubr.bf16.gmra.mrb[24].mxu1 %v5880_v7  ;;  %v1363_v20 = vrot.slane %v5601_v57, 1  ;;  %4669 = vmatpush3.bf16.msra.mxu0 %v5125_v53  ;;  %v838_v63 = vshll.u32 %v5882_v11, 16  ;;  %v460_v44 = vadd.f32 %v5798_v21, %v399_v33  ;;  %v512_v55 = vmax.f32 %v5886_v62, 0.0 }
  0x72   : > { %v1365_v9 = vrot.slane %v5652_v19, 1  ;;  %4670 = vmatprep.subr.bf16.mxu0 %v5127_v2  ;;  %v835_v39 = vrot.slane %v833_v37, 1  ;;  %v513_v15 = vmax.f32 %v5892_v43, 0.0  ;;  %v1366_v53 = vrot.slane %v5657_v10, 1 }
  0x73   : > { %v5906_v57 = vsel %vm1337_vm3, %v1362_v54, %v1363_v20  ;;  %v840_v23 = vrot.slane %v838_v63, 1  ;;  %v514_v33 = vmax.f32 %v460_v44, 0.0  ;;  %v600_v62 = vsel %vm525_vm0, %v512_v55, 0.0 }
  0x74   : > { %4637 = vmatmul.mubr.bf16.gmra.mrb[12].mxu0 %v5906_v57  ;;  %v1368_v19 = vrot.slane %v5686_v41, 1  ;;  %v836_v48 = vor.u32 %v835_v39, %v831_v1  ;;  %v5913_v7 = vpack.c.bf16 %v513_v15, %v600_v62  ;;  %v5916_v37 = vsel %vm1337_vm3, %v1365_v9, %v1366_v53  ;;  %v4136_v9 = vld [vmem:[%s5256_s20 + $0xc0] sm:$0xff]   ;;  %v287_v39 = vld [vmem:[%s5256_s20 + $0xc8] sm:$0x1] }
  0x75   : > { %v1369_v54 = vrot.slane %v5692_v29, 1  ;;  %4671 = vmatpush3.bf16.msra.mxu0 %v5127_v2  ;;  %v602_v10 = vsel %vm536_vm1, %v514_v33, 0.0  ;;  %4640 = vmatprep.mubr.bf16.mxu0 %v5916_v37  ;;  %v1371_v43 = vrot.slane %v5729_v14, 1  ;;  %v1372_v41 = vrot.slane %v5743_v22, 1 }
  0x76   : > { %4704 = vmatprep.subr.bf16.mxu0 %v5902_v30  ;;  %v5926_v1 = vsel %vm661_vm2, %v836_v48, %v840_v23  ;;  %v5928_v20 = vpack.c.bf16 %v602_v10, %v602_v10  ;;  %v843_v29 = vshrl.u32 %v5913_v7, 16  ;;  %v845_v2 = vshll.u32 %v5913_v7, 16 }
  0x77   : > { %4412 = vmatprep.mubr.bf16.mxu1 %v5926_v1  ;;  %v5935_v14 = vsel %vm1337_vm3, %v1368_v19, %v1369_v54  ;;  %v5938_v22 = vsel %vm1337_vm3, %v1371_v43, %v1372_v41  ;;  %v1374_v53 = vrot.slane %v5791_v45, 1  ;;  %v1375_v33 = vrot.slane %v5793_v58, 1 }
  0x78   : > { %v847_v63 = vrot.slane %v845_v2, 1  ;;  %v850_v44 = vshll.u32 %v5928_v20, 16  ;;  %v1377_v19 = vrot.slane %v5828_v52, 1  ;;  %v6528_v54 = vmax.f32 %v5520_v16, 0.0 }
  0x79   : > { %v6529_v10 = vmax.f32 %v5527_v32, 0.0  ;;  %v4047_v41 = vunpack.c.l.bf16 %v4136_v9  ;;  %v1378_v45 = vrot.slane %v5833_v59, 1  ;;  %v341_v58 = vunpack.c.l.bf16 %v287_v39 }
  0x7a   : > { %v848_v48 = vor.u32 %v847_v63, %v843_v29  ;;  %v852_v23 = vrot.slane %v850_v44, 1  ;;  %v4048_v29 = vunpack.c.h.bf16 %v4136_v9  ;;  %v6530_v2 = vmax.f32 %v5558_v31, 0.0 }
  0x7b   : > { %v5954_v43 = vpack.c.bf16 %v6529_v10, %v6528_v54  ;;  %v6531_v63 = vmax.f32 %v5567_v42, 0.0  ;;  %v5175_v52 = vmov 0.0|0.0   ;;  %v400_v16 = vmul.f32 %v5769_v5, %v4047_v41 }
  0x7c   : > { %4641 = vmatmul.mubr.bf16.gmra.mrb[16].mxu0 %v5935_v14  ;;  %v5946_v62 = vsel %vm661_vm2, %v848_v48, %v852_v23  ;;  %v6532_v32 = vmax.f32 %v5615_v40, 0.0  ;;  %v6533_v48 = vmax.f32 %v5618_v6, 0.0  ;;  %v6534_v59 = vmax.f32 %v5660_v35, 0.0 }
  0x7d   : > { %4644 = vmatprep.mubr.bf16.mxu0 %v5938_v22  ;;  %4413 = vmatmul.mubr.bf16.gmra.mrb[28].mxu1 %v5946_v62  ;;  %v5962_v44 = vpack.c.bf16 %v6531_v63, %v6530_v2  ;;  %v6535_v9 = vmax.f32 %v5663_v8, 0.0  ;;  %v6536_v42 = vmax.f32 %v5696_v25, 0.0  ;;  %v6537_v39 = vmax.f32 %v5706_v61, 0.0 }
  0x7e   : > { %4432 = vmatprep.mubr.bf16.mxu1 %v5175_v52  ;;  %v5970_v23 = vpack.c.bf16 %v6533_v48, %v6532_v32  ;;  %v401_v10 = vmul.f32 %v5769_v5, %v4048_v29  ;;  %v402_v40 = vmul.f32 %v5769_v5, %v341_v58  ;;  %v6538_v6 = vmax.f32 %v5749_v36, 0.0 }
  0x7f   : > { %v5976_v31 = vpack.c.bf16 %v6535_v9, %v6534_v59  ;;  %v5982_v54 = vpack.c.bf16 %v6537_v39, %v6536_v42  ;;  %v6539_v41 = vmax.f32 %v5752_v17, 0.0  ;;  %v6540_v35 = vmax.f32 %v5801_v46, 0.0 }
  0x80   : > { %v6541_v8 = vmax.f32 %v5805_v0, 0.0  ;;  %v5999_v25 = vsel %vm1337_vm3, %v1374_v53, %v1375_v33  ;;  %v6002_v61 = vadd.f32 %v5798_v21, %v400_v16  ;;  %v6542_v5 = vmax.f32 %v5841_v24, 0.0 }
  0x81   : > { %v5990_v2 = vpack.c.bf16 %v6539_v41, %v6538_v6  ;;  %v6543_v36 = vmax.f32 %v5844_v34, 0.0  ;;  %v6010_v17 = vpack.c.bf16 %v513_v15, %v512_v55  ;;  %v6013_v46 = vsel %vm1337_vm3, %v1377_v19, %v1378_v45  ;;  %v5122_v19 = vld [vmem:[%s6450_s3 + $0x88] sm:$0xff]  }
  0x82   : > { %v5996_v63 = vpack.c.bf16 %v6541_v8, %v6540_v35  ;;  %v6016_v0 = vadd.f32 %v5798_v21, %v401_v10  ;;  %v463_v53 = vadd.f32 %v5798_v21, %v402_v40  ;;  %v6546_v24 = vmax.f32 %v5301_v47, 0.0  ;;  %v6554_v35 = vld [vmem:[#allocation5_spill] sm:$0xff] }
  0x83   : > { %v6008_v29 = vpack.c.bf16 %v6543_v36, %v6542_v5  ;;  %v6547_v34 = vmax.f32 %v5307_v49, 0.0  ;;  %v515_v15 = vmax.f32 %v6002_v61, 0.0  ;;  %v1380_v45 = vrot.slane %v5875_v60, 1  ;;  %v6556_v5 = vld [vmem:[#allocation6_spill] sm:$0xff]  ;;  %v6561_v61 = vld [vmem:[#allocation16_spill] sm:$0xff] }
  0x84   : > { %4645 = vmatmul.mubr.bf16.gmra.mrb[20].mxu0 %v5999_v25  ;;  %v517_v21 = vmax.f32 %v463_v53, 0.0  ;;  %v1381_v58 = vrot.slane %v5882_v11, 1  ;;  %v516_v47 = vmax.f32 %v6016_v0, 0.0  ;;  %v1383_v49 = vrot.slane %v5913_v7, 1  ;;  %v5124_v7 = vld [vmem:[%s6450_s3 + $0x90] sm:$0xff]   ;;  %v5144_v0 = vld [vmem:[%s6450_s3 + $0xe0] sm:$0xff]  }
  0x85   : > { %v6029_v55 = vpack.c.bf16 %v6547_v34, %v6546_v24  ;;  %4648 = vmatprep.mubr.bf16.mxu0 %v6013_v46  ;;  %4433 = vmatmul.mubr.msk.bf16.vlgmr.msra.gmra.mrb[0].mxu1 %vm6021_vm5, %v5318_v56  ;;  %v1384_v16 = vrot.slane %v5928_v20, 1  ;;  %v603_v32 = vsel %vm525_vm0, %v515_v15, 0.0  ;;  %v6550_v9 = vmax.f32 %v5393_v50, 0.0  ;;  %v5128_v50 = vld [vmem:[%s6450_s3 + $0xa0] sm:$0xff]   ;;  %v5130_v24 = vld [vmem:[%s6450_s3 + $0xa8] sm:$0xff]  }
  0x86   : > { %v605_v60 = vsel %vm536_vm1, %v517_v21, 0.0  ;;  %4465 = vmatpush3.bf16.msra.mxu1 %v5585_v38  ;;  %v6059_v11 = vsel %vm1337_vm3, %v1380_v45, %v1381_v58  ;;  %v641_v12 = vpack.c.bf16 %v516_v47, %v603_v32  ;;  %v6549_v38 = vmax.f32 %v5356_v13, 0.0  ;;  %v5131_v58 = vld [vmem:[%s6450_s3 + $0x1c8] sm:$0xff]  }
  0x87   : > { %4436 = vmatprep.mubr.msk.bf16.mxu1 %vm6021_vm5, %v6029_v55  ;;  %4466 = vmatprep.subr.bf16.mxu1 %v5122_v19  ;;  %v642_v20 = vpack.c.bf16 %v605_v60, %v605_v60  ;;  %v6070_v59 = vsel %vm1337_vm3, %v1383_v49, %v1384_v16  ;;  %v6551_v42 = vmax.f32 %v5396_v51, 0.0  ;;  %v6552_v40 = vmax.f32 %v5431_v27, 0.0  ;;  %v5134_v16 = vld [vmem:[%s6450_s3 + $0xb8] sm:$0xff]   ;;  %v5133_v60 = vld [vmem:[%s6450_s3 + $0x1d0] sm:$0xff]  }
  0x88   : > { %v6067_v48 = vpack.c.bf16 %v6549_v38, %v6548_v18  ;;  %v2191_v13 = vrot.slane %v641_v12, 1  ;;  %v6553_v6 = vmax.f32 %v5434_v28, 0.0  ;;  %v6555_v8 = vmax.f32 %v6554_v35, 0.0  ;;  %v5141_v18 = vld [vmem:[%s6450_s3 + $0x1f0] sm:$0xff]   ;;  %v5143_v38 = vld [vmem:[%s6450_s3 + $0x1f8] sm:$0xff]   ;;  %v6560_v35 = vld [vmem:[#allocation14_spill] sm:$0xff] }
  0x89   : > { %v6076_v39 = vpack.c.bf16 %v6551_v42, %v6550_v9  ;;  %v2192_v10 = vrot.slane %v642_v20, 1  ;;  %v6557_v36 = vmax.f32 %v6556_v5, 0.0  ;;  %v1921_v27 = vshll.u32 %v641_v12, 16  ;;  %v5145_v9 = vld [vmem:[%s6450_s3 + $0x200] sm:$0xff]   ;;  %v6564_v5 = vld [vmem:[#allocation20_spill] sm:$0xff] }
  0x8a   : > { %4467 = vmatpush3.bf16.msra.mxu1 %v5122_v19  ;;  %v6099_v41 = vpack.c.bf16 %v6553_v6, %v6552_v40  ;;  %v1919_v28 = vshrl.u32 %v641_v12, 16  ;;  %v1926_v34 = vshll.u32 %v642_v20, 16  ;;  %v5132_v19 = vld [vmem:[%s6450_s3 + $0xb0] sm:$0xff]   ;;  %v5137_v12 = vld [vmem:[%s6450_s3 + $0x1e0] sm:$0xff]   ;;  %v5139_v20 = vld [vmem:[%s6450_s3 + $0x1e8] sm:$0xff]   ;;  %v6206_v42 = vrot.slane %v5175_v52, 1 }
  0x8b   : > { %4468 = vmatprep.subr.bf16.mxu1 %v5124_v7  ;;  %v6093_v51 = vsel %vm1337_vm3, %v2191_v13, %v2192_v10  ;;  %v6105_v53 = vpack.c.bf16 %v6557_v36, %v6555_v8  ;;  %v1923_v21 = vrot.slane %v1921_v27, 1  ;;  %v6558_v13 = vld [vmem:[#allocation10_spill] sm:$0xff]  ;;  %v6559_v10 = vld [vmem:[#allocation12_spill] sm:$0xff]  ;;  %v6236_v40 = vpack.c.bf16 %v516_v47, %v515_v15  ;;  %v5142_v6 = vld [vmem:[%s6450_s3 + $0xd8] sm:$0xff]  }
  0x8c   : > { %4649 = vmatmul.mubr.bf16.gmra.mrb[24].mxu0 %v6059_v11  ;;  %v1928_v45 = vrot.slane %v1926_v34, 1  ;;  %v5146_v15 = vld [vmem:[%s6450_s3 + $0xe8] sm:$0xff]   ;;  %v6563_v8 = vld [vmem:[#allocation18_spill] sm:$0xff]  ;;  %v5148_v36 = vld [vmem:[%s6450_s3 + $0xf0] sm:$0xff]  }
  0x8d   : > { %4652 = vmatprep.mubr.bf16.mxu0 %v6070_v59  ;;  %4437 = vmatmul.mubr.msk.bf16.gmra.mrb[4].mxu1 %vm6021_vm5, %v6067_v48  ;;  %v1924_v49 = vor.u32 %v1923_v21, %v1919_v28  ;;  %v6562_v47 = vld [vmem:[#allocation3_spill] sm:$0xff]  ;;  %v5150_v27 = vld [vmem:[%s6450_s3 + $0xf8] sm:$0xff]   ;;  %v5149_v34 = vld [vmem:[%s6450_s3 + $0x210] sm:$0xff]  }
  0x8e   : > { %4440 = vmatprep.mubr.msk.bf16.mxu1 %vm6021_vm5, %v6076_v39  ;;  %4469 = vmatpush3.bf16.msra.mxu1 %v5124_v7  ;;  %v5135_v7 = vld [vmem:[%s6450_s3 + $0x1d8] sm:$0xff]   ;;  %v6566_v28 = vld [vmem:[#allocation7_spill] sm:$0xff]  ;;  %v6567_v21 = vld [vmem:[#allocation8_spill] sm:$0xff] }
  0x8f   : > { %4470 = vmatprep.subr.bf16.mxu1 %v5126_v4  ;;  %v6133_v32 = vsel %vm661_vm2, %v1924_v49, %v1928_v45  ;;  %v5158_v45 = vld [vmem:[%s6450_s3 + $0x100] sm:$0xff]  }
  0x90   : > { %v5152_v49 = vld [vmem:[%s6450_s3 + $0x220] sm:$0xff]  }
  0x92   : > { %4471 = vmatpush3.bf16.msra.mxu1 %v5126_v4  ;;  %v5138_v4 = vld [vmem:[%s6450_s3 + $0xc8] sm:$0xff]  }
  0x93   : > { %4472 = vmatprep.subr.bf16.mxu1 %v5128_v50 }
  0x94   : > { %4653 = vmatmul.mubr.bf16.gmra.mrb[28].mxu0 %v6093_v51 }
  0x95   : > { %4672 = vmatprep.mubr.msk.bf16.mxu0 %vm6021_vm5, %v6029_v55  ;;  %4441 = vmatmul.mubr.msk.bf16.gmra.mrb[8].mxu1 %vm6021_vm5, %v6099_v41 }
  0x96   : > { %4444 = vmatprep.mubr.msk.bf16.mxu1 %vm6021_vm5, %v6105_v53  ;;  %4473 = vmatpush3.bf16.msra.mxu1 %v5128_v50  ;;  %v5140_v50 = vld [vmem:[%s6450_s3 + $0xd0] sm:$0xff]  }
  0x97   : > { %4474 = vmatprep.subr.bf16.mxu1 %v5130_v24 }
  0x9a   : > { %4475 = vmatpush3.bf16.msra.mxu1 %v5130_v24  ;;  %v6565_v24 = vld [vmem:[#allocation4_spill] sm:$0xff] }
  0x9b   : > { %4476 = vmatprep.subr.bf16.mxu1 %v5132_v19 }
  0x9c   : > { %4673 = vmatmul.mubr.msk.bf16.vlgmr.msra.gmra.mrb[0].mxu0 %vm6021_vm5, %v6067_v48 }
  0x9d   : > { %4705 = vmatpush3.bf16.msra.mxu0 %v5902_v30  ;;  %4676 = vmatprep.mubr.msk.bf16.mxu0 %vm6021_vm5, %v6076_v39  ;;  %v5136_v30 = vld [vmem:[%s6450_s3 + $0xc0] sm:$0xff]  }
  0x9e   : > { %4445 = vmatmul.mubr.msk.bf16.gmra.mrb[12].mxu1 %vm6021_vm5, %v5954_v43  ;;  %4706 = vmatprep.subr.bf16.mxu0 %v5131_v58 }
  0x9f   : > { %4448 = vmatprep.mubr.msk.bf16.mxu1 %vm6021_vm5, %v5962_v44  ;;  %4477 = vmatpush3.bf16.msra.mxu1 %v5132_v19  ;;  %v5151_v19 = vld [vmem:[%s6450_s3 + $0x218] sm:$0xff]  }
  0xa0   : > { %4478 = vmatprep.subr.bf16.mxu1 %v5134_v16 }
  0xa1   : > { %4707 = vmatpush3.bf16.msra.mxu0 %v5131_v58  ;;  %v6568_v58 = vld [vmem:[#allocation9_spill] sm:$0xff] }
  0xa2   : > { %4708 = vmatprep.subr.bf16.mxu0 %v5133_v60 }
  0xa3   : > { %4479 = vmatpush3.bf16.msra.mxu1 %v5134_v16  ;;  %v5153_v16 = vld [vmem:[%s6450_s3 + $0x228] sm:$0xff]  }
  0xa4   : > { %4677 = vmatmul.mubr.msk.bf16.gmra.mrb[4].mxu0 %vm6021_vm5, %v6099_v41  ;;  %4512 = vmatprep.subr.bf16.mxu1 %v5136_v30 }
  0xa5   : > { %4680 = vmatprep.mubr.msk.bf16.mxu0 %vm6021_vm5, %v6105_v53  ;;  %4709 = vmatpush3.bf16.msra.mxu0 %v5133_v60  ;;  %v6569_v60 = vld [vmem:[#allocation11_spill] sm:$0xff] }
  0xa6   : > { %4449 = vmatmul.mubr.msk.bf16.gmra.mrb[16].mxu1 %vm6021_vm5, %v5970_v23  ;;  %4710 = vmatprep.subr.bf16.mxu0 %v5135_v7 }
  0xa7   : > { %4452 = vmatprep.mubr.msk.bf16.mxu1 %vm6021_vm5, %v5976_v31 }
  0xa9   : > { %4711 = vmatpush3.bf16.msra.mxu0 %v5135_v7  ;;  %v5154_v7 = vld [vmem:[%s6450_s3 + $0x230] sm:$0xff]  }
  0xaa   : > { %4712 = vmatprep.subr.bf16.mxu0 %v5137_v12 }
  0xac   : > { %4681 = vmatmul.mubr.msk.bf16.gmra.mrb[8].mxu0 %vm6021_vm5, %v5954_v43 }
  0xad   : > { %4684 = vmatprep.mubr.msk.bf16.mxu0 %vm6021_vm5, %v5962_v44  ;;  %4713 = vmatpush3.bf16.msra.mxu0 %v5137_v12  ;;  %v5155_v12 = vld [vmem:[%s6450_s3 + $0x238] sm:$0xff]  }
  0xae   : > { %4453 = vmatmul.mubr.msk.bf16.gmra.mrb[20].mxu1 %vm6021_vm5, %v5982_v54  ;;  %4714 = vmatprep.subr.bf16.mxu0 %v5139_v20 }
  0xaf   : > { %4456 = vmatprep.mubr.msk.bf16.mxu1 %vm6021_vm5, %v5990_v2 }
  0xb1   : > { %4715 = vmatpush3.bf16.msra.mxu0 %v5139_v20  ;;  %v6571_v20 = vld [vmem:[#allocation15_spill] sm:$0xff] }
  0xb2   : > { %4716 = vmatprep.subr.bf16.mxu0 %v5141_v18 }
  0xb4   : > { %4685 = vmatmul.mubr.msk.bf16.gmra.mrb[12].mxu0 %vm6021_vm5, %v5970_v23 }
  0xb5   : > { %4688 = vmatprep.mubr.msk.bf16.mxu0 %vm6021_vm5, %v5976_v31  ;;  %4717 = vmatpush3.bf16.msra.mxu0 %v5141_v18  ;;  %v6572_v18 = vld [vmem:[#allocation17_spill] sm:$0xff] }
  0xb6   : > { %4457 = vmatmul.mubr.msk.bf16.gmra.mrb[24].mxu1 %vm6021_vm5, %v5996_v63  ;;  %4718 = vmatprep.subr.bf16.mxu0 %v5143_v38 }
  0xb7   : > { %4460 = vmatprep.mubr.msk.bf16.mxu1 %vm6021_vm5, %v6008_v29 }
  0xb9   : > { %4719 = vmatpush3.bf16.msra.mxu0 %v5143_v38  ;;  %v6573_v38 = vld [vmem:[#allocation19_spill] sm:$0xff] }
  0xba   : > { %4752 = vmatprep.subr.bf16.mxu0 %v5145_v9 }
  0xbc   : > { %4689 = vmatmul.mubr.msk.bf16.gmra.mrb[16].mxu0 %vm6021_vm5, %v5982_v54 }
  0xbd   : > { %4692 = vmatprep.mubr.msk.bf16.mxu0 %vm6021_vm5, %v5990_v2 }
  0xbe   : > { %4461 = vmatmul.mubr.msk.bf16.gmra.mrb[28].mxu1 %vm6021_vm5, %v6010_v17 }
  0xbf   : > { %4480 = vmatprep.mubr.bf16.mxu1 %v6206_v42 }
  0xc4   : > { %4693 = vmatmul.mubr.msk.bf16.gmra.mrb[20].mxu0 %vm6021_vm5, %v5996_v63 }
  0xc5   : > { %4696 = vmatprep.mubr.msk.bf16.mxu0 %vm6021_vm5, %v6008_v29 }
  0xc6   : > { %4481 = vmatmul.mubr.bf16.vlgmr.msra.gmra.mrb[0].mxu1 %v6558_v13  ;;  %v5162_v13 = vld [vmem:[%s6450_s3 + $0x120] sm:$0xff]  }
  0xc7   : > { %4513 = vmatpush3.bf16.msra.mxu1 %v5136_v30  ;;  %4484 = vmatprep.mubr.bf16.mxu1 %v6559_v10  ;;  %v6570_v30 = vld [vmem:[#allocation13_spill] sm:$0xff] }
  0xc8   : > { %4514 = vmatprep.subr.bf16.mxu1 %v5138_v4 }
  0xcb   : > { %4515 = vmatpush3.bf16.msra.mxu1 %v5138_v4  ;;  %v5159_v4 = vld [vmem:[%s6450_s3 + $0x108] sm:$0xff]  }
  0xcc   : > { %4516 = vmatprep.subr.bf16.mxu1 %v5140_v50  ;;  %4697 = vmatmul.mubr.msk.bf16.gmra.mrb[24].mxu0 %vm6021_vm5, %v6010_v17 }
  0xcd   : > { %4700 = vmatprep.mubr.msk.bf16.mxu0 %vm6021_vm5, %v6236_v40 }
  0xce   : > { %4485 = vmatmul.mubr.bf16.gmra.mrb[4].mxu1 %v6560_v35 }
  0xcf   : > { %4488 = vmatprep.mubr.bf16.mxu1 %v6561_v61  ;;  %4517 = vmatpush3.bf16.msra.mxu1 %v5140_v50 }
  0xd0   : > { %4518 = vmatprep.subr.bf16.mxu1 %v5142_v6 }
  0xd3   : > { %4519 = vmatpush3.bf16.msra.mxu1 %v5142_v6 }
  0xd4   : > { %4701 = vmatmul.mubr.bf16.gmra.mrb[28].mxu0 %v5175_v52  ;;  %4520 = vmatprep.subr.bf16.mxu1 %v5144_v0  ;;  %v5147_v52 = vld [vmem:[%s6450_s3 + $0x208] sm:$0xff]  }
  0xd5   : > { %4720 = vmatprep.mubr.bf16.mxu0 %v6562_v47 }
  0xd6   : > { %4489 = vmatmul.mubr.bf16.gmra.mrb[8].mxu1 %v6563_v8 }
  0xd7   : > { %4492 = vmatprep.mubr.bf16.mxu1 %v6564_v5  ;;  %4521 = vmatpush3.bf16.msra.mxu1 %v5144_v0 }
  0xd8   : > { %4522 = vmatprep.subr.bf16.mxu1 %v5146_v15 }
  0xdb   : > { %4523 = vmatpush3.bf16.msra.mxu1 %v5146_v15 }
  0xdc   : > { %4721 = vmatmul.mubr.bf16.vlgmr.msra.gmra.mrb[0].mxu0 %v6565_v24  ;;  %4524 = vmatprep.subr.bf16.mxu1 %v5148_v36 }
  0xdd   : > { %4753 = vmatpush3.bf16.msra.mxu0 %v5145_v9  ;;  %4724 = vmatprep.mubr.bf16.mxu0 %v6566_v28  ;;  %v6574_v9 = vld [vmem:[#allocation21_spill] sm:$0xff] }
  0xde   : > { %4493 = vmatmul.mubr.bf16.gmra.mrb[12].mxu1 %v5860_v3  ;;  %4754 = vmatprep.subr.bf16.mxu0 %v5147_v52 }
  0xdf   : > { %4496 = vmatprep.mubr.bf16.mxu1 %v5906_v57  ;;  %4525 = vmatpush3.bf16.msra.mxu1 %v5148_v36 }
  0xe0   : > { %4526 = vmatprep.subr.bf16.mxu1 %v5150_v27 }
  0xe1   : > { %4755 = vmatpush3.bf16.msra.mxu0 %v5147_v52 }
  0xe2   : > { %4756 = vmatprep.subr.bf16.mxu0 %v5149_v34 }
  0xe3   : > { %4527 = vmatpush3.bf16.msra.mxu1 %v5150_v27 }
  0xe4   : > { %4725 = vmatmul.mubr.bf16.gmra.mrb[4].mxu0 %v6567_v21  ;;  %4800 = vmatprep.subr.bf16.mxu1 %v5158_v45 }
  0xe5   : > { %4728 = vmatprep.mubr.bf16.mxu0 %v6568_v58  ;;  %4757 = vmatpush3.bf16.msra.mxu0 %v5149_v34 }
  0xe6   : > { %4497 = vmatmul.mubr.bf16.gmra.mrb[16].mxu1 %v5916_v37  ;;  %4758 = vmatprep.subr.bf16.mxu0 %v5151_v19 }
  0xe7   : > { %4500 = vmatprep.mubr.bf16.mxu1 %v5935_v14 }
  0xe9   : > { %4759 = vmatpush3.bf16.msra.mxu0 %v5151_v19 }
  0xea   : > { %4760 = vmatprep.subr.bf16.mxu0 %v5152_v49 }
  0xec   : > { %4729 = vmatmul.mubr.bf16.gmra.mrb[8].mxu0 %v6569_v60 }
  0xed   : > { %4732 = vmatprep.mubr.bf16.mxu0 %v6570_v30  ;;  %4761 = vmatpush3.bf16.msra.mxu0 %v5152_v49 }
  0xee   : > { %4501 = vmatmul.mubr.bf16.gmra.mrb[20].mxu1 %v5938_v22  ;;  %4762 = vmatprep.subr.bf16.mxu0 %v5153_v16 }
  0xef   : > { %4504 = vmatprep.mubr.bf16.mxu1 %v5999_v25 }
  0xf1   : > { %4763 = vmatpush3.bf16.msra.mxu0 %v5153_v16 }
  0xf2   : > { %4764 = vmatprep.subr.bf16.mxu0 %v5154_v7 }
  0xf4   : > { %4733 = vmatmul.mubr.bf16.gmra.mrb[12].mxu0 %v6571_v20 }
  0xf5   : > { %4736 = vmatprep.mubr.bf16.mxu0 %v6572_v18  ;;  %4765 = vmatpush3.bf16.msra.mxu0 %v5154_v7 }
  0xf6   : > { %4505 = vmatmul.mubr.bf16.gmra.mrb[24].mxu1 %v6013_v46  ;;  %4766 = vmatprep.subr.bf16.mxu0 %v5155_v12 }
  0xf7   : > { %4508 = vmatprep.mubr.bf16.mxu1 %v6059_v11 }
  0xf9   : > { %4767 = vmatpush3.bf16.msra.mxu0 %v5155_v12 }
  0xfc   : > { %4737 = vmatmul.mubr.bf16.gmra.mrb[16].mxu0 %v6573_v38 }
  0xfd   : > { %4740 = vmatprep.mubr.bf16.mxu0 %v5850_v26 }
  0xfe   : > { %4509 = vmatmul.mubr.bf16.gmra.mrb[28].mxu1 %v6070_v59 }
  0xff   : > { %4528 = vmatprep.mubr.msk.bf16.mxu1 %vm6021_vm5, %v5318_v56  ;;  %v5160_v56 = vld [vmem:[%s6450_s3 + $0x110] sm:$0xff]  }
 0x104   : > { %4741 = vmatmul.mubr.bf16.gmra.mrb[20].mxu0 %v6574_v9 }
 0x105   : > { %4744 = vmatprep.mubr.bf16.mxu0 %v5926_v1 }
 0x106   : > { %4529 = vmatmul.mubr.msk.bf16.vlgmr.msra.gmra.mrb[0].mxu1 %vm6021_vm5, %v6029_v55  ;;  %v5161_v55 = vld [vmem:[%s6450_s3 + $0x118] sm:$0xff]  }
 0x107   : > { %4808 = vmatpush3.bf16.msra.mxu1 %v5158_v45  ;;  %4532 = vmatprep.mubr.msk.bf16.mxu1 %vm6021_vm5, %v6067_v48  ;;  %v6575_v48 = vld [vmem:[#allocation2_spill] sm:$0xff] }
 0x108   : > { %4801 = vmatprep.subr.bf16.mxu1 %v5159_v4 }
 0x10b   : > { %4809 = vmatpush3.bf16.msra.mxu1 %v5159_v4 }
 0x10c   : > { %4802 = vmatprep.subr.bf16.mxu1 %v5160_v56  ;;  %4745 = vmatmul.mubr.bf16.gmra.mrb[24].mxu0 %v5946_v62 }
 0x10d   : > { %4748 = vmatprep.mubr.bf16.mxu0 %v6133_v32 }
 0x10e   : > { %4533 = vmatmul.mubr.msk.bf16.gmra.mrb[4].mxu1 %vm6021_vm5, %v6076_v39  ;;  %v5163_v39 = vld [vmem:[%s6450_s3 + $0x128] sm:$0xff]  }
 0x10f   : > { %4536 = vmatprep.mubr.msk.bf16.mxu1 %vm6021_vm5, %v6099_v41  ;;  %4810 = vmatpush3.bf16.msra.mxu1 %v5160_v56  ;;  %v5164_v41 = vld [vmem:[%s6450_s3 + $0x130] sm:$0xff]  }
 0x110   : > { %4803 = vmatprep.subr.bf16.mxu1 %v5161_v55 }
 0x113   : > { %4811 = vmatpush3.bf16.msra.mxu1 %v5161_v55 }
 0x114   : > { %4749 = vmatmul.mubr.bf16.gmra.mrb[28].mxu0 %v6575_v48  ;;  %4804 = vmatprep.subr.bf16.mxu1 %v5162_v13 }
 0x115   : > { %4768 = vmatprep.mubr.bf16.mxu0 %v6559_v10 }
 0x116   : > { %4537 = vmatmul.mubr.msk.bf16.gmra.mrb[8].mxu1 %vm6021_vm5, %v6105_v53 }
 0x117   : > { %4540 = vmatprep.mubr.msk.bf16.mxu1 %vm6021_vm5, %v5954_v43  ;;  %4812 = vmatpush3.bf16.msra.mxu1 %v5162_v13  ;;  %v5165_v43 = vld [vmem:[%s6450_s3 + $0x138] sm:$0xff]  }
 0x118   : > { %4805 = vmatprep.subr.bf16.mxu1 %v5163_v39 }
 0x11b   : > { %4813 = vmatpush3.bf16.msra.mxu1 %v5163_v39 }
 0x11c   : > { %4769 = vmatmul.mubr.bf16.vlgmr.msra.gmra.mrb[0].mxu0 %v6560_v35  ;;  %4806 = vmatprep.subr.bf16.mxu1 %v5164_v41 }
 0x11d   : > { %4772 = vmatprep.mubr.bf16.mxu0 %v6561_v61 }
 0x11e   : > { %4541 = vmatmul.mubr.msk.bf16.gmra.mrb[12].mxu1 %vm6021_vm5, %v5962_v44 }
 0x11f   : > { %4544 = vmatprep.mubr.msk.bf16.mxu1 %vm6021_vm5, %v5970_v23  ;;  %4814 = vmatpush3.bf16.msra.mxu1 %v5164_v41 }
 0x120   : > { %4807 = vmatprep.subr.bf16.mxu1 %v5165_v43 }
 0x123   : > { %4815 = vmatpush3.bf16.msra.mxu1 %v5165_v43 }
 0x124   : > { %4773 = vmatmul.mubr.bf16.gmra.mrb[4].mxu0 %v6563_v8 }
 0x125   : > { %4776 = vmatprep.mubr.bf16.mxu0 %v6564_v5 }
 0x126   : > { %4545 = vmatmul.mubr.msk.bf16.gmra.mrb[16].mxu1 %vm6021_vm5, %v5976_v31 }
 0x127   : > { %4548 = vmatprep.mubr.msk.bf16.mxu1 %vm6021_vm5, %v5982_v54 }
 0x12c   : > { %4777 = vmatmul.mubr.bf16.gmra.mrb[8].mxu0 %v5860_v3 }
 0x12d   : > { %4780 = vmatprep.mubr.bf16.mxu0 %v5906_v57 }
 0x12e   : > { %4549 = vmatmul.mubr.msk.bf16.gmra.mrb[20].mxu1 %vm6021_vm5, %v5990_v2 }
 0x12f   : > { %4552 = vmatprep.mubr.msk.bf16.mxu1 %vm6021_vm5, %v5996_v63 }
 0x134   : > { %4781 = vmatmul.mubr.bf16.gmra.mrb[12].mxu0 %v5916_v37 }
 0x135   : > { %4784 = vmatprep.mubr.bf16.mxu0 %v5935_v14 }
 0x136   : > { %4553 = vmatmul.mubr.msk.bf16.gmra.mrb[24].mxu1 %vm6021_vm5, %v6008_v29 }
 0x137   : > { %4556 = vmatprep.mubr.msk.bf16.mxu1 %vm6021_vm5, %v6010_v17 }
 0x13c   : > { %4785 = vmatmul.mubr.bf16.gmra.mrb[16].mxu0 %v5938_v22 }
 0x13d   : > { %4788 = vmatprep.mubr.bf16.mxu0 %v5999_v25 }
 0x13e   : > { %4557 = vmatmul.mubr.msk.bf16.gmra.mrb[28].mxu1 %vm6021_vm5, %v6236_v40 }
 0x13f   : > { %4592 = vmatprep.mubr.bf16.mxu1 %v6571_v20 }
 0x144   : > { %4789 = vmatmul.mubr.bf16.gmra.mrb[20].mxu0 %v6013_v46 }
 0x145   : > { %4792 = vmatprep.mubr.bf16.mxu0 %v6059_v11 }
 0x146   : > { %4593 = vmatmul.mubr.bf16.vlgmr.msra.gmra.mrb[16].mxu1 %v6572_v18 }
 0x147   : > { %4596 = vmatprep.mubr.bf16.mxu1 %v6573_v38 }
 0x14c   : > { %4793 = vmatmul.mubr.bf16.gmra.mrb[24].mxu0 %v6070_v59 }
 0x14d   : > { %4796 = vmatprep.mubr.bf16.mxu0 %v6093_v51 }
 0x14e   : > { %4597 = vmatmul.mubr.bf16.gmra.mrb[20].mxu1 %v5850_v26 }
 0x14f   : > { %4600 = vmatprep.mubr.bf16.mxu1 %v6574_v9 }
 0x154   : > { %4797 = vmatmul.mubr.bf16.gmra.mrb[28].mxu0 %v6206_v42 }
 0x156   : > { %4601 = vmatmul.mubr.bf16.gmra.mrb[24].mxu1 %v5926_v1 }
 0x157   : > { %4604 = vmatprep.mubr.bf16.mxu1 %v5946_v62 }
 0x15e   : > { %4605 = vmatmul.mubr.bf16.gmra.mrb[28].mxu1 %v6133_v32 }
 0x1d9   : > { %v4530_v3 = vpop.f32.mrb[0].mxu1 }
 0x1da   : > { %v1759_v57 = vpop.f32.mrb[1].mxu1 }
 0x1db   : > { %v4531_v37 = vpop.f32.mrb[2].mxu1 }
 0x1dc   : > { %v1762_v14 = vpop.f32.mrb[3].mxu1 }
 0x1e1   : > { %v4534_v22 = vpop.f32.mrb[4].mxu1 }
 0x1e2   : > { %v1775_v44 = vpop.f32.mrb[5].mxu1 }
 0x1e3   : > { %v4535_v23 = vpop.f32.mrb[6].mxu1 }
 0x1e4   : > { %v1778_v31 = vpop.f32.mrb[7].mxu1 }
 0x1e9   : > { %v4538_v26 = vpop.f32.mrb[8].mxu1 }
 0x1ea   : > { %v1791_v54 = vpop.f32.mrb[9].mxu1 }
 0x1eb   : > { %v4539_v2 = vpop.f32.mrb[10].mxu1 }
 0x1ec   : > { %v1794_v63 = vpop.f32.mrb[11].mxu1 }
 0x1ef   : > { %v4770_v25 = vpop.f32.mrb[0].mxu0 }
 0x1f0   : > { %v4816_v29 = vadd.f32 %v4770_v25, %v4530_v3  ;;  %v3087_v1 = vpop.f32.mrb[1].mxu0 }
 0x1f1   : > { %v6407_v62 = vpop.f32.mrb[12].mxu1  ;;  %v4817_v17 = vadd.f32 %v3087_v1, %v1759_v57  ;;  %v4771_v46 = vpop.f32.mrb[2].mxu0 }
 0x1f2   : > { %v6409_v33 = vpop.f32.mrb[13].mxu1  ;;  %v4818_v11 = vadd.f32 %v4771_v46, %v4531_v37  ;;  %v3090_v59 = vpop.f32.mrb[3].mxu0  ;;  %v3285_v35 = vmul.f32 %v4816_v29, %v4816_v29 }
 0x1f3   : > { %v6411_v51 = vpop.f32.mrb[14].mxu1  ;;  %v4819_v53 = vadd.f32 %v3090_v59, %v1762_v14  ;;  %v3283_v10 = vmul.f32 %v4817_v17, %v4817_v17 }
 0x1f4   : > { %v6418_v32 = vpop.f32.mrb[15].mxu1  ;;  %v4057_v42 = vpack.c.bf16 %v4818_v11, %v4816_v29  ;;  %v3286_v5 = vmul.f32 %v4818_v11, %v4818_v11 }
 0x1f5   : > { %v3246_v50 = vadd.f32 %v4819_v53, %v4817_v17  ;;  %v3284_v40 = vmul.f32 %v4819_v53, %v4819_v53  ;;  %v4052_v6 = vpack.c.bf16 %v4819_v53, %v4817_v17 }
 0x1f6   : > { %4137 = vst [vmem:[%s6416_s11 + $0x8] sm:$0xff] %v4057_v42  }
 0x1f7   : > { %v3247_v61 = vadd.f32 %v4816_v29, %v3246_v50  ;;  %v3315_v0 = vadd.f32 %v3284_v40, %v3283_v10  ;;  %4053 = vst [vmem:[%s6416_s11] sm:$0xff] %v4052_v6   ;;  %v4774_v15 = vpop.f32.mrb[4].mxu0 }
 0x1f8   : > { %v4820_v47 = vadd.f32 %v4774_v15, %v4534_v22  ;;  %v3103_v8 = vpop.f32.mrb[5].mxu0 }
 0x1f9   : > { %v3316_v36 = vadd.f32 %v3315_v0, %v3285_v35  ;;  %v4821_v52 = vadd.f32 %v3103_v8, %v1775_v44  ;;  %v3248_v24 = vadd.f32 %v4818_v11, %v3247_v61  ;;  %v4775_v27 = vpop.f32.mrb[6].mxu0 }
 0x1fa   : > { %v4822_v28 = vadd.f32 %v4775_v27, %v4535_v23  ;;  %v3106_v34 = vpop.f32.mrb[7].mxu0  ;;  %v3289_v12 = vmul.f32 %v4820_v47, %v4820_v47 }
 0x1fb   : > { %v3249_v19 = vadd.f32 %v4821_v52, %v3248_v24  ;;  %v3287_v21 = vmul.f32 %v4821_v52, %v4821_v52  ;;  %v3317_v45 = vadd.f32 %v3316_v36, %v3286_v5  ;;  %v4823_v58 = vadd.f32 %v3106_v34, %v1778_v31 }
 0x1fc   : > { %v4067_v49 = vpack.c.bf16 %v4822_v28, %v4820_v47  ;;  %v3290_v56 = vmul.f32 %v4822_v28, %v4822_v28 }
 0x1fd   : > { %v3318_v16 = vadd.f32 %v3317_v45, %v3287_v21  ;;  %v3250_v60 = vadd.f32 %v4823_v58, %v3249_v19  ;;  %v3288_v30 = vmul.f32 %v4823_v58, %v4823_v58  ;;  %v4062_v7 = vpack.c.bf16 %v4823_v58, %v4821_v52 }
 0x1fe   : > { %4139 = vst [vmem:[%s6416_s11 + $0x18] sm:$0xff] %v4067_v49  }
 0x1ff   : > { %v3251_v20 = vadd.f32 %v4820_v47, %v3250_v60  ;;  %v3319_v18 = vadd.f32 %v3318_v16, %v3288_v30  ;;  %4138 = vst [vmem:[%s6416_s11 + $0x10] sm:$0xff] %v4062_v7   ;;  %v4778_v38 = vpop.f32.mrb[8].mxu0 }
 0x200   : > { %v4824_v9 = vadd.f32 %v4778_v38, %v4538_v26  ;;  %v3119_v4 = vpop.f32.mrb[9].mxu0 }
 0x201   : > { %v3320_v55 = vadd.f32 %v3319_v18, %v3289_v12  ;;  %v4825_v48 = vadd.f32 %v3119_v4, %v1791_v54  ;;  %v3252_v13 = vadd.f32 %v4822_v28, %v3251_v20  ;;  %v4779_v39 = vpop.f32.mrb[10].mxu0 }
 0x202   : > { %v4826_v41 = vadd.f32 %v4779_v39, %v4539_v2  ;;  %v3122_v43 = vpop.f32.mrb[11].mxu0  ;;  %v3293_v26 = vmul.f32 %v4824_v9, %v4824_v9 }
 0x203   : > { %v3253_v3 = vadd.f32 %v4825_v48, %v3252_v13  ;;  %v3291_v57 = vmul.f32 %v4825_v48, %v4825_v48  ;;  %v3321_v37 = vadd.f32 %v3320_v55, %v3290_v56  ;;  %v4827_v14 = vadd.f32 %v3122_v43, %v1794_v63 }
 0x204   : > { %v4077_v22 = vpack.c.bf16 %v4826_v41, %v4824_v9  ;;  %v3294_v2 = vmul.f32 %v4826_v41, %v4826_v41 }
 0x205   : > { %v3322_v44 = vadd.f32 %v3321_v37, %v3291_v57  ;;  %v3254_v23 = vadd.f32 %v4827_v14, %v3253_v3  ;;  %v3292_v31 = vmul.f32 %v4827_v14, %v4827_v14  ;;  %v4072_v25 = vpack.c.bf16 %v4827_v14, %v4825_v48 }
 0x206   : > { %4141 = vst [vmem:[%s6416_s11 + $0x28] sm:$0xff] %v4077_v22  }
 0x207   : > { %v3255_v29 = vadd.f32 %v4824_v9, %v3254_v23  ;;  %v3323_v1 = vadd.f32 %v3322_v44, %v3292_v31  ;;  %4140 = vst [vmem:[%s6416_s11 + $0x20] sm:$0xff] %v4072_v25   ;;  %v4782_v54 = vpop.f32.mrb[12].mxu0 }
 0x208   : > { %v4828_v17 = vadd.f32 %v4782_v54, %v6407_v62  ;;  %v3135_v46 = vpop.f32.mrb[13].mxu0 }
 0x209   : > { %v3324_v11 = vadd.f32 %v3323_v1, %v3293_v26  ;;  %v4829_v59 = vadd.f32 %v3135_v46, %v6409_v33  ;;  %v3256_v63 = vadd.f32 %v4826_v41, %v3255_v29  ;;  %v4783_v53 = vpop.f32.mrb[14].mxu0 }
 0x20a   : > { %v4830_v42 = vadd.f32 %v4783_v53, %v6411_v51  ;;  %v3138_v10 = vpop.f32.mrb[15].mxu0  ;;  %v3297_v8 = vmul.f32 %v4828_v17, %v4828_v17 }
 0x20b   : > { %v3257_v50 = vadd.f32 %v4829_v59, %v3256_v63  ;;  %v3295_v40 = vmul.f32 %v4829_v59, %v4829_v59  ;;  %v3325_v6 = vadd.f32 %v3324_v11, %v3294_v2  ;;  %v4831_v35 = vadd.f32 %v3138_v10, %v6418_v32 }
 0x20c   : > { %v4087_v61 = vpack.c.bf16 %v4830_v42, %v4828_v17  ;;  %v3298_v24 = vmul.f32 %v4830_v42, %v4830_v42 }
 0x20d   : > { %v3326_v0 = vadd.f32 %v3325_v6, %v3295_v40  ;;  %v3258_v62 = vadd.f32 %v4831_v35, %v3257_v50  ;;  %v3296_v15 = vmul.f32 %v4831_v35, %v4831_v35  ;;  %v4082_v47 = vpack.c.bf16 %v4831_v35, %v4829_v59 }
 0x20e   : > { %4143 = vst [vmem:[%s6416_s11 + $0x38] sm:$0xff] %v4087_v61  }
 0x20f   : > { %v3259_v5 = vadd.f32 %v4828_v17, %v3258_v62  ;;  %v3327_v33 = vadd.f32 %v3326_v0, %v3296_v15  ;;  %4142 = vst [vmem:[%s6416_s11 + $0x30] sm:$0xff] %v4082_v47   ;;  %v4786_v36 = vpop.f32.mrb[16].mxu0 }
 0x210   : > { %v3151_v52 = vpop.f32.mrb[17].mxu0 }
 0x211   : > { %v3328_v51 = vadd.f32 %v3327_v33, %v3297_v8  ;;  %v3260_v27 = vadd.f32 %v4830_v42, %v3259_v5  ;;  %v4787_v28 = vpop.f32.mrb[18].mxu0 }
 0x212   : > { %v3154_v34 = vpop.f32.mrb[19].mxu0 }
 0x213   : > { %v3329_v19 = vadd.f32 %v3328_v51, %v3298_v24 }
 0x217   : > { %v4790_v21 = vpop.f32.mrb[20].mxu0 }
 0x218   : > { %v3167_v32 = vpop.f32.mrb[21].mxu0 }
 0x219   : > { %v4594_v45 = vpop.f32.mrb[16].mxu1  ;;  %v4791_v58 = vpop.f32.mrb[22].mxu0 }
 0x21a   : > { %v4832_v49 = vadd.f32 %v4786_v36, %v4594_v45  ;;  %v2094_v16 = vpop.f32.mrb[17].mxu1  ;;  %v3170_v60 = vpop.f32.mrb[23].mxu0 }
 0x21b   : > { %v4833_v30 = vadd.f32 %v3151_v52, %v2094_v16  ;;  %v4595_v7 = vpop.f32.mrb[18].mxu1 }
 0x21c   : > { %v4834_v12 = vadd.f32 %v4787_v28, %v4595_v7  ;;  %v2097_v20 = vpop.f32.mrb[19].mxu1  ;;  %v3301_v43 = vmul.f32 %v4832_v49, %v4832_v49 }
 0x21d   : > { %v3261_v18 = vadd.f32 %v4833_v30, %v3260_v27  ;;  %v3299_v38 = vmul.f32 %v4833_v30, %v4833_v30  ;;  %v4835_v9 = vadd.f32 %v3154_v34, %v2097_v20 }
 0x21e   : > { %v4097_v4 = vpack.c.bf16 %v4834_v12, %v4832_v49  ;;  %v3302_v31 = vmul.f32 %v4834_v12, %v4834_v12 }
 0x21f   : > { %v3330_v56 = vadd.f32 %v3329_v19, %v3299_v38  ;;  %v3262_v55 = vadd.f32 %v4835_v9, %v3261_v18  ;;  %v3300_v48 = vmul.f32 %v4835_v9, %v4835_v9  ;;  %v4092_v13 = vpack.c.bf16 %v4835_v9, %v4833_v30  ;;  %v4794_v39 = vpop.f32.mrb[24].mxu0 }
 0x220   : > { %4145 = vst [vmem:[%s6416_s11 + $0x48] sm:$0xff] %v4097_v4   ;;  %v3183_v41 = vpop.f32.mrb[25].mxu0 }
 0x221   : > { %v3263_v3 = vadd.f32 %v4832_v49, %v3262_v55  ;;  %v3331_v57 = vadd.f32 %v3330_v56, %v3300_v48  ;;  %4144 = vst [vmem:[%s6416_s11 + $0x40] sm:$0xff] %v4092_v13   ;;  %v4598_v37 = vpop.f32.mrb[20].mxu1  ;;  %v4795_v14 = vpop.f32.mrb[26].mxu0 }
 0x222   : > { %v4836_v22 = vadd.f32 %v4790_v21, %v4598_v37  ;;  %v2110_v44 = vpop.f32.mrb[21].mxu1  ;;  %v3186_v23 = vpop.f32.mrb[27].mxu0 }
 0x223   : > { %v3332_v25 = vadd.f32 %v3331_v57, %v3301_v43  ;;  %v4837_v26 = vadd.f32 %v3167_v32, %v2110_v44  ;;  %v3264_v29 = vadd.f32 %v4834_v12, %v3263_v3  ;;  %v4599_v1 = vpop.f32.mrb[22].mxu1 }
 0x224   : > { %v4838_v54 = vadd.f32 %v4791_v58, %v4599_v1  ;;  %v2113_v17 = vpop.f32.mrb[23].mxu1  ;;  %v3305_v35 = vmul.f32 %v4836_v22, %v4836_v22 }
 0x225   : > { %v3265_v46 = vadd.f32 %v4837_v26, %v3264_v29  ;;  %v3303_v2 = vmul.f32 %v4837_v26, %v4837_v26  ;;  %v3333_v11 = vadd.f32 %v3332_v25, %v3302_v31  ;;  %v4839_v59 = vadd.f32 %v3170_v60, %v2113_v17 }
 0x226   : > { %v4107_v63 = vpack.c.bf16 %v4838_v54, %v4836_v22  ;;  %v3306_v33 = vmul.f32 %v4838_v54, %v4838_v54 }
 0x227   : > { %v3334_v53 = vadd.f32 %v3333_v11, %v3303_v2  ;;  %v3266_v42 = vadd.f32 %v4839_v59, %v3265_v46  ;;  %v3304_v10 = vmul.f32 %v4839_v59, %v4839_v59  ;;  %v4102_v50 = vpack.c.bf16 %v4839_v59, %v4837_v26  ;;  %v4798_v40 = vpop.f32.mrb[28].mxu0 }
 0x228   : > { %4147 = vst [vmem:[%s6416_s11 + $0x58] sm:$0xff] %v4107_v63   ;;  %v3199_v6 = vpop.f32.mrb[29].mxu0 }
 0x229   : > { %v3267_v61 = vadd.f32 %v4836_v22, %v3266_v42  ;;  %v3335_v0 = vadd.f32 %v3334_v53, %v3304_v10  ;;  %4146 = vst [vmem:[%s6416_s11 + $0x50] sm:$0xff] %v4102_v50   ;;  %v4602_v62 = vpop.f32.mrb[24].mxu1  ;;  %v4799_v15 = vpop.f32.mrb[30].mxu0 }
 0x22a   : > { %v4840_v47 = vadd.f32 %v4794_v39, %v4602_v62  ;;  %v2126_v8 = vpop.f32.mrb[25].mxu1  ;;  %v3202_v5 = vpop.f32.mrb[31].mxu0 }
 0x22b   : > { %v3336_v36 = vadd.f32 %v3335_v0, %v3305_v35  ;;  %v4841_v52 = vadd.f32 %v3183_v41, %v2126_v8  ;;  %v3268_v24 = vadd.f32 %v4838_v54, %v3267_v61  ;;  %v4603_v51 = vpop.f32.mrb[26].mxu1 }
 0x22c   : > { %v4842_v27 = vadd.f32 %v4795_v14, %v4603_v51  ;;  %v2129_v28 = vpop.f32.mrb[27].mxu1  ;;  %v3309_v30 = vmul.f32 %v4840_v47, %v4840_v47 }
 0x22d   : > { %v3269_v34 = vadd.f32 %v4841_v52, %v3268_v24  ;;  %v3307_v19 = vmul.f32 %v4841_v52, %v4841_v52  ;;  %v3337_v21 = vadd.f32 %v3336_v36, %v3306_v33  ;;  %v4843_v32 = vadd.f32 %v3186_v23, %v2129_v28 }
 0x22e   : > { %v4117_v45 = vpack.c.bf16 %v4842_v27, %v4840_v47  ;;  %v3310_v9 = vmul.f32 %v4842_v27, %v4842_v27 }
 0x22f   : > { %v3338_v58 = vadd.f32 %v3337_v21, %v3307_v19  ;;  %v3270_v49 = vadd.f32 %v4843_v32, %v3269_v34  ;;  %v3308_v16 = vmul.f32 %v4843_v32, %v4843_v32  ;;  %v4112_v60 = vpack.c.bf16 %v4843_v32, %v4841_v52 }
 0x230   : > { %4149 = vst [vmem:[%s6416_s11 + $0x68] sm:$0xff] %v4117_v45  }
 0x231   : > { %v3271_v7 = vadd.f32 %v4840_v47, %v3270_v49  ;;  %v3339_v12 = vadd.f32 %v3338_v58, %v3308_v16  ;;  %4148 = vst [vmem:[%s6416_s11 + $0x60] sm:$0xff] %v4112_v60   ;;  %v4606_v20 = vpop.f32.mrb[28].mxu1 }
 0x232   : > { %v4844_v18 = vadd.f32 %v4798_v40, %v4606_v20  ;;  %v2142_v38 = vpop.f32.mrb[29].mxu1 }
 0x233   : > { %v3340_v4 = vadd.f32 %v3339_v12, %v3309_v30  ;;  %v4845_v56 = vadd.f32 %v3199_v6, %v2142_v38  ;;  %v3272_v55 = vadd.f32 %v4842_v27, %v3271_v7  ;;  %v4607_v48 = vpop.f32.mrb[30].mxu1 }
 0x234   : > { %v4846_v13 = vadd.f32 %v4799_v15, %v4607_v48  ;;  %v2145_v39 = vpop.f32.mrb[31].mxu1  ;;  %v3313_v31 = vmul.f32 %v4844_v18, %v4844_v18 }
 0x235   : > { %v3273_v41 = vadd.f32 %v4845_v56, %v3272_v55  ;;  %v3311_v43 = vmul.f32 %v4845_v56, %v4845_v56  ;;  %v3341_v3 = vadd.f32 %v3340_v4, %v3310_v9  ;;  %v4847_v57 = vadd.f32 %v3202_v5, %v2145_v39 }
 0x236   : > { %v4127_v37 = vpack.c.bf16 %v4846_v13, %v4844_v18  ;;  %v3314_v29 = vmul.f32 %v4846_v13, %v4846_v13 }
 0x237   : > { %v3342_v14 = vadd.f32 %v3341_v3, %v3311_v43  ;;  %v3274_v22 = vadd.f32 %v4847_v57, %v3273_v41  ;;  %v3312_v44 = vmul.f32 %v4847_v57, %v4847_v57  ;;  %v4122_v23 = vpack.c.bf16 %v4847_v57, %v4845_v56 }
 0x238   : > { %4151 = vst [vmem:[%s6416_s11 + $0x78] sm:$0xff] %v4127_v37  }
 0x239   : > { %v3275_v25 = vadd.f32 %v4844_v18, %v3274_v22  ;;  %v3343_v26 = vadd.f32 %v3342_v14, %v3312_v44  ;;  %4150 = vst [vmem:[%s6416_s11 + $0x70] sm:$0xff] %v4122_v23  }
 0x23b   : > { %v3276_v1 = vadd.f32 %v4846_v13, %v3275_v25  ;;  %v3344_v54 = vadd.f32 %v3343_v26, %v3313_v31 }
 0x23d   : > { %v3277_v17 = vrot.slane %v3276_v1, 4  ;;  %v3345_v46 = vadd.f32 %v3344_v54, %v3314_v29 }
 0x23f   : > { %v3278_v2 = vadd.f32 %v3277_v17, %v3276_v1  ;;  %v3346_v11 = vrot.slane %v3345_v46, 4 }
 0x241   : > { %v3279_v59 = vrot.slane %v3278_v2, 2  ;;  %v3347_v63 = vadd.f32 %v3346_v11, %v3345_v46 }
 0x243   : > { %v3280_v53 = vadd.f32 %v3279_v59, %v3278_v2  ;;  %v3348_v42 = vrot.slane %v3347_v63, 2 }
 0x245   : > { %v3281_v10 = vrot.slane %v3280_v53, 1  ;;  %v3349_v50 = vadd.f32 %v3348_v42, %v3347_v63 }
 0x247   : > { %v3350_v40 = vrot.slane %v3349_v50, 1  ;;  %v3282_v6 = vadd.f32 %v3281_v10, %v3280_v53 }
 0x249   : > { %v3351_v35 = vadd.f32 %v3350_v40, %v3349_v50 }
 0x24b   : > { %v3353_v61 = vsel %vm3352_vm6, %v3282_v6, %v3351_v35 }
 0x24c   : > { %3354 = vst [vmem:[%s235_s15] sm:$0x3] %v3353_v61 }
 0x24d PF: > { %s16_s18 = sadd.s32 1, %s5172_s18  }
 0x24e   : > { %p13_p4 = scmp.ge.s32.totalorder %s16_s18, 4  }
 0x250   :  { %15 = sbr.rel (!%p13_p4) target bundleno = 1 (0x1), region = 86 }

</bundles_post_ra>
